<compile_context>
chip_gen: v7x
topology: tpu7x:2x2x1
jax: 0.10.0
libtpu: 0.0.40
codegen_flags: <defaults>
</compile_context>

<pallas_src>
import functools

import jax
import jax.numpy as jnp
from jax.experimental import pallas as pl
from jax.experimental.pallas import tpu as pltpu


def sequence_head_kernel(x4_ref, labels_ref, w1_ref, b1_ref, w2_ref, b2_ref,
                         out_ref, *, num_classes):
    # x4 = tanh([sent | pos | doc*sent | doc-sent]); drop() is identity in eval mode.
    # TODO(synk): training-mode dropout would need pltpu.prng_seed / prng_random_bits.
    x = jnp.tanh(x4_ref[...]).astype(jnp.bfloat16)                       # [T, 4H]
    h = jnp.dot(x, w1_ref[...], preferred_element_type=jnp.float32) + b1_ref[...]
    h = jnp.tanh(h).astype(jnp.bfloat16)                                  # [T, H]

    # pred Linear, lane-padded to 128 output columns. Padded columns carry bias -1e30,
    # so they do not perturb max/logsumexp below.
    logits = jnp.dot(h, w2_ref[...], preferred_element_type=jnp.float32) + b2_ref[...]

    # CrossEntropyLoss(reduction='none') per row.
    # TODO(synk): criterion is defined by subclasses; CrossEntropyLoss assumed here,
    # labels outside [0, num_classes) (e.g. ignore_index) are not supported.
    m = jnp.max(logits, axis=-1, keepdims=True)
    lse = m + jnp.log(jnp.sum(jnp.exp(logits - m), axis=-1, keepdims=True))   # [T, 1]
    lane_ids = jax.lax.broadcasted_iota(jnp.int32, logits.shape, 1)           # [T, 128]
    picked = jnp.sum(jnp.where(lane_ids == labels_ref[...], logits, 0.0),
                     axis=-1, keepdims=True)                                  # [T, 1]
    loss_col = lse - picked                                                   # [T, 1]

    # Single lane-dense store: logits in lanes 0..C-1, per-example CE in lane C.
    out_ref[...] = jnp.where(lane_ids == num_classes, loss_col, logits)


def sequence_head_forward(sent, pos, doc, labels, w1t, b1, w2t, b2, *, tile_n=4096):
    """Returns (loss_scalar, pred[N, C]) matching SequenceHeadBase.forward."""
    N, H = sent.shape
    C = w2t.shape[-1]

    # Lane-dense packed input, built once by XLA (one fused elementwise op): [N, 4H].
    x4 = jnp.concatenate([sent, pos, doc * sent, doc - sent], axis=-1)
    labels2 = labels.reshape(N, 1).astype(jnp.int32)

    # Tile sizing: sublane-aligned, as large as requested, but keep >= 2 grid steps
    # when N allows so the "parallel" axis shards across v7x's two TensorCores.
    half = max(8, (((N + 1) // 2 + 7) // 8) * 8)
    tile_n = max(8, (min(tile_n, half) // 8) * 8)
    n_tiles = pl.cdiv(N, tile_n)
    n_pad = n_tiles * tile_n
    if n_pad != N:
        # Only the single packed input (and the tiny labels array) is ever padded.
        x4 = jnp.pad(x4, ((0, n_pad - N), (0, 0)))
        labels2 = jnp.pad(labels2, ((0, n_pad - N), (0, 0)))

    # Pad the output-classes axis to a lane-dense width; lane C carries the CE loss.
    C_out = ((C + 1 + 127) // 128) * 128

    # bf16 MXU operands (f32 accumulation stays in-kernel); biases stay f32.
    w1_bf = w1t.astype(jnp.bfloat16)                                          # [4H, H]
    b1f = b1.reshape(1, H).astype(jnp.float32)
    w2_pad = jnp.zeros((H, C_out), jnp.bfloat16).at[:, :C].set(w2t.astype(jnp.bfloat16))
    b2_pad = jnp.full((1, C_out), -1e30, jnp.float32).at[:, :C].set(
        b2.reshape(1, C).astype(jnp.float32))

    row4_spec = pl.BlockSpec((tile_n, 4 * H), lambda i: (i, 0))
    lbl_spec = pl.BlockSpec((tile_n, 1), lambda i: (i, 0))
    resident = lambda shape: pl.BlockSpec(shape, lambda i: (0, 0))            # fetched once
    out_spec = pl.BlockSpec((tile_n, C_out), lambda i: (i, 0))

    cost = pl.CostEstimate(
        flops=2 * n_pad * (4 * H * H + H * C_out),
        transcendentals=n_pad * (5 * H + C_out),                  # tanh + exp
        bytes_accessed=(n_pad * 4 * H + n_pad) * 4                # packed input + labels
                       + n_pad * C_out * 4                        # output slab
                       + (4 * H * H + H * C_out) * 2 + (H + C_out) * 4,  # weights/biases
    )

    slab = pl.pallas_call(
        functools.partial(sequence_head_kernel, num_classes=C),
        grid=(n_tiles,),
        in_specs=[
            row4_spec, lbl_spec,                                  # packed x4, labels
            resident((4 * H, H)), resident((1, H)),               # pre_pred W^T, b
            resident((H, C_out)), resident((1, C_out)),           # pred W^T, b (lane-padded)
        ],
        out_specs=out_spec,
        out_shape=jax.ShapeDtypeStruct((n_pad, C_out), jnp.float32),
        compiler_params=pltpu.CompilerParams(
            dimension_semantics=("parallel",)),
        cost_estimate=cost,
    )(x4, labels2, w1_bf, b1f, w2_pad, b2_pad)

    pred = slab[:N, :C]                                           # logits, lanes 0..C-1
    per_example = slab[:N, C]                                     # CE loss, lane C
    loss = jnp.sum(per_example) / N                               # torch.mean over true N
    return loss, pred


def xavier_uniform(key, out_features, in_features):
    a = (6.0 / (in_features + out_features)) ** 0.5
    # torch weight shape is [out, in]; sample in that shape then transpose for the kernel.
    w = jax.random.uniform(key, (out_features, in_features), jnp.float32, -a, a)
    return jnp.transpose(w)  # [in, out]


def reference_forward(sent, pos, doc, labels, w1t, b1, w2t, b2):
    concat = jnp.concatenate([sent, pos, doc * sent, doc - sent], axis=-1)
    h = jnp.tanh(concat) @ w1t + b1
    logits = jnp.tanh(h) @ w2t + b2
    lse = jax.scipy.special.logsumexp(logits, axis=-1)
    picked = jnp.take_along_axis(logits, labels.reshape(-1, 1), axis=-1)[:, 0]
    return jnp.mean(lse - picked), logits


if __name__ == "__main__":
    # N sentences, hidden_dim, num_classes (H=32 -> concat dim = 128 lanes).
    N, H, C = 1024, 32, 4
    key = jax.random.PRNGKey(0)
    k_sent, k_pos, k_doc, k_lab, k_w1, k_w2 = jax.random.split(key, 6)

    sentence_embs = jax.random.normal(k_sent, (N, H), jnp.float32)
    position_embs = jax.random.normal(k_pos, (N, H), jnp.float32)
    doc_embedding = jax.random.normal(k_doc, (N, H), jnp.float32)
    labels = jax.random.randint(k_lab, (N,), 0, C, jnp.int32)

    # pre_pred: Linear(4H -> H), xavier_uniform weight, zero bias.
    w1t = xavier_uniform(k_w1, H, 4 * H)          # [4H, H]
    b1 = jnp.zeros((1, H), jnp.float32)
    # pred: Linear(H -> C), xavier_uniform weight, zero bias.
    w2t = xavier_uniform(k_w2, C, H)              # [H, C]
    b2 = jnp.zeros((1, C), jnp.float32)

    fwd = jax.jit(functools.partial(sequence_head_forward, tile_n=4096))
    loss, pred = fwd(sentence_embs, position_embs, doc_embedding, labels,
                     w1t, b1, w2t, b2)
    jax.block_until_ready((loss, pred))

    ref_loss, ref_pred = reference_forward(sentence_embs, position_embs,
                                           doc_embedding, labels, w1t, b1, w2t, b2)

    assert pred.shape == (N, C) and loss.shape == ()
    assert bool(jnp.all(jnp.isfinite(pred))) and bool(jnp.isfinite(loss))
    assert jnp.allclose(pred, ref_pred, atol=0.05, rtol=0.05), "pred mismatch vs reference"
    assert jnp.allclose(loss, ref_loss, atol=0.03), "loss mismatch vs reference"
    print("KERNEL_OK")
</pallas_src>

<mosaic_0001>
module attributes {stable_mosaic.version = 11 : i64} {
  func.func @sequence_head_kernel(%arg0: i32, %arg1: memref<512x128xf32, #tpu.memory_space<vmem>>, %arg2: memref<512x1xi32, #tpu.memory_space<vmem>>, %arg3: memref<128x32xbf16, #tpu.memory_space<vmem>>, %arg4: memref<1x32xf32, #tpu.memory_space<vmem>>, %arg5: memref<32x128xbf16, #tpu.memory_space<vmem>>, %arg6: memref<1x128xf32, #tpu.memory_space<vmem>>, %arg7: memref<512x128xf32, #tpu.memory_space<vmem>>) attributes {dimension_semantics = [#tpu.dimension_semantics<parallel>], iteration_bounds = array<i64: 2>, scalar_prefetch = 0 : i64, scratch_operands = 0 : i64, tpu.core_type = #tpu.core_type<tc>, window_params = [{transform_indices = @transform_0, window_bounds = array<i64: 512, 128>}, {transform_indices = @transform_1, window_bounds = array<i64: 512, 1>}, {pipeline_mode = #tpu.pipeline_mode<synchronous>, transform_indices = @transform_2, window_bounds = array<i64: 128, 32>}, {pipeline_mode = #tpu.pipeline_mode<synchronous>, transform_indices = @transform_3, window_bounds = array<i64: 1, 32>}, {pipeline_mode = #tpu.pipeline_mode<synchronous>, transform_indices = @transform_4, window_bounds = array<i64: 32, 128>}, {pipeline_mode = #tpu.pipeline_mode<synchronous>, transform_indices = @transform_5, window_bounds = array<i64: 1, 128>}, {transform_indices = @transform_6, window_bounds = array<i64: 512, 128>}]} {
    %c0 = arith.constant 0 : index
    %c0_0 = arith.constant 0 : index
    %0 = vector.load %arg1[%c0, %c0_0] : memref<512x128xf32, #tpu.memory_space<vmem>>, vector<512x128xf32>
    %1 = math.tanh %0 : vector<512x128xf32>
    %2 = arith.truncf %1 : vector<512x128xf32> to vector<512x128xbf16>
    %c0_1 = arith.constant 0 : index
    %c0_2 = arith.constant 0 : index
    %3 = vector.load %arg3[%c0_1, %c0_2] : memref<128x32xbf16, #tpu.memory_space<vmem>>, vector<128x32xbf16>
    %cst = arith.constant dense<0.000000e+00> : vector<512x32xf32>
    %4 = tpu.matmul %2, %3, %cst {dimension_numbers = #tpu.dot_dimension_numbers<[1], [0], [0], [1], [0, 0, 1, 1], [], []>} : vector<512x128xbf16>, vector<128x32xbf16>, vector<512x32xf32> -> vector<512x32xf32>
    %c0_3 = arith.constant 0 : index
    %c0_4 = arith.constant 0 : index
    %5 = vector.load %arg4[%c0_3, %c0_4] : memref<1x32xf32, #tpu.memory_space<vmem>>, vector<1x32xf32>
    %6 = vector.broadcast %5 : vector<1x32xf32> to vector<512x32xf32>
    %7 = arith.addf %4, %6 : vector<512x32xf32>
    %8 = math.tanh %7 : vector<512x32xf32>
    %9 = arith.truncf %8 : vector<512x32xf32> to vector<512x32xbf16>
    %c0_5 = arith.constant 0 : index
    %c0_6 = arith.constant 0 : index
    %10 = vector.load %arg5[%c0_5, %c0_6] : memref<32x128xbf16, #tpu.memory_space<vmem>>, vector<32x128xbf16>
    %cst_7 = arith.constant dense<0.000000e+00> : vector<512x128xf32>
    %11 = tpu.matmul %9, %10, %cst_7 {dimension_numbers = #tpu.dot_dimension_numbers<[1], [0], [0], [1], [0, 0, 1, 1], [], []>} : vector<512x32xbf16>, vector<32x128xbf16>, vector<512x128xf32> -> vector<512x128xf32>
    %c0_8 = arith.constant 0 : index
    %c0_9 = arith.constant 0 : index
    %12 = vector.load %arg6[%c0_8, %c0_9] : memref<1x128xf32, #tpu.memory_space<vmem>>, vector<1x128xf32>
    %13 = vector.broadcast %12 : vector<1x128xf32> to vector<512x128xf32>
    %14 = arith.addf %11, %13 : vector<512x128xf32>
    %cst_10 = arith.constant dense<0xFF800000> : vector<512xf32>
    %15 = vector.multi_reduction <maximumf>, %14, %cst_10 [1] : vector<512x128xf32> to vector<512xf32>
    %16 = vector.shape_cast %15 : vector<512xf32> to vector<512x1xf32>
    %17 = vector.broadcast %16 : vector<512x1xf32> to vector<512x128xf32>
    %18 = arith.subf %14, %17 : vector<512x128xf32>
    %19 = math.exp %18 : vector<512x128xf32>
    %cst_11 = arith.constant dense<0.000000e+00> : vector<512xf32>
    %20 = vector.multi_reduction <add>, %19, %cst_11 [1] : vector<512x128xf32> to vector<512xf32>
    %21 = vector.shape_cast %20 : vector<512xf32> to vector<512x1xf32>
    %22 = math.log %21 : vector<512x1xf32>
    %23 = arith.addf %16, %22 : vector<512x1xf32>
    %24 = tpu.iota {dimensions = array<i32: 1>} : vector<512x128xi32>
    %c0_12 = arith.constant 0 : index
    %c0_13 = arith.constant 0 : index
    %25 = vector.load %arg2[%c0_12, %c0_13] : memref<512x1xi32, #tpu.memory_space<vmem>>, vector<512x1xi32>
    %26 = vector.broadcast %25 : vector<512x1xi32> to vector<512x128xi32>
    %27 = arith.cmpi eq, %24, %26 : vector<512x128xi32>
    %cst_14 = arith.constant 0.000000e+00 : f32
    %28 = vector.broadcast %cst_14 : f32 to vector<512x128xf32>
    %29 = arith.select %27, %14, %28 : vector<512x128xi1>, vector<512x128xf32>
    %cst_15 = arith.constant dense<0.000000e+00> : vector<512xf32>
    %30 = vector.multi_reduction <add>, %29, %cst_15 [1] : vector<512x128xf32> to vector<512xf32>
    %31 = vector.shape_cast %30 : vector<512xf32> to vector<512x1xf32>
    %32 = arith.subf %23, %31 : vector<512x1xf32>
    %c4_i32 = arith.constant 4 : i32
    %33 = vector.broadcast %c4_i32 : i32 to vector<512x128xi32>
    %34 = arith.cmpi eq, %24, %33 : vector<512x128xi32>
    %35 = vector.shape_cast %32 : vector<512x1xf32> to vector<512x1xf32>
    %36 = vector.broadcast %35 : vector<512x1xf32> to vector<512x128xf32>
    %37 = arith.select %34, %36, %14 : vector<512x128xi1>, vector<512x128xf32>
    %c0_16 = arith.constant 0 : index
    %c0_17 = arith.constant 0 : index
    %38 = vector.load %arg7[%c0_16, %c0_17] : memref<512x128xf32, #tpu.memory_space<vmem>>, vector<512x128xf32>
    tpu.vector_store %arg7[%c0_16, %c0_17], %37 {strides = array<i32>} : memref<512x128xf32, #tpu.memory_space<vmem>>, vector<512x128xf32>,
    return
  }
  func.func @transform_0(%arg0: i32) -> (i32, i32) {
    %c0_i32 = arith.constant 0 : i32
    %c0_i32_0 = arith.constant 0 : i32
    return %arg0, %c0_i32 : i32, i32
  }
  func.func @transform_1(%arg0: i32) -> (i32, i32) {
    %c0_i32 = arith.constant 0 : i32
    %c0_i32_0 = arith.constant 0 : i32
    return %arg0, %c0_i32 : i32, i32
  }
  func.func @transform_2(%arg0: i32) -> (i32, i32) {
    %c0_i32 = arith.constant 0 : i32
    %c0_i32_0 = arith.constant 0 : i32
    %c0_i32_1 = arith.constant 0 : i32
    return %c0_i32, %c0_i32_0 : i32, i32
  }
  func.func @transform_3(%arg0: i32) -> (i32, i32) {
    %c0_i32 = arith.constant 0 : i32
    %c0_i32_0 = arith.constant 0 : i32
    %c0_i32_1 = arith.constant 0 : i32
    return %c0_i32, %c0_i32_0 : i32, i32
  }
  func.func @transform_4(%arg0: i32) -> (i32, i32) {
    %c0_i32 = arith.constant 0 : i32
    %c0_i32_0 = arith.constant 0 : i32
    %c0_i32_1 = arith.constant 0 : i32
    return %c0_i32, %c0_i32_0 : i32, i32
  }
  func.func @transform_5(%arg0: i32) -> (i32, i32) {
    %c0_i32 = arith.constant 0 : i32
    %c0_i32_0 = arith.constant 0 : i32
    %c0_i32_1 = arith.constant 0 : i32
    return %c0_i32, %c0_i32_0 : i32, i32
  }
  func.func @transform_6(%arg0: i32) -> (i32, i32) {
    %c0_i32 = arith.constant 0 : i32
    %c0_i32_0 = arith.constant 0 : i32
    return %arg0, %c0_i32 : i32, i32
  }
}

</mosaic_0001>

<bundles_post_ra>
// kernel: sequence_head_forward.1
= control target key start
LH: loop header
LB: loop body
LE: loop exit
PB: predicated region body
PF: predicated region fallthrough
CT: control target
= control target key end

     0   :  { %s3574_s21 = smov 0   ;;  %s5324_s0 = inlined_call_operand.vmem [shape: f32[1024,128], index: 0, kind: input, shape index: {}]   ;;  %s5325_s1 = inlined_call_operand.vmem [shape: s32[1024,1], index: 1, kind: input, shape index: {}]   ;;  %s5326_s2 = inlined_call_operand.vmem [shape: bf16[128,32], index: 2, kind: input, shape index: {}]   ;;  %s5327_s3 = inlined_call_operand.vmem [shape: f32[1,32], index: 3, kind: input, shape index: {}]   ;;  %s5328_s4 = inlined_call_operand.vmem [shape: bf16[32,128], index: 4, kind: input, shape index: {}]   ;;  %s5329_s5 = inlined_call_operand.vmem [shape: f32[1,128], index: 5, kind: input, shape index: {}]   ;;  %s5330_s6 = inlined_call_operand.vmem [shape: f32[1024,128], index: 6, kind: output, shape index: {}]  }
   0x1 LB: > { %s2718_s22 = sadd.s32 4294967295, %s3536_s21   ;;  %p2722_p0 = scmp.ge.s32.totalorder %s3536_s21, 1  ;;  %s3536_s21 = sphi %s3574_s21, %s16_s21  }
   0x2   : > { %p224_p1 = scmp.lt.s32.totalorder %s3536_s21, 3 }
   0x4   : > { %p225_p2 = pnand %p2722_p0, %p224_p1 }
   0x6   : > { %228 = sbr.rel (%p225_p2) target bundleno = 1047 (0x417), region = 44 }
   0xd   : > { %v3008_v0 = vld [vmem:[%s5326_s2] sm:$0xff]   ;;  %s2723_s25 = sshll.u32 %s2718_s22, 6  ;;  %v3009_v1 = vld [vmem:[%s5326_s2 + $0x8] sm:$0xff]   ;;  %v3010_v2 = vld [vmem:[%s5326_s2 + $0x10] sm:$0xff]   ;;  %v3538_v24 = vmov 0   ;;  %vm917_vm0 = vcmask 261120  }
   0xe   : > { %p260_p3 = scmp.lt.s32.totalorder %s2723_s25, 127  ;;  %2849 = vmatprep.subr.bf16.mxu0 %v3008_v0  ;;  %v3011_v3 = vld [vmem:[%s5326_s2 + $0x18] sm:$0xff]   ;;  %v3012_v6 = vld [vmem:[%s5326_s2 + $0x20] sm:$0xff]   ;;  %v3013_v11 = vld [vmem:[%s5326_s2 + $0x28] sm:$0xff]   ;;  %3007 = vset.pattern.permute.xlu1 %v3538_v24 }
   0xf   : > { %2850 = vmatpush3.bf16.msra.mxu0 %v3008_v0  ;;  %v3014_v14 = vld [vmem:[%s5326_s2 + $0x30] sm:$0xff]   ;;  %v3015_v20 = vld [vmem:[%s5326_s2 + $0x38] sm:$0xff]   ;;  %3006 = vset.pattern.permute.xlu0 %v3538_v24 }
  0x10   : > { %s5804_s25 = smov (!%p260_p3, %s2723_s25), 127  ;;  %2851 = vmatprep.subr.bf16.mxu0 %v3009_v1 }
  0x11   : > { %s3591_s30 = sshll.u32 %s5804_s25, 3 }
  0x12   : > { %s3597_s9 = scalar_lea.vmem %s5324_s0, %s3591_s30  ;;  %s3628_s23 = scalar_lea.vmem %s5325_s1, %s3591_s30 }
  0x13   : > { %2852 = vmatpush3.bf16.msra.mxu0 %v3009_v1  ;;  %v278_v4 = vld [vmem:[%s3597_s9] sm:$0xff]  ;;  %v279_v5 = vld [vmem:[%s3597_s9 + $0x8] sm:$0xff]  ;;  %v280_v7 = vld [vmem:[%s3597_s9 + $0x10] sm:$0xff]  ;;  %s4929_s11 = scalar_lea.vmem %s5330_s6, %s3591_s30 }
  0x14   : > { %2853 = vmatprep.subr.bf16.mxu0 %v3010_v2  ;;  %3018 = vtanh.f32 %v278_v4  ;;  %v281_v8 = vld [vmem:[%s3597_s9 + $0x18] sm:$0xff]  ;;  %v282_v9 = vld [vmem:[%s3597_s9 + $0x20] sm:$0xff]  ;;  %v283_v10 = vld [vmem:[%s3597_s9 + $0x28] sm:$0xff] }
  0x15   : > { %3020 = vtanh.f32 %v279_v5  ;;  %v284_v15 = vld [vmem:[%s3597_s9 + $0x30] sm:$0xff]  ;;  %v285_v17 = vld [vmem:[%s3597_s9 + $0x38] sm:$0xff]  ;;  %v286_v18 = vld [vmem:[%s3597_s9 + $0x40] sm:$0xff] }
  0x16   : > { %3022 = vtanh.f32 %v280_v7  ;;  %v287_v19 = vld [vmem:[%s3597_s9 + $0x48] sm:$0xff]  ;;  %v288_v26 = vld [vmem:[%s3597_s9 + $0x50] sm:$0xff]  ;;  %v289_v27 = vld [vmem:[%s3597_s9 + $0x58] sm:$0xff] }
  0x17   : > { %2854 = vmatpush3.bf16.msra.mxu0 %v3010_v2  ;;  %3024 = vtanh.f32 %v281_v8  ;;  %v1946_v28 = vld [vmem:[%s3628_s23 + $0x8] sm:$0xff]  ;;  %v290_v30 = vld [vmem:[%s3597_s9 + $0x60] sm:$0xff]  ;;  %v1947_v33 = vld [vmem:[%s3628_s23 + $0x10] sm:$0xff] }
  0x18   : > { %2855 = vmatprep.subr.bf16.mxu0 %v3011_v3  ;;  %3026 = vtanh.f32 %v282_v9  ;;  %2013 = vperm.xlu1 %3007, %v1946_v28   ;;  %v291_v32 = vld [vmem:[%s3597_s9 + $0x68] sm:$0xff]  ;;  %v1945_v36 = vld [vmem:[%s3628_s23] sm:$0xff]  ;;  %v1948_v38 = vld [vmem:[%s3628_s23 + $0x18] sm:$0xff] }
  0x19   : > { %3028 = vtanh.f32 %v283_v10  ;;  %2010 = vperm.xlu0 %3006, %v1945_v36   ;;  %v292_v40 = vld [vmem:[%s3597_s9 + $0x70] sm:$0xff]  ;;  %v1954_v41 = vld [vmem:[%s3628_s23 + $0x48] sm:$0xff]  ;;  %v293_v42 = vld [vmem:[%s3597_s9 + $0x78] sm:$0xff] }
  0x1a   : > { %3030 = vtanh.f32 %v284_v15  ;;  %v294_v43 = vld [vmem:[%s3597_s9 + $0x80] sm:$0xff]  ;;  %v295_v46 = vld [vmem:[%s3597_s9 + $0x88] sm:$0xff]  ;;  %v1956_v48 = vld [vmem:[%s3628_s23 + $0x58] sm:$0xff] }
  0x1b   : > { %2856 = vmatpush3.bf16.msra.mxu0 %v3011_v3  ;;  %3032 = vtanh.f32 %v285_v17  ;;  %v1949_v47 = vld [vmem:[%s3628_s23 + $0x20] sm:$0xff]  ;;  %v1950_v52 = vld [vmem:[%s3628_s23 + $0x28] sm:$0xff]  ;;  %v296_v54 = vld [vmem:[%s3597_s9 + $0x90] sm:$0xff] }
  0x1c   : > { %2857 = vmatprep.subr.bf16.mxu0 %v3012_v6  ;;  %3034 = vtanh.f32 %v286_v18  ;;  %2016 = vperm.xlu1 %3007, %v1947_v33   ;;  %v1958_v55 = vld [vmem:[%s3628_s23 + $0x68] sm:$0xff]  ;;  %v297_v56 = vld [vmem:[%s3597_s9 + $0x98] sm:$0xff]  ;;  %v298_v58 = vld [vmem:[%s3597_s9 + $0xa0] sm:$0xff] }
  0x1d   : > { %3036 = vtanh.f32 %v287_v19  ;;  %2037 = vperm.xlu0 %3006, %v1954_v41   ;;  %v299_v60 = vld [vmem:[%s3597_s9 + $0xa8] sm:$0xff]  ;;  %v1951_v61 = vld [vmem:[%s3628_s23 + $0x30] sm:$0xff]  ;;  %v1960_v62 = vld [vmem:[%s3628_s23 + $0x78] sm:$0xff] }
  0x1e   : > { %v3019_v12 = vpop.eup %3018  ;;  %3038 = vtanh.f32 %v288_v26  ;;  %v1952_v2 = vld [vmem:[%s3628_s23 + $0x38] sm:$0xff]  ;;  %v300_v4 = vld [vmem:[%s3597_s9 + $0xb0] sm:$0xff]  ;;  %v1962_v5 = vld [vmem:[%s3628_s23 + $0x88] sm:$0xff] }
  0x1f   : > { %2858 = vmatpush3.bf16.msra.mxu0 %v3012_v6  ;;  %v3021_v13 = vpop.eup %3020  ;;  %3040 = vtanh.f32 %v289_v27  ;;  %v301_v6 = vld [vmem:[%s3597_s9 + $0xb8] sm:$0xff]  ;;  %v302_v8 = vld [vmem:[%s3597_s9 + $0xc0] sm:$0xff]  ;;  %v303_v10 = vld [vmem:[%s3597_s9 + $0xc8] sm:$0xff] }
  0x20   : > { %2859 = vmatprep.subr.bf16.mxu0 %v3013_v11  ;;  %v406_v16 = vpack.c.bf16 %v3021_v13, %v3019_v12  ;;  %v3023_v21 = vpop.eup %3022  ;;  %3042 = vtanh.f32 %v290_v30  ;;  %2019 = vperm.xlu1 %3007, %v1948_v38   ;;  %v1955_v15 = vld [vmem:[%s3628_s23 + $0x50] sm:$0xff]  ;;  %v305_v18 = vld [vmem:[%s3597_s9 + $0xd8] sm:$0xff] }
  0x21   : > { %v3025_v22 = vpop.eup %3024  ;;  %3044 = vtanh.f32 %v291_v32  ;;  %2043 = vperm.xlu0 %3006, %v1956_v48   ;;  %v304_v17 = vld [vmem:[%s3597_s9 + $0xd0] sm:$0xff]  ;;  %v309_v30 = vld [vmem:[%s3597_s9 + $0xf8] sm:$0xff]  ;;  %v310_v32 = vld [vmem:[%s3597_s9 + $0x100] sm:$0xff] }
  0x22   : > { %2865 = vmatprep.mubr.bf16.mxu0 %v406_v16  ;;  %v3027_v23 = vpop.eup %3026  ;;  %v407_v29 = vpack.c.bf16 %v3025_v22, %v3023_v21  ;;  %3046 = vtanh.f32 %v292_v40  ;;  %v307_v22 = vld [vmem:[%s3597_s9 + $0xe8] sm:$0xff]  ;;  %v1959_v27 = vld [vmem:[%s3628_s23 + $0x70] sm:$0xff] }
  0x23   : > { %2860 = vmatpush3.bf16.msra.mxu0 %v3013_v11  ;;  %v3029_v25 = vpop.eup %3028  ;;  %3048 = vtanh.f32 %v293_v42  ;;  %v1953_v11 = vld [vmem:[%s3628_s23 + $0x40] sm:$0xff]  ;;  %v312_v41 = vld [vmem:[%s3597_s9 + $0x110] sm:$0xff]  ;;  %v313_v42 = vld [vmem:[%s3597_s9 + $0x118] sm:$0xff] }
  0x24   : > { %2861 = vmatprep.subr.bf16.mxu0 %v3014_v14  ;;  %v408_v31 = vpack.c.bf16 %v3029_v25, %v3027_v23  ;;  %v3031_v34 = vpop.eup %3030  ;;  %3050 = vtanh.f32 %v294_v43  ;;  %2022 = vperm.xlu1 %3007, %v1949_v47   ;;  %v1957_v23 = vld [vmem:[%s3628_s23 + $0x60] sm:$0xff] }
  0x25   : > { %v3033_v35 = vpop.eup %3032  ;;  %3052 = vtanh.f32 %v295_v46  ;;  %2049 = vperm.xlu0 %3006, %v1958_v55   ;;  %v315_v46 = vld [vmem:[%s3597_s9 + $0x128] sm:$0xff]  ;;  %v1965_v47 = vld [vmem:[%s3628_s23 + $0xa0] sm:$0xff] }
  0x26   : > { %v3035_v37 = vpop.eup %3034  ;;  %v409_v44 = vpack.c.bf16 %v3033_v35, %v3031_v34  ;;  %3054 = vtanh.f32 %v296_v54  ;;  %v311_v34 = vld [vmem:[%s3597_s9 + $0x108] sm:$0xff]  ;;  %v1961_v35 = vld [vmem:[%s3628_s23 + $0x80] sm:$0xff]  ;;  %v317_v54 = vld [vmem:[%s3597_s9 + $0x138] sm:$0xff] }
  0x27   : > { %2862 = vmatpush3.bf16.msra.mxu0 %v3014_v14  ;;  %v3037_v39 = vpop.eup %3036  ;;  %3056 = vtanh.f32 %v297_v56  ;;  %v318_v56 = vld [vmem:[%s3597_s9 + $0x140] sm:$0xff] }
  0x28   : > { %2863 = vmatprep.subr.bf16.mxu0 %v3015_v20  ;;  %v410_v45 = vpack.c.bf16 %v3037_v39, %v3035_v37  ;;  %v3039_v49 = vpop.eup %3038  ;;  %2025 = vperm.xlu1 %3007, %v1950_v52   ;;  %3058 = vtanh.f32 %v298_v58  ;;  %v1963_v39 = vld [vmem:[%s3628_s23 + $0x90] sm:$0xff]  ;;  %v319_v58 = vld [vmem:[%s3597_s9 + $0x148] sm:$0xff] }
  0x29   : > { %v3041_v50 = vpop.eup %3040  ;;  %3060 = vtanh.f32 %v299_v60  ;;  %2055 = vperm.xlu0 %3006, %v1960_v62  }
  0x2a   : > { %v3043_v51 = vpop.eup %3042  ;;  %v411_v57 = vpack.c.bf16 %v3041_v50, %v3039_v49  ;;  %3062 = vtanh.f32 %v300_v4  ;;  %v322_v4 = vld [vmem:[%s3597_s9 + $0x160] sm:$0xff] }
  0x2b   : > { %2864 = vmatpush3.bf16.msra.mxu0 %v3015_v20  ;;  %v3045_v53 = vpop.eup %3044  ;;  %3064 = vtanh.f32 %v301_v6  ;;  %v306_v20 = vld [vmem:[%s3597_s9 + $0xe0] sm:$0xff]  ;;  %v323_v6 = vld [vmem:[%s3597_s9 + $0x168] sm:$0xff] }
  0x2c   : > { %v412_v59 = vpack.c.bf16 %v3045_v53, %v3043_v51  ;;  %v3047_v63 = vpop.eup %3046  ;;  %2028 = vperm.xlu1 %3007, %v1951_v61   ;;  %3066 = vtanh.f32 %v302_v8  ;;  %v1967_v51 = vld [vmem:[%s3628_s23 + $0xb0] sm:$0xff] }
  0x2d   : > { %v3049_v0 = vpop.eup %3048  ;;  %2061 = vperm.xlu0 %3006, %v1962_v5   ;;  %3068 = vtanh.f32 %v303_v10  ;;  %v316_v53 = vld [vmem:[%s3597_s9 + $0x130] sm:$0xff] }
  0x2e   : > { %2866 = vmatmul.mubr.bf16.vlgmr.msra.gmra.mrb[0].mxu0 %v407_v29  ;;  %v3051_v1 = vpop.eup %3050  ;;  %v413_v7 = vpack.c.bf16 %v3049_v0, %v3047_v63  ;;  %3070 = vtanh.f32 %v304_v17  ;;  %v308_v29 = vld [vmem:[%s3597_s9 + $0xf0] sm:$0xff] }
  0x2f   : > { %2869 = vmatprep.mubr.bf16.mxu0 %v408_v31  ;;  %v3053_v3 = vpop.eup %3052  ;;  %3072 = vtanh.f32 %v305_v18  ;;  %v1971_v63 = vld [vmem:[%s3628_s23 + $0xd0] sm:$0xff]  ;;  %v327_v18 = vld [vmem:[%s3597_s9 + $0x188] sm:$0xff] }
  0x30   : > { %2031 = vperm.xlu1 %3007, %v1952_v2   ;;  %v414_v9 = vpack.c.bf16 %v3053_v3, %v3051_v1  ;;  %v3055_v12 = vpop.eup %3054  ;;  %3074 = vtanh.f32 %v306_v20  ;;  %v320_v1 = vld [vmem:[%s3597_s9 + $0x150] sm:$0xff]  ;;  %v321_v2 = vld [vmem:[%s3597_s9 + $0x158] sm:$0xff] }
  0x31   : > { %v3057_v13 = vpop.eup %3056  ;;  %3076 = vtanh.f32 %v307_v22 }
  0x32   : > { %v3059_v14 = vpop.eup %3058  ;;  %v415_v19 = vpack.c.bf16 %v3057_v13, %v3055_v12  ;;  %3078 = vtanh.f32 %v308_v29  ;;  %v324_v13 = vld [vmem:[%s3597_s9 + $0x170] sm:$0xff] }
  0x33   : > { %v3061_v16 = vpop.eup %3060  ;;  %3080 = vtanh.f32 %v309_v30 }
  0x34   : > { %2034 = vperm.xlu1 %3007, %v1953_v11   ;;  %v416_v21 = vpack.c.bf16 %v3061_v16, %v3059_v14  ;;  %v3063_v24 = vpop.eup %3062  ;;  %3082 = vtanh.f32 %v310_v32  ;;  %v1975_v11 = vld [vmem:[%s3628_s23 + $0xf0] sm:$0xff]  ;;  %v325_v14 = vld [vmem:[%s3597_s9 + $0x178] sm:$0xff]  ;;  %v326_v16 = vld [vmem:[%s3597_s9 + $0x180] sm:$0xff] }
  0x35   : > { %v3065_v25 = vpop.eup %3064  ;;  %3084 = vtanh.f32 %v311_v34  ;;  %v333_v34 = vld [vmem:[%s3597_s9 + $0x1b8] sm:$0xff] }
  0x36   : > { %2870 = vmatmul.mubr.bf16.gmra.mrb[4].mxu0 %v409_v44  ;;  %v3067_v26 = vpop.eup %3066  ;;  %v417_v31 = vpack.c.bf16 %v3065_v25, %v3063_v24  ;;  %v314_v44 = vld [vmem:[%s3597_s9 + $0x120] sm:$0xff]  ;;  %3086 = vtanh.f32 %v312_v41  ;;  %v329_v24 = vld [vmem:[%s3597_s9 + $0x198] sm:$0xff] }
  0x37   : > { %2873 = vmatprep.mubr.bf16.mxu0 %v410_v45  ;;  %v3069_v28 = vpop.eup %3068  ;;  %3088 = vtanh.f32 %v313_v42 }
  0x38   : > { %2040 = vperm.xlu1 %3007, %v1955_v15   ;;  %v418_v33 = vpack.c.bf16 %v3069_v28, %v3067_v26  ;;  %v3071_v36 = vpop.eup %3070  ;;  %3090 = vtanh.f32 %v314_v44  ;;  %v330_v26 = vld [vmem:[%s3597_s9 + $0x1a0] sm:$0xff]  ;;  %v331_v28 = vld [vmem:[%s3597_s9 + $0x1a8] sm:$0xff]  ;;  %v1979_v44 = vld [vmem:[%s3628_s23 + $0x110] sm:$0xff] }
  0x39   : > { %v3073_v37 = vpop.eup %3072  ;;  %3092 = vtanh.f32 %v315_v46 }
  0x3a   : > { %v3075_v38 = vpop.eup %3074  ;;  %v419_v43 = vpack.c.bf16 %v3073_v37, %v3071_v36  ;;  %3094 = vtanh.f32 %v316_v53  ;;  %v334_v36 = vld [vmem:[%s3597_s9 + $0x1c0] sm:$0xff] }
  0x3b   : > { %v3077_v40 = vpop.eup %3076  ;;  %3096 = vtanh.f32 %v317_v54  ;;  %v1981_v53 = vld [vmem:[%s3628_s23 + $0x120] sm:$0xff] }
  0x3c   : > { %2046 = vperm.xlu1 %3007, %v1957_v23   ;;  %v420_v45 = vpack.c.bf16 %v3077_v40, %v3075_v38  ;;  %v3079_v48 = vpop.eup %3078  ;;  %3098 = vtanh.f32 %v318_v56  ;;  %v328_v23 = vld [vmem:[%s3597_s9 + $0x190] sm:$0xff]  ;;  %v335_v38 = vld [vmem:[%s3597_s9 + $0x1c8] sm:$0xff]  ;;  %v1964_v40 = vld [vmem:[%s3628_s23 + $0x98] sm:$0xff] }
  0x3d   : > { %v3081_v49 = vpop.eup %3080  ;;  %3100 = vtanh.f32 %v319_v58  ;;  %2067 = vperm.xlu0 %3006, %v1964_v40   ;;  %v3016_v54 = vld [vmem:[%s5328_s4] sm:$0xff]   ;;  %v2004_v40 = vld [vmem:[%s3628_s23 + $0x1d8] sm:$0xff] }
  0x3e   : > { %2874 = vmatmul.mubr.bf16.gmra.mrb[8].mxu0 %v411_v57  ;;  %v3083_v50 = vpop.eup %3082  ;;  %v421_v55 = vpack.c.bf16 %v3081_v49, %v3079_v48  ;;  %3102 = vtanh.f32 %v320_v1  ;;  %v337_v48 = vld [vmem:[%s3597_s9 + $0x1d8] sm:$0xff]  ;;  %2929 = vmatprep.subr.bf16.mxu1 %v3016_v54 }
  0x3f   : > { %2877 = vmatprep.mubr.bf16.mxu0 %v412_v59  ;;  %v3085_v52 = vpop.eup %3084  ;;  %v1969_v59 = vld [vmem:[%s3628_s23 + $0xc0] sm:$0xff]  ;;  %3104 = vtanh.f32 %v321_v2  ;;  %2930 = vmatpush3.bf16.msra.mxu1 %v3016_v54  ;;  %v341_v1 = vld [vmem:[%s3597_s9 + $0x1f8] sm:$0xff] }
  0x40   : > { %2052 = vperm.xlu1 %3007, %v1959_v27   ;;  %v422_v57 = vpack.c.bf16 %v3085_v52, %v3083_v50  ;;  %v3087_v60 = vpop.eup %3086  ;;  %3106 = vtanh.f32 %v322_v4  ;;  %v338_v50 = vld [vmem:[%s3597_s9 + $0x1e0] sm:$0xff]  ;;  %v339_v52 = vld [vmem:[%s3597_s9 + $0x1e8] sm:$0xff]  ;;  %v1972_v4 = vld [vmem:[%s3628_s23 + $0xd8] sm:$0xff] }
  0x41   : > { %v3089_v61 = vpop.eup %3088  ;;  %3108 = vtanh.f32 %v323_v6 }
  0x42   : > { %v3091_v62 = vpop.eup %3090  ;;  %v423_v3 = vpack.c.bf16 %v3089_v61, %v3087_v60  ;;  %3110 = vtanh.f32 %v324_v13  ;;  %v3017_v60 = vld [vmem:[%s5328_s4 + $0x8] sm:$0xff]   ;;  %v1989_v13 = vld [vmem:[%s3628_s23 + $0x160] sm:$0xff] }
  0x43   : > { %v3093_v0 = vpop.eup %3092  ;;  %3112 = vtanh.f32 %v325_v14  ;;  %v1970_v61 = vld [vmem:[%s3628_s23 + $0xc8] sm:$0xff]  ;;  %2931 = vmatprep.subr.bf16.mxu1 %v3017_v60  ;;  %v1976_v14 = vld [vmem:[%s3628_s23 + $0xf8] sm:$0xff] }
  0x44   : > { %2058 = vperm.xlu1 %3007, %v1961_v35   ;;  %v424_v5 = vpack.c.bf16 %v3093_v0, %v3091_v62  ;;  %v3095_v8 = vpop.eup %3094  ;;  %3114 = vtanh.f32 %v326_v16  ;;  %2932 = vmatpush3.bf16.msra.mxu1 %v3017_v60 }
  0x45   : > { %3116 = vtanh.f32 %v327_v18  ;;  %v1978_v18 = vld [vmem:[%s3628_s23 + $0x108] sm:$0xff] }
  0x46   : > { %2878 = vmatmul.mubr.bf16.gmra.mrb[12].mxu0 %v413_v7  ;;  %v1973_v7 = vld [vmem:[%s3628_s23 + $0xe0] sm:$0xff]  ;;  %3118 = vtanh.f32 %v328_v23  ;;  %v1982_v23 = vld [vmem:[%s3628_s23 + $0x128] sm:$0xff] }
  0x47   : > { %2881 = vmatprep.mubr.bf16.mxu0 %v414_v9  ;;  %v3097_v9 = vpop.eup %3096  ;;  %3120 = vtanh.f32 %v329_v24  ;;  %v1997_v24 = vld [vmem:[%s3628_s23 + $0x1a0] sm:$0xff] }
  0x48   : > { %2064 = vperm.xlu1 %3007, %v1963_v39   ;;  %v3099_v10 = vpop.eup %3098  ;;  %v425_v15 = vpack.c.bf16 %v3097_v9, %v3095_v8  ;;  %3122 = vtanh.f32 %v330_v26  ;;  %v1977_v39 = vld [vmem:[%s3628_s23 + $0x100] sm:$0xff]  ;;  %v1987_v8 = vld [vmem:[%s3628_s23 + $0x150] sm:$0xff]  ;;  %v1974_v9 = vld [vmem:[%s3628_s23 + $0xe8] sm:$0xff] }
  0x49   : > { %v3101_v12 = vpop.eup %3100  ;;  %3124 = vtanh.f32 %v331_v28  ;;  %v1999_v26 = vld [vmem:[%s3628_s23 + $0x1b0] sm:$0xff]  ;;  %v2001_v28 = vld [vmem:[%s3628_s23 + $0x1c0] sm:$0xff] }
  0x4a   : > { %v426_v17 = vpack.c.bf16 %v3101_v12, %v3099_v10 }
  0x4c   : > { %2070 = vperm.xlu1 %3007, %v1965_v47   ;;  %v336_v47 = vld [vmem:[%s3597_s9 + $0x1d0] sm:$0xff] }
  0x4e   : > { %2882 = vmatmul.mubr.bf16.gmra.mrb[16].mxu0 %v415_v19  ;;  %v3103_v19 = vpop.eup %3102 }
  0x4f   : > { %2885 = vmatprep.mubr.bf16.mxu0 %v416_v21  ;;  %v3105_v20 = vpop.eup %3104 }
  0x50   : > { %2076 = vperm.xlu1 %3007, %v1967_v51   ;;  %v3107_v21 = vpop.eup %3106  ;;  %v427_v25 = vpack.c.bf16 %v3105_v20, %v3103_v19  ;;  %v1993_v20 = vld [vmem:[%s3628_s23 + $0x180] sm:$0xff] }
  0x51   : > { %v3109_v22 = vpop.eup %3108 }
  0x52   : > { %v428_v27 = vpack.c.bf16 %v3109_v22, %v3107_v21  ;;  %v3111_v29 = vpop.eup %3110  ;;  %v1980_v21 = vld [vmem:[%s3628_s23 + $0x118] sm:$0xff]  ;;  %v1995_v22 = vld [vmem:[%s3628_s23 + $0x190] sm:$0xff] }
  0x53   : > { %v3113_v30 = vpop.eup %3112 }
  0x54   : > { %2082 = vperm.xlu1 %3007, %v1969_v59   ;;  %v429_v35 = vpack.c.bf16 %v3113_v30, %v3111_v29  ;;  %v1983_v59 = vld [vmem:[%s3628_s23 + $0x130] sm:$0xff]  ;;  %v1988_v29 = vld [vmem:[%s3628_s23 + $0x158] sm:$0xff] }
  0x55   : > { %v2003_v30 = vld [vmem:[%s3628_s23 + $0x1d0] sm:$0xff] }
  0x56   : > { %2886 = vmatmul.mubr.bf16.gmra.mrb[20].mxu0 %v417_v31  ;;  %v3115_v31 = vpop.eup %3114 }
  0x57   : > { %2889 = vmatprep.mubr.bf16.mxu0 %v418_v33  ;;  %v3117_v32 = vpop.eup %3116  ;;  %v332_v33 = vld [vmem:[%s3597_s9 + $0x1b0] sm:$0xff] }
  0x58   : > { %2088 = vperm.xlu1 %3007, %v1971_v63   ;;  %v430_v37 = vpack.c.bf16 %v3117_v32, %v3115_v31  ;;  %3126 = vtanh.f32 %v332_v33  ;;  %v3119_v41 = vpop.eup %3118  ;;  %v340_v63 = vld [vmem:[%s3597_s9 + $0x1f0] sm:$0xff]  ;;  %v1990_v31 = vld [vmem:[%s3628_s23 + $0x168] sm:$0xff]  ;;  %v2005_v32 = vld [vmem:[%s3628_s23 + $0x1e0] sm:$0xff] }
  0x59   : > { %3128 = vtanh.f32 %v333_v34  ;;  %v3121_v42 = vpop.eup %3120  ;;  %v1992_v33 = vld [vmem:[%s3628_s23 + $0x178] sm:$0xff]  ;;  %v2007_v34 = vld [vmem:[%s3628_s23 + $0x1f0] sm:$0xff] }
  0x5a   : > { %3130 = vtanh.f32 %v334_v36  ;;  %v431_v49 = vpack.c.bf16 %v3121_v42, %v3119_v41  ;;  %v1996_v36 = vld [vmem:[%s3628_s23 + $0x198] sm:$0xff]  ;;  %v2006_v41 = vld [vmem:[%s3628_s23 + $0x1e8] sm:$0xff] }
  0x5b   : > { %3132 = vtanh.f32 %v335_v38  ;;  %v2000_v38 = vld [vmem:[%s3628_s23 + $0x1b8] sm:$0xff] }
  0x5c   : > { %2094 = vperm.xlu1 %3007, %v1973_v7   ;;  %3134 = vtanh.f32 %v336_v47  ;;  %v2008_v42 = vld [vmem:[%s3628_s23 + $0x1f8] sm:$0xff] }
  0x5d   : > { %3136 = vtanh.f32 %v337_v48 }
  0x5e   : > { %2890 = vmatmul.mubr.bf16.gmra.mrb[24].mxu0 %v419_v43  ;;  %v3123_v43 = vpop.eup %3122  ;;  %3138 = vtanh.f32 %v338_v50 }
  0x5f   : > { %2893 = vmatprep.mubr.bf16.mxu0 %v420_v45  ;;  %v1966_v45 = vld [vmem:[%s3628_s23 + $0xa8] sm:$0xff]  ;;  %v3125_v46 = vpop.eup %3124  ;;  %3140 = vtanh.f32 %v339_v52 }
  0x60   : > { %2100 = vperm.xlu1 %3007, %v1975_v11   ;;  %2073 = vperm.xlu0 %3006, %v1966_v45   ;;  %v432_v51 = vpack.c.bf16 %v3125_v46, %v3123_v43  ;;  %3142 = vtanh.f32 %v340_v63  ;;  %v3757_v43 = vld [vmem:[%s5327_s3] ss:$0 sm:$0xff] }
  0x61   : > { %3144 = vtanh.f32 %v341_v1 }
  0x62   : > { %v3127_v56 = vpop.eup %3126 }
  0x64   : > { %2106 = vperm.xlu1 %3007, %v1977_v39   ;;  %v2002_v39 = vld [vmem:[%s3628_s23 + $0x1c8] sm:$0xff] }
  0x66   : > { %2894 = vmatmul.mubr.bf16.gmra.mrb[28].mxu0 %v421_v55  ;;  %v1968_v55 = vld [vmem:[%s3628_s23 + $0xb8] sm:$0xff] }
  0x67   : > { %2897 = vmatprep.mubr.bf16.mxu0 %v422_v57  ;;  %2079 = vperm.xlu0 %3006, %v1968_v55   ;;  %v3129_v57 = vpop.eup %3128 }
  0x68   : > { %2112 = vperm.xlu1 %3007, %v1979_v44   ;;  %v3131_v58 = vpop.eup %3130  ;;  %v433_v0 = vpack.c.bf16 %v3129_v57, %v3127_v56 }
  0x69   : > { %v3133_v62 = vpop.eup %3132 }
  0x6a   : > { %v434_v2 = vpack.c.bf16 %v3133_v62, %v3131_v58 }
  0x6b   : > { %2085 = vperm.xlu0 %3006, %v1970_v61  }
  0x6c   : > { %2118 = vperm.xlu1 %3007, %v1981_v53  }
  0x6e   : > { %2898 = vmatmul.mubr.bf16.gmra.mrb[32].mxu0 %v423_v3  ;;  %v1985_v3 = vld [vmem:[%s3628_s23 + $0x140] sm:$0xff] }
  0x6f   : > { %2901 = vmatprep.mubr.bf16.mxu0 %v424_v5  ;;  %v3135_v5 = vpop.eup %3134  ;;  %2091 = vperm.xlu0 %3006, %v1972_v4  }
  0x70   : > { %2124 = vperm.xlu1 %3007, %v1983_v59   ;;  %v3137_v6 = vpop.eup %3136 }
  0x71   : > { %v3139_v7 = vpop.eup %3138  ;;  %v435_v11 = vpack.c.bf16 %v3137_v6, %v3135_v5 }
  0x72   : > { %v3141_v10 = vpop.eup %3140 }
  0x73   : > { %2097 = vperm.xlu0 %3006, %v1974_v9   ;;  %v436_v12 = vpack.c.bf16 %v3141_v10, %v3139_v7 }
  0x74   : > { %2130 = vperm.xlu1 %3007, %v1985_v3  }
  0x76   : > { %2902 = vmatmul.mubr.bf16.gmra.mrb[36].mxu0 %v425_v15  ;;  %v3143_v15 = vpop.eup %3142 }
  0x77   : > { %2905 = vmatprep.mubr.bf16.mxu0 %v426_v17  ;;  %2103 = vperm.xlu0 %3006, %v1976_v14   ;;  %v3145_v16 = vpop.eup %3144  ;;  %v1991_v17 = vld [vmem:[%s3628_s23 + $0x170] sm:$0xff] }
  0x78   : > { %2136 = vperm.xlu1 %3007, %v1987_v8   ;;  %v437_v19 = vpack.c.bf16 %v3145_v16, %v3143_v15 }
  0x7b   : > { %2109 = vperm.xlu0 %3006, %v1978_v18  }
  0x7c   : > { %2142 = vperm.xlu1 %3007, %v1989_v13  }
  0x7e   : > { %2906 = vmatmul.mubr.bf16.gmra.mrb[40].mxu0 %v427_v25  ;;  %v1984_v25 = vld [vmem:[%s3628_s23 + $0x138] sm:$0xff] }
  0x7f   : > { %2909 = vmatprep.mubr.bf16.mxu0 %v428_v27  ;;  %2115 = vperm.xlu0 %3006, %v1980_v21   ;;  %v1986_v27 = vld [vmem:[%s3628_s23 + $0x148] sm:$0xff] }
  0x80   : > { %2148 = vperm.xlu1 %3007, %v1991_v17  }
  0x83   : > { %2121 = vperm.xlu0 %3006, %v1982_v23  }
  0x84   : > { %2154 = vperm.xlu1 %3007, %v1993_v20  }
  0x86   : > { %2910 = vmatmul.mubr.bf16.gmra.mrb[44].mxu0 %v429_v35  ;;  %v1994_v35 = vld [vmem:[%s3628_s23 + $0x188] sm:$0xff] }
  0x87   : > { %2913 = vmatprep.mubr.bf16.mxu0 %v430_v37  ;;  %2127 = vperm.xlu0 %3006, %v1984_v25   ;;  %v1998_v37 = vld [vmem:[%s3628_s23 + $0x1a8] sm:$0xff] }
  0x88   : > { %2160 = vperm.xlu1 %3007, %v1995_v22  }
  0x8b   : > { %2133 = vperm.xlu0 %3006, %v1986_v27  }
  0x8c   : > { %2166 = vperm.xlu1 %3007, %v1997_v24  }
  0x8e   : > { %2914 = vmatmul.mubr.bf16.gmra.mrb[48].mxu0 %v431_v49 }
  0x8f   : > { %2917 = vmatprep.mubr.bf16.mxu0 %v432_v51  ;;  %2139 = vperm.xlu0 %3006, %v1988_v29  }
  0x90   : > { %2172 = vperm.xlu1 %3007, %v1999_v26  }
  0x93   : > { %2145 = vperm.xlu0 %3006, %v1990_v31  }
  0x94   : > { %2178 = vperm.xlu1 %3007, %v2001_v28  }
  0x96   : > { %2918 = vmatmul.mubr.bf16.gmra.mrb[52].mxu0 %v433_v0 }
  0x97   : > { %2921 = vmatprep.mubr.bf16.mxu0 %v434_v2  ;;  %2151 = vperm.xlu0 %3006, %v1992_v33  }
  0x98   : > { %2184 = vperm.xlu1 %3007, %v2003_v30  }
  0x9b   : > { %2157 = vperm.xlu0 %3006, %v1994_v35  }
  0x9c   : > { %2190 = vperm.xlu1 %3007, %v2005_v32  }
  0x9e   : > { %2922 = vmatmul.mubr.bf16.gmra.mrb[56].mxu0 %v435_v11 }
  0x9f   : > { %2925 = vmatprep.mubr.bf16.mxu0 %v436_v12  ;;  %2163 = vperm.xlu0 %3006, %v1996_v36  }
  0xa0   : > { %2196 = vperm.xlu1 %3007, %v2007_v34  }
  0xa3   : > { %2169 = vperm.xlu0 %3006, %v1998_v37  }
  0xa6   : > { %2926 = vmatmul.mubr.bf16.gmra.mrb[60].mxu0 %v437_v19 }
  0xa7   : > { %2175 = vperm.xlu0 %3006, %v2000_v38  }
  0xab   : > { %2181 = vperm.xlu0 %3006, %v2002_v39  }
  0xaf   : > { %2187 = vperm.xlu0 %3006, %v2004_v40  }
  0xb3   : > { %2193 = vperm.xlu0 %3006, %v2006_v41  }
  0xb7   : > { %2199 = vperm.xlu0 %3006, %v2008_v42  }
 0x101   : > { %v2867_v44 = vpop.f32.mrb[0].mxu0 }
 0x102   : > { %v552_v45 = vadd.f32 %v2867_v44, %v3757_v43  ;;  %v543_v46 = vpop.f32.mrb[1].mxu0 }
 0x103   : > { %v544_v47 = vadd.f32 %v3757_v43, %v543_v46  ;;  %v2868_v48 = vpop.f32.mrb[2].mxu0 }
 0x104   : > { %3146 = vtanh.f32 %v552_v45  ;;  %v555_v49 = vadd.f32 %v2868_v48, %v3757_v43  ;;  %v546_v50 = vpop.f32.mrb[3].mxu0 }
 0x105   : > { %3148 = vtanh.f32 %v544_v47  ;;  %v547_v51 = vadd.f32 %v3757_v43, %v546_v50 }
 0x106   : > { %3150 = vtanh.f32 %v555_v49 }
 0x107   : > { %3152 = vtanh.f32 %v547_v51 }
 0x109   : > { %v2871_v52 = vpop.f32.mrb[4].mxu0 }
 0x10a   : > { %v568_v53 = vadd.f32 %v2871_v52, %v3757_v43  ;;  %v559_v54 = vpop.f32.mrb[5].mxu0 }
 0x10b   : > { %v560_v55 = vadd.f32 %v3757_v43, %v559_v54  ;;  %v2872_v56 = vpop.f32.mrb[6].mxu0 }
 0x10c   : > { %3154 = vtanh.f32 %v568_v53  ;;  %v571_v57 = vadd.f32 %v2872_v56, %v3757_v43  ;;  %v562_v58 = vpop.f32.mrb[7].mxu0 }
 0x10d   : > { %3156 = vtanh.f32 %v560_v55  ;;  %v563_v59 = vadd.f32 %v3757_v43, %v562_v58 }
 0x10e   : > { %v3147_v60 = vpop.eup %3146  ;;  %3158 = vtanh.f32 %v571_v57 }
 0x10f   : > { %v3149_v61 = vpop.eup %3148  ;;  %3160 = vtanh.f32 %v563_v59 }
 0x110   : > { %v3151_v62 = vpop.eup %3150 }
 0x111   : > { %v3153_v63 = vpop.eup %3152  ;;  %v2875_v0 = vpop.f32.mrb[8].mxu0  ;;  %v863_v1 = vpack.c.bf16 %v3151_v62, %v3147_v60 }
 0x112   : > { %v584_v2 = vadd.f32 %v2875_v0, %v3757_v43  ;;  %v575_v3 = vpop.f32.mrb[9].mxu0  ;;  %v862_v4 = vpack.c.bf16 %v3153_v63, %v3149_v61 }
 0x113   : > { %v576_v5 = vadd.f32 %v3757_v43, %v575_v3  ;;  %v2876_v6 = vpop.f32.mrb[10].mxu0 }
 0x114   : > { %3162 = vtanh.f32 %v584_v2  ;;  %v587_v7 = vadd.f32 %v2876_v6, %v3757_v43  ;;  %v578_v8 = vpop.f32.mrb[11].mxu0  ;;  %2933 = vmatprep.mubr.msk.bf16.mxu1 %vm917_vm0, %v862_v4 }
 0x115   : > { %3164 = vtanh.f32 %v576_v5  ;;  %v579_v9 = vadd.f32 %v3757_v43, %v578_v8  ;;  %2934 = vmatmul.mubr.msk.bf16.vlgmr.msra.gmra.mrb[0].mxu1 %vm917_vm0, %v863_v1 }
 0x116   : > { %v3155_v10 = vpop.eup %3154  ;;  %3166 = vtanh.f32 %v587_v7 }
 0x117   : > { %v3157_v11 = vpop.eup %3156  ;;  %3168 = vtanh.f32 %v579_v9 }
 0x118   : > { %v3159_v12 = vpop.eup %3158 }
 0x119   : > { %v3161_v13 = vpop.eup %3160  ;;  %v2879_v14 = vpop.f32.mrb[12].mxu0  ;;  %v865_v15 = vpack.c.bf16 %v3159_v12, %v3155_v10 }
 0x11a   : > { %v600_v16 = vadd.f32 %v2879_v14, %v3757_v43  ;;  %v591_v17 = vpop.f32.mrb[13].mxu0  ;;  %v864_v18 = vpack.c.bf16 %v3161_v13, %v3157_v11 }
 0x11b   : > { %v592_v19 = vadd.f32 %v3757_v43, %v591_v17  ;;  %v2880_v20 = vpop.f32.mrb[14].mxu0 }
 0x11c   : > { %3170 = vtanh.f32 %v600_v16  ;;  %v603_v21 = vadd.f32 %v2880_v20, %v3757_v43  ;;  %v594_v22 = vpop.f32.mrb[15].mxu0  ;;  %2937 = vmatprep.mubr.msk.bf16.mxu1 %vm917_vm0, %v864_v18 }
 0x11d   : > { %3172 = vtanh.f32 %v592_v19  ;;  %v595_v23 = vadd.f32 %v3757_v43, %v594_v22  ;;  %2938 = vmatmul.mubr.msk.bf16.gmra.mrb[4].mxu1 %vm917_vm0, %v865_v15 }
 0x11e   : > { %v3163_v24 = vpop.eup %3162  ;;  %3174 = vtanh.f32 %v603_v21 }
 0x11f   : > { %v3165_v25 = vpop.eup %3164  ;;  %3176 = vtanh.f32 %v595_v23 }
 0x120   : > { %v3167_v26 = vpop.eup %3166 }
 0x121   : > { %v3169_v27 = vpop.eup %3168  ;;  %v2883_v28 = vpop.f32.mrb[16].mxu0  ;;  %v867_v29 = vpack.c.bf16 %v3167_v26, %v3163_v24 }
 0x122   : > { %v616_v30 = vadd.f32 %v2883_v28, %v3757_v43  ;;  %v607_v31 = vpop.f32.mrb[17].mxu0  ;;  %v866_v32 = vpack.c.bf16 %v3169_v27, %v3165_v25 }
 0x123   : > { %v608_v33 = vadd.f32 %v3757_v43, %v607_v31  ;;  %v2884_v34 = vpop.f32.mrb[18].mxu0 }
 0x124   : > { %3178 = vtanh.f32 %v616_v30  ;;  %v619_v35 = vadd.f32 %v2884_v34, %v3757_v43  ;;  %v610_v36 = vpop.f32.mrb[19].mxu0  ;;  %2941 = vmatprep.mubr.msk.bf16.mxu1 %vm917_vm0, %v866_v32 }
 0x125   : > { %3180 = vtanh.f32 %v608_v33  ;;  %v611_v37 = vadd.f32 %v3757_v43, %v610_v36  ;;  %2942 = vmatmul.mubr.msk.bf16.gmra.mrb[8].mxu1 %vm917_vm0, %v867_v29 }
 0x126   : > { %v3171_v38 = vpop.eup %3170  ;;  %3182 = vtanh.f32 %v619_v35 }
 0x127   : > { %v3173_v39 = vpop.eup %3172  ;;  %3184 = vtanh.f32 %v611_v37 }
 0x128   : > { %v3175_v40 = vpop.eup %3174 }
 0x129   : > { %v3177_v41 = vpop.eup %3176  ;;  %v2887_v42 = vpop.f32.mrb[20].mxu0  ;;  %v869_v44 = vpack.c.bf16 %v3175_v40, %v3171_v38 }
 0x12a   : > { %v632_v45 = vadd.f32 %v2887_v42, %v3757_v43  ;;  %v623_v46 = vpop.f32.mrb[21].mxu0  ;;  %v868_v47 = vpack.c.bf16 %v3177_v41, %v3173_v39 }
 0x12b   : > { %v624_v48 = vadd.f32 %v3757_v43, %v623_v46  ;;  %v2888_v49 = vpop.f32.mrb[22].mxu0 }
 0x12c   : > { %3186 = vtanh.f32 %v632_v45  ;;  %v635_v50 = vadd.f32 %v2888_v49, %v3757_v43  ;;  %v626_v51 = vpop.f32.mrb[23].mxu0  ;;  %2945 = vmatprep.mubr.msk.bf16.mxu1 %vm917_vm0, %v868_v47 }
 0x12d   : > { %3188 = vtanh.f32 %v624_v48  ;;  %v627_v52 = vadd.f32 %v3757_v43, %v626_v51  ;;  %2946 = vmatmul.mubr.msk.bf16.gmra.mrb[12].mxu1 %vm917_vm0, %v869_v44 }
 0x12e   : > { %v3179_v53 = vpop.eup %3178  ;;  %3190 = vtanh.f32 %v635_v50 }
 0x12f   : > { %v3181_v54 = vpop.eup %3180  ;;  %3192 = vtanh.f32 %v627_v52 }
 0x130   : > { %v3183_v55 = vpop.eup %3182 }
 0x131   : > { %v3185_v56 = vpop.eup %3184  ;;  %v2891_v57 = vpop.f32.mrb[24].mxu0  ;;  %v871_v58 = vpack.c.bf16 %v3183_v55, %v3179_v53 }
 0x132   : > { %v648_v59 = vadd.f32 %v2891_v57, %v3757_v43  ;;  %v639_v60 = vpop.f32.mrb[25].mxu0  ;;  %v870_v61 = vpack.c.bf16 %v3185_v56, %v3181_v54 }
 0x133   : > { %v640_v62 = vadd.f32 %v3757_v43, %v639_v60  ;;  %v2892_v63 = vpop.f32.mrb[26].mxu0 }
 0x134   : > { %3194 = vtanh.f32 %v648_v59  ;;  %v651_v0 = vadd.f32 %v2892_v63, %v3757_v43  ;;  %v642_v1 = vpop.f32.mrb[27].mxu0  ;;  %2949 = vmatprep.mubr.msk.bf16.mxu1 %vm917_vm0, %v870_v61 }
 0x135   : > { %3196 = vtanh.f32 %v640_v62  ;;  %v643_v2 = vadd.f32 %v3757_v43, %v642_v1  ;;  %2950 = vmatmul.mubr.msk.bf16.gmra.mrb[16].mxu1 %vm917_vm0, %v871_v58 }
 0x136   : > { %v3187_v3 = vpop.eup %3186  ;;  %3198 = vtanh.f32 %v651_v0 }
 0x137   : > { %v3189_v4 = vpop.eup %3188  ;;  %3200 = vtanh.f32 %v643_v2 }
 0x138   : > { %v3191_v5 = vpop.eup %3190 }
 0x139   : > { %v3193_v6 = vpop.eup %3192  ;;  %v2895_v7 = vpop.f32.mrb[28].mxu0  ;;  %v873_v8 = vpack.c.bf16 %v3191_v5, %v3187_v3 }
 0x13a   : > { %v664_v9 = vadd.f32 %v2895_v7, %v3757_v43  ;;  %v655_v10 = vpop.f32.mrb[29].mxu0  ;;  %v872_v11 = vpack.c.bf16 %v3193_v6, %v3189_v4 }
 0x13b   : > { %v656_v12 = vadd.f32 %v3757_v43, %v655_v10  ;;  %v2896_v13 = vpop.f32.mrb[30].mxu0 }
 0x13c   : > { %3202 = vtanh.f32 %v664_v9  ;;  %v667_v14 = vadd.f32 %v2896_v13, %v3757_v43  ;;  %v658_v15 = vpop.f32.mrb[31].mxu0  ;;  %2953 = vmatprep.mubr.msk.bf16.mxu1 %vm917_vm0, %v872_v11 }
 0x13d   : > { %3204 = vtanh.f32 %v656_v12  ;;  %v659_v16 = vadd.f32 %v3757_v43, %v658_v15  ;;  %2954 = vmatmul.mubr.msk.bf16.gmra.mrb[20].mxu1 %vm917_vm0, %v873_v8 }
 0x13e   : > { %v3195_v17 = vpop.eup %3194  ;;  %3206 = vtanh.f32 %v667_v14 }
 0x13f   : > { %v3197_v18 = vpop.eup %3196  ;;  %3208 = vtanh.f32 %v659_v16 }
 0x140   : > { %v3199_v19 = vpop.eup %3198 }
 0x141   : > { %v3201_v20 = vpop.eup %3200  ;;  %v2899_v21 = vpop.f32.mrb[32].mxu0  ;;  %v875_v22 = vpack.c.bf16 %v3199_v19, %v3195_v17 }
 0x142   : > { %v680_v23 = vadd.f32 %v2899_v21, %v3757_v43  ;;  %v671_v24 = vpop.f32.mrb[33].mxu0  ;;  %v874_v25 = vpack.c.bf16 %v3201_v20, %v3197_v18 }
 0x143   : > { %v672_v26 = vadd.f32 %v3757_v43, %v671_v24  ;;  %v2900_v27 = vpop.f32.mrb[34].mxu0 }
 0x144   : > { %3210 = vtanh.f32 %v680_v23  ;;  %v683_v28 = vadd.f32 %v2900_v27, %v3757_v43  ;;  %v674_v29 = vpop.f32.mrb[35].mxu0  ;;  %2957 = vmatprep.mubr.msk.bf16.mxu1 %vm917_vm0, %v874_v25 }
 0x145   : > { %3212 = vtanh.f32 %v672_v26  ;;  %v675_v30 = vadd.f32 %v3757_v43, %v674_v29  ;;  %2958 = vmatmul.mubr.msk.bf16.gmra.mrb[24].mxu1 %vm917_vm0, %v875_v22 }
 0x146   : > { %v3203_v31 = vpop.eup %3202  ;;  %3214 = vtanh.f32 %v683_v28 }
 0x147   : > { %v3205_v32 = vpop.eup %3204  ;;  %3216 = vtanh.f32 %v675_v30 }
 0x148   : > { %v3207_v33 = vpop.eup %3206 }
 0x149   : > { %v3209_v34 = vpop.eup %3208  ;;  %v2903_v35 = vpop.f32.mrb[36].mxu0  ;;  %v877_v36 = vpack.c.bf16 %v3207_v33, %v3203_v31 }
 0x14a   : > { %v696_v37 = vadd.f32 %v2903_v35, %v3757_v43  ;;  %v687_v38 = vpop.f32.mrb[37].mxu0  ;;  %v876_v39 = vpack.c.bf16 %v3209_v34, %v3205_v32 }
 0x14b   : > { %v688_v40 = vadd.f32 %v3757_v43, %v687_v38  ;;  %v2904_v41 = vpop.f32.mrb[38].mxu0 }
 0x14c   : > { %3218 = vtanh.f32 %v696_v37  ;;  %v699_v42 = vadd.f32 %v2904_v41, %v3757_v43  ;;  %v690_v44 = vpop.f32.mrb[39].mxu0  ;;  %2961 = vmatprep.mubr.msk.bf16.mxu1 %vm917_vm0, %v876_v39 }
 0x14d   : > { %3220 = vtanh.f32 %v688_v40  ;;  %v691_v45 = vadd.f32 %v3757_v43, %v690_v44  ;;  %2962 = vmatmul.mubr.msk.bf16.gmra.mrb[28].mxu1 %vm917_vm0, %v877_v36 }
 0x14e   : > { %v3211_v46 = vpop.eup %3210  ;;  %3222 = vtanh.f32 %v699_v42 }
 0x14f   : > { %v3213_v47 = vpop.eup %3212  ;;  %3224 = vtanh.f32 %v691_v45 }
 0x150   : > { %v3215_v48 = vpop.eup %3214 }
 0x151   : > { %v3217_v49 = vpop.eup %3216  ;;  %v2907_v50 = vpop.f32.mrb[40].mxu0  ;;  %v879_v51 = vpack.c.bf16 %v3215_v48, %v3211_v46 }
 0x152   : > { %v712_v52 = vadd.f32 %v2907_v50, %v3757_v43  ;;  %v703_v53 = vpop.f32.mrb[41].mxu0  ;;  %v878_v54 = vpack.c.bf16 %v3217_v49, %v3213_v47 }
 0x153   : > { %v704_v55 = vadd.f32 %v3757_v43, %v703_v53  ;;  %v2908_v56 = vpop.f32.mrb[42].mxu0 }
 0x154   : > { %3226 = vtanh.f32 %v712_v52  ;;  %v715_v57 = vadd.f32 %v2908_v56, %v3757_v43  ;;  %v706_v58 = vpop.f32.mrb[43].mxu0  ;;  %2965 = vmatprep.mubr.msk.bf16.mxu1 %vm917_vm0, %v878_v54 }
 0x155   : > { %3228 = vtanh.f32 %v704_v55  ;;  %v707_v59 = vadd.f32 %v3757_v43, %v706_v58  ;;  %2966 = vmatmul.mubr.msk.bf16.gmra.mrb[32].mxu1 %vm917_vm0, %v879_v51 }
 0x156   : > { %v3219_v60 = vpop.eup %3218  ;;  %3230 = vtanh.f32 %v715_v57 }
 0x157   : > { %v3221_v61 = vpop.eup %3220  ;;  %3232 = vtanh.f32 %v707_v59 }
 0x158   : > { %v3223_v62 = vpop.eup %3222 }
 0x159   : > { %v3225_v63 = vpop.eup %3224  ;;  %v2911_v0 = vpop.f32.mrb[44].mxu0  ;;  %v881_v1 = vpack.c.bf16 %v3223_v62, %v3219_v60 }
 0x15a   : > { %v728_v2 = vadd.f32 %v2911_v0, %v3757_v43  ;;  %v719_v3 = vpop.f32.mrb[45].mxu0  ;;  %v880_v4 = vpack.c.bf16 %v3225_v63, %v3221_v61 }
 0x15b   : > { %v720_v5 = vadd.f32 %v3757_v43, %v719_v3  ;;  %v2912_v6 = vpop.f32.mrb[46].mxu0 }
 0x15c   : > { %3234 = vtanh.f32 %v728_v2  ;;  %v731_v7 = vadd.f32 %v2912_v6, %v3757_v43  ;;  %v722_v8 = vpop.f32.mrb[47].mxu0  ;;  %2969 = vmatprep.mubr.msk.bf16.mxu1 %vm917_vm0, %v880_v4 }
 0x15d   : > { %3236 = vtanh.f32 %v720_v5  ;;  %v723_v9 = vadd.f32 %v3757_v43, %v722_v8  ;;  %2970 = vmatmul.mubr.msk.bf16.gmra.mrb[36].mxu1 %vm917_vm0, %v881_v1 }
 0x15e   : > { %v3227_v10 = vpop.eup %3226  ;;  %3238 = vtanh.f32 %v731_v7 }
 0x15f   : > { %v3229_v11 = vpop.eup %3228  ;;  %3240 = vtanh.f32 %v723_v9 }
 0x160   : > { %v3231_v12 = vpop.eup %3230 }
 0x161   : > { %v3233_v13 = vpop.eup %3232  ;;  %v2915_v14 = vpop.f32.mrb[48].mxu0  ;;  %v883_v15 = vpack.c.bf16 %v3231_v12, %v3227_v10 }
 0x162   : > { %v744_v16 = vadd.f32 %v2915_v14, %v3757_v43  ;;  %v735_v17 = vpop.f32.mrb[49].mxu0  ;;  %v882_v18 = vpack.c.bf16 %v3233_v13, %v3229_v11  ;;  %v2014_v14 = vpop.permute.xlu1 %2013 }
 0x163   : > { %v736_v19 = vadd.f32 %v3757_v43, %v735_v17  ;;  %v2916_v20 = vpop.f32.mrb[50].mxu0 }
 0x164   : > { %3242 = vtanh.f32 %v744_v16  ;;  %v747_v21 = vadd.f32 %v2916_v20, %v3757_v43  ;;  %v738_v22 = vpop.f32.mrb[51].mxu0  ;;  %2973 = vmatprep.mubr.msk.bf16.mxu1 %vm917_vm0, %v882_v18 }
 0x165   : > { %3244 = vtanh.f32 %v736_v19  ;;  %v739_v23 = vadd.f32 %v3757_v43, %v738_v22  ;;  %2974 = vmatmul.mubr.msk.bf16.gmra.mrb[40].mxu1 %vm917_vm0, %v883_v15 }
 0x166   : > { %v3235_v24 = vpop.eup %3234  ;;  %3246 = vtanh.f32 %v747_v21  ;;  %v2017_v15 = vpop.permute.xlu1 %2016 }
 0x167   : > { %v3237_v25 = vpop.eup %3236  ;;  %3248 = vtanh.f32 %v739_v23  ;;  %v2011_v21 = vpop.permute.xlu0 %2010 }
 0x168   : > { %v3239_v26 = vpop.eup %3238 }
 0x169   : > { %v3241_v27 = vpop.eup %3240  ;;  %v2919_v28 = vpop.f32.mrb[52].mxu0  ;;  %v885_v29 = vpack.c.bf16 %v3239_v26, %v3235_v24 }
 0x16a   : > { %v760_v30 = vadd.f32 %v2919_v28, %v3757_v43  ;;  %v751_v31 = vpop.f32.mrb[53].mxu0  ;;  %v884_v32 = vpack.c.bf16 %v3241_v27, %v3237_v25  ;;  %v2020_v16 = vpop.permute.xlu1 %2019 }
 0x16b   : > { %v752_v33 = vadd.f32 %v3757_v43, %v751_v31  ;;  %v2920_v34 = vpop.f32.mrb[54].mxu0  ;;  %v3865_v23 = vpop.permute.xlu0 %2037  ;;  %v3882_v31 = vld [vmem:[%s5329_s5] ss:$0 sm:$0xff] }
 0x16c   : > { %3250 = vtanh.f32 %v760_v30  ;;  %v763_v35 = vadd.f32 %v2920_v34, %v3757_v43  ;;  %v754_v36 = vpop.f32.mrb[55].mxu0  ;;  %2977 = vmatprep.mubr.msk.bf16.mxu1 %vm917_vm0, %v884_v32  ;;  %v1943_v30 = vlaneseq }
 0x16d   : > { %3252 = vtanh.f32 %v752_v33  ;;  %v755_v37 = vadd.f32 %v3757_v43, %v754_v36  ;;  %2978 = vmatmul.mubr.msk.bf16.gmra.mrb[44].mxu1 %vm917_vm0, %v885_v29 }
 0x16e   : > { %v3243_v38 = vpop.eup %3242  ;;  %3254 = vtanh.f32 %v763_v35  ;;  %v3855_v17 = vpop.permute.xlu1 %2022  ;;  %v3889_v36 = vand.u32 127, %v1943_v30 }
 0x16f   : > { %v3245_v39 = vpop.eup %3244  ;;  %3256 = vtanh.f32 %v755_v37  ;;  %v3869_v25 = vpop.permute.xlu0 %2043 }
 0x170   : > { %v3247_v40 = vpop.eup %3246  ;;  %5459 = vst [vmem:[#allocation3_spill] sm:$0xff] %v3889_v36  ;;  %vm2203_vm1 = vcmp.eq.s32.totalorder %v3889_v36, %v2017_v15  ;;  %vm2201_vm2 = vcmp.eq.s32.totalorder %v3889_v36, %v2011_v21  ;;  %vm2204_vm3 = vcmp.eq.s32.totalorder %v3889_v36, %v2020_v16  ;;  %vm2202_vm4 = vcmp.eq.s32.totalorder %v3889_v36, %v2014_v14 }
 0x171   : > { %v3249_v41 = vpop.eup %3248  ;;  %v2923_v42 = vpop.f32.mrb[56].mxu0  ;;  %v887_v44 = vpack.c.bf16 %v3247_v40, %v3243_v38  ;;  %vm2205_vm8 = vcmp.eq.s32.totalorder %v3889_v36, %v3855_v17  ;;  %vm2212_vm9 = vcmp.eq.s32.totalorder %v3889_v36, %v3869_v25  ;;  %vm2210_vm11 = vcmp.eq.s32.totalorder %v3889_v36, %v3865_v23 }
 0x172   : > { %v776_v45 = vadd.f32 %v2923_v42, %v3757_v43  ;;  %v767_v46 = vpop.f32.mrb[57].mxu0  ;;  %v886_v47 = vpack.c.bf16 %v3249_v41, %v3245_v39  ;;  %v3857_v18 = vpop.permute.xlu1 %2025 }
 0x173   : > { %v768_v48 = vadd.f32 %v3757_v43, %v767_v46  ;;  %v2924_v49 = vpop.f32.mrb[58].mxu0  ;;  %v3873_v27 = vpop.permute.xlu0 %2049  ;;  %vm2206_vm7 = vcmp.eq.s32.totalorder %v3889_v36, %v3857_v18 }
 0x174   : > { %3258 = vtanh.f32 %v776_v45  ;;  %v779_v50 = vadd.f32 %v2924_v49, %v3757_v43  ;;  %v770_v51 = vpop.f32.mrb[59].mxu0  ;;  %2981 = vmatprep.mubr.msk.bf16.mxu1 %vm917_vm0, %v886_v47  ;;  %vm2214_vm15 = vcmp.eq.s32.totalorder %v3889_v36, %v3873_v27 }
 0x175   : > { %3260 = vtanh.f32 %v768_v48  ;;  %v771_v52 = vadd.f32 %v3757_v43, %v770_v51  ;;  %2982 = vmatmul.mubr.msk.bf16.gmra.mrb[48].mxu1 %vm917_vm0, %v887_v44 }
 0x176   : > { %v3251_v53 = vpop.eup %3250  ;;  %3262 = vtanh.f32 %v779_v50  ;;  %v3859_v19 = vpop.permute.xlu1 %2028 }
 0x177   : > { %v3253_v54 = vpop.eup %3252  ;;  %3264 = vtanh.f32 %v771_v52  ;;  %v3877_v29 = vpop.permute.xlu0 %2055  ;;  %vm2207_vm6 = vcmp.eq.s32.totalorder %v3889_v36, %v3859_v19 }
 0x178   : > { %v3255_v55 = vpop.eup %3254  ;;  %vm2216_vm13 = vcmp.eq.s32.totalorder %v3889_v36, %v3877_v29 }
 0x179   : > { %v3257_v56 = vpop.eup %3256  ;;  %v2927_v57 = vpop.f32.mrb[60].mxu0  ;;  %v889_v58 = vpack.c.bf16 %v3255_v55, %v3251_v53 }
 0x17a   : > { %v792_v59 = vadd.f32 %v2927_v57, %v3757_v43  ;;  %v783_v60 = vpop.f32.mrb[61].mxu0  ;;  %v888_v61 = vpack.c.bf16 %v3257_v56, %v3253_v54  ;;  %v3861_v20 = vpop.permute.xlu1 %2031 }
 0x17b   : > { %v784_v62 = vadd.f32 %v3757_v43, %v783_v60  ;;  %v2928_v63 = vpop.f32.mrb[62].mxu0  ;;  %v3894_v39 = vpop.permute.xlu0 %2061  ;;  %vm2208_vm5 = vcmp.eq.s32.totalorder %v3889_v36, %v3861_v20 }
 0x17c   : > { %3266 = vtanh.f32 %v792_v59  ;;  %v795_v0 = vadd.f32 %v2928_v63, %v3757_v43  ;;  %v786_v1 = vpop.f32.mrb[63].mxu0  ;;  %2985 = vmatprep.mubr.msk.bf16.mxu1 %vm917_vm0, %v888_v61 }
 0x17d   : > { %3268 = vtanh.f32 %v784_v62  ;;  %v787_v2 = vadd.f32 %v3757_v43, %v786_v1  ;;  %2986 = vmatmul.mubr.msk.bf16.gmra.mrb[52].mxu1 %vm917_vm0, %v889_v58 }
 0x17e   : > { %v3259_v3 = vpop.eup %3258  ;;  %3270 = vtanh.f32 %v795_v0  ;;  %v3863_v22 = vpop.permute.xlu1 %2034 }
 0x17f   : > { %v3261_v4 = vpop.eup %3260  ;;  %3272 = vtanh.f32 %v787_v2  ;;  %v3906_v46 = vpop.permute.xlu0 %2067  ;;  %vm2209_vm12 = vcmp.eq.s32.totalorder %v3889_v36, %v3863_v22 }
 0x180   : > { %v3263_v5 = vpop.eup %3262 }
 0x181   : > { %v3265_v6 = vpop.eup %3264  ;;  %v891_v7 = vpack.c.bf16 %v3263_v5, %v3259_v3 }
 0x182   : > { %v890_v8 = vpack.c.bf16 %v3265_v6, %v3261_v4  ;;  %v3867_v24 = vpop.permute.xlu1 %2040 }
 0x183   : > { %v3919_v54 = vpop.permute.xlu0 %2073  ;;  %vm2211_vm10 = vcmp.eq.s32.totalorder %v3889_v36, %v3867_v24 }
 0x184   : > { %2989 = vmatprep.mubr.msk.bf16.mxu1 %vm917_vm0, %v890_v8 }
 0x185   : > { %2990 = vmatmul.mubr.msk.bf16.gmra.mrb[56].mxu1 %vm917_vm0, %v891_v7 }
 0x186   : > { %v3267_v9 = vpop.eup %3266  ;;  %v3871_v26 = vpop.permute.xlu1 %2046 }
 0x187   : > { %v3269_v10 = vpop.eup %3268  ;;  %v3932_v63 = vpop.permute.xlu0 %2079 }
 0x188   : > { %v3271_v11 = vpop.eup %3270 }
 0x189   : > { %v3273_v12 = vpop.eup %3272  ;;  %v893_v13 = vpack.c.bf16 %v3271_v11, %v3267_v9 }
 0x18a   : > { %v892_v43 = vpack.c.bf16 %v3273_v12, %v3269_v10  ;;  %v3875_v28 = vpop.permute.xlu1 %2052 }
 0x18b   : > { %v3949_v7 = vpop.permute.xlu0 %2085  ;;  %vm2215_vm14 = vcmp.eq.s32.totalorder %v3889_v36, %v3875_v28 }
 0x18c   : > { %2993 = vmatprep.mubr.msk.bf16.mxu1 %vm917_vm0, %v892_v43 }
 0x18d   : > { %2994 = vmatmul.mubr.msk.bf16.gmra.mrb[60].mxu1 %vm917_vm0, %v893_v13  ;;  %vm2213_vm0 = vcmp.eq.s32.totalorder %v3889_v36, %v3871_v26 }
 0x18e   : > { %v3887_v35 = vpop.permute.xlu1 %2058 }
 0x18f   : > { %v3962_v43 = vpop.permute.xlu0 %2091 }
 0x192   : > { %v3904_v44 = vpop.permute.xlu1 %2064 }
 0x193   : > { %v3986_v30 = vpop.permute.xlu0 %2097 }
 0x196   : > { %v3915_v52 = vpop.permute.xlu1 %2070 }
 0x19a   : > { %v3929_v62 = vpop.permute.xlu1 %2076 }
 0x19e   : > { %v3944_v4 = vpop.permute.xlu1 %2082 }
 0x1a2   : > { %v3958_v12 = vpop.permute.xlu1 %2088 }
 0x1a6   : > { %v3981_v20 = vpop.permute.xlu1 %2094 }
 0x1e8   : > { %v2935_v32 = vpop.f32.mrb[0].mxu1 }
 0x1e9   : > { %v3885_v33 = vadd.f32 %v2935_v32, %v3882_v31  ;;  %v1048_v34 = vpop.f32.mrb[1].mxu1 }
 0x1ea   : > { %v3892_v37 = vadd.f32 %v3882_v31, %v1048_v34  ;;  %v2936_v38 = vpop.f32.mrb[2].mxu1 }
 0x1eb   : > { %5458 = vst [vmem:[#allocation2_spill] sm:$0xff] %v3885_v33  ;;  %1307 = vmax.xlane.f32.xlu1 %v3885_v33  ;;  %v1051_v40 = vpop.f32.mrb[3].mxu1  ;;  %v3899_v41 = vadd.f32 %v2936_v38, %v3882_v31  ;;  %v2267_v42 = vsel %vm2203_vm1, %v3885_v33, 0.0  ;;  %vm2220_vm1 = vcmp.eq.s32.totalorder %v3889_v36, %v3906_v46 }
 0x1ec   : > { %5460 = vst [vmem:[#allocation4_spill] sm:$0xff] %v3892_v37  ;;  %1303 = vmax.xlane.f32.xlu0 %v3892_v37  ;;  %v3910_v48 = vadd.f32 %v3882_v31, %v1051_v40  ;;  %v2265_v50 = vsel %vm2201_vm2, %v3892_v37, 0.0  ;;  %vm2219_vm2 = vcmp.eq.s32.totalorder %v3889_v36, %v3904_v44 }
 0x1ed   : > { %5461 = vst [vmem:[#allocation5_spill] sm:$0xff] %v3899_v41  ;;  %v2268_v53 = vsel %vm2204_vm3, %v3899_v41, 0.0  ;;  %vm2218_vm3 = vcmp.eq.s32.totalorder %v3889_v36, %v3894_v39 }
 0x1ee   : > { %5462 = vst [vmem:[#allocation6_spill] sm:$0xff] %v3910_v48  ;;  %v2266_v55 = vsel %vm2202_vm4, %v3910_v48, 0.0  ;;  %vm2217_vm4 = vcmp.eq.s32.totalorder %v3889_v36, %v3887_v35 }
 0x1ef   : > { %1309 = vmax.xlane.f32.xlu1 %v3899_v41 }
 0x1f0   : > { %v2939_v45 = vpop.f32.mrb[4].mxu1  ;;  %2333 = vadd.xlane.f32.xlu0 %v2267_v42 }
 0x1f1   : > { %v1064_v47 = vpop.f32.mrb[5].mxu1  ;;  %v3926_v59 = vadd.f32 %v2939_v45, %v3882_v31 }
 0x1f2   : > { %v2940_v49 = vpop.f32.mrb[6].mxu1  ;;  %v3938_v1 = vadd.f32 %v3882_v31, %v1064_v47  ;;  %v4004_v47 = vpop.permute.xlu1 %2100 }
 0x1f3   : > { %v1067_v51 = vpop.f32.mrb[7].mxu1  ;;  %2329 = vadd.xlane.f32.xlu1 %v2265_v50  ;;  %v3923_v57 = vadd.f32 %v2940_v49, %v3882_v31  ;;  %5464 = vst [vmem:[#allocation8_spill] sm:$0xff] %v3926_v59  ;;  %v2271_v9 = vsel %vm2207_vm6, %v3926_v59, 0.0  ;;  %v4006_v49 = vpop.permute.xlu0 %2103  ;;  %vm2223_vm6 = vcmp.eq.s32.totalorder %v3889_v36, %v3929_v62 }
 0x1f4   : > { %1305 = vmax.xlane.f32.xlu0 %v3910_v48  ;;  %v3935_v0 = vadd.f32 %v3882_v31, %v1067_v51  ;;  %5466 = vst [vmem:[#allocation10_spill] sm:$0xff] %v3938_v1  ;;  %v2269_v11 = vsel %vm2205_vm8, %v3938_v1, 0.0  ;;  %vm2221_vm8 = vcmp.eq.s32.totalorder %v3889_v36, %v3915_v52 }
 0x1f5   : > { %5463 = vst [vmem:[#allocation7_spill] sm:$0xff] %v3923_v57  ;;  %v2272_v6 = vsel %vm2208_vm5, %v3923_v57, 0.0  ;;  %vm2224_vm5 = vcmp.eq.s32.totalorder %v3889_v36, %v3932_v63 }
 0x1f6   : > { %5465 = vst [vmem:[#allocation9_spill] sm:$0xff] %v3935_v0  ;;  %v2270_v10 = vsel %vm2206_vm7, %v3935_v0, 0.0  ;;  %vm2222_vm7 = vcmp.eq.s32.totalorder %v3889_v36, %v3919_v54 }
 0x1f7   : > { %2335 = vadd.xlane.f32.xlu1 %v2268_v53 }
 0x1f8   : > { %v2943_v56 = vpop.f32.mrb[8].mxu1  ;;  %2331 = vadd.xlane.f32.xlu0 %v2266_v55  ;;  %v4021_v55 = vpop.permute.xlu1 %2106 }
 0x1f9   : > { %v1080_v58 = vpop.f32.mrb[9].mxu1  ;;  %v3970_v16 = vadd.f32 %v2943_v56, %v3882_v31 }
 0x1fa   : > { %v2944_v60 = vpop.f32.mrb[10].mxu1  ;;  %v3984_v21 = vadd.f32 %v3882_v31, %v1080_v58  ;;  %v4028_v58 = vpop.permute.xlu0 %2109 }
 0x1fb   : > { %v1083_v61 = vpop.f32.mrb[11].mxu1  ;;  %1317 = vmax.xlane.f32.xlu1 %v3923_v57  ;;  %v3965_v14 = vadd.f32 %v2944_v60, %v3882_v31  ;;  %5468 = vst [vmem:[#allocation12_spill] sm:$0xff] %v3970_v16  ;;  %v2275_v45 = vsel %vm2211_vm10, %v3970_v16, 0.0  ;;  %vm2227_vm10 = vcmp.eq.s32.totalorder %v3889_v36, %v3958_v12 }
 0x1fc   : > { %1315 = vmax.xlane.f32.xlu0 %v3926_v59  ;;  %v3979_v19 = vadd.f32 %v3882_v31, %v1083_v61  ;;  %5470 = vst [vmem:[#allocation14_spill] sm:$0xff] %v3984_v21  ;;  %v2273_v24 = vsel %vm2209_vm12, %v3984_v21, 0.0  ;;  %vm2225_vm12 = vcmp.eq.s32.totalorder %v3889_v36, %v3944_v4 }
 0x1fd   : > { %5467 = vst [vmem:[#allocation11_spill] sm:$0xff] %v3965_v14  ;;  %v2276_v40 = vsel %vm2212_vm9, %v3965_v14, 0.0  ;;  %vm2228_vm9 = vcmp.eq.s32.totalorder %v3889_v36, %v3962_v43 }
 0x1fe   : > { %5469 = vst [vmem:[#allocation13_spill] sm:$0xff] %v3979_v19  ;;  %v2274_v25 = vsel %vm2210_vm11, %v3979_v19, 0.0  ;;  %vm2226_vm11 = vcmp.eq.s32.totalorder %v3889_v36, %v3949_v7 }
 0x1ff   : > { %1313 = vmax.xlane.f32.xlu1 %v3935_v0 }
 0x200   : > { %v2947_v2 = vpop.f32.mrb[12].mxu1  ;;  %1311 = vmax.xlane.f32.xlu0 %v3938_v1 }
 0x201   : > { %v1096_v3 = vpop.f32.mrb[13].mxu1  ;;  %v4024_v23 = vadd.f32 %v2947_v2, %v3882_v31  ;;  %v4041_v2 = vpop.permute.xlu1 %2112 }
 0x202   : > { %v2948_v5 = vpop.f32.mrb[14].mxu1  ;;  %v4038_v61 = vadd.f32 %v3882_v31, %v1096_v3 }
 0x203   : > { %v1099_v8 = vpop.f32.mrb[15].mxu1  ;;  %2343 = vadd.xlane.f32.xlu1 %v2272_v6  ;;  %v4017_v51 = vadd.f32 %v2948_v5, %v3882_v31  ;;  %5472 = vst [vmem:[#allocation16_spill] sm:$0xff] %v4024_v23  ;;  %v4048_v6 = vpop.permute.xlu0 %2115 }
 0x204   : > { %2341 = vadd.xlane.f32.xlu0 %v2271_v9  ;;  %v4035_v60 = vadd.f32 %v3882_v31, %v1099_v8  ;;  %5474 = vst [vmem:[#allocation18_spill] sm:$0xff] %v4038_v61  ;;  %v2277_v28 = vsel %vm2213_vm0, %v4038_v61, 0.0  ;;  %vm2229_vm0 = vcmp.eq.s32.totalorder %v3889_v36, %v3981_v20 }
 0x205   : > { %5471 = vst [vmem:[#allocation15_spill] sm:$0xff] %v4017_v51  ;;  %v2280_v3 = vsel %vm2216_vm13, %v4017_v51, 0.0  ;;  %v4062_v29 = vpop.permute.xlu1 %2118  ;;  %vm2232_vm13 = vcmp.eq.s32.totalorder %v3889_v36, %v4006_v49 }
 0x206   : > { %5473 = vst [vmem:[#allocation17_spill] sm:$0xff] %v4035_v60 }
 0x207   : > { %2339 = vadd.xlane.f32.xlu1 %v2270_v10 }
 0x208   : > { %v3960_v13 = vpop.f32.mrb[16].mxu1  ;;  %2337 = vadd.xlane.f32.xlu0 %v2269_v11  ;;  %v2279_v11 = vsel %vm2215_vm14, %v4024_v23, 0.0  ;;  %vm2231_vm14 = vcmp.eq.s32.totalorder %v3889_v36, %v4004_v47 }
 0x209   : > { %v3967_v15 = vpop.f32.mrb[17].mxu1 }
 0x20a   : > { %v3972_v18 = vpop.f32.mrb[18].mxu1 }
 0x20b   : > { %v3974_v17 = vpop.f32.mrb[19].mxu1  ;;  %1325 = vmax.xlane.f32.xlu1 %v3965_v14 }
 0x20c   : > { %1323 = vmax.xlane.f32.xlu0 %v3970_v16 }
 0x20f   : > { %1321 = vmax.xlane.f32.xlu1 %v3979_v19 }
 0x210   : > { %v3989_v32 = vpop.f32.mrb[20].mxu1  ;;  %1319 = vmax.xlane.f32.xlu0 %v3984_v21 }
 0x211   : > { %v3992_v34 = vpop.f32.mrb[21].mxu1 }
 0x212   : > { %v3996_v38 = vpop.f32.mrb[22].mxu1 }
 0x213   : > { %v4001_v42 = vpop.f32.mrb[23].mxu1  ;;  %2351 = vadd.xlane.f32.xlu1 %v2276_v40  ;;  %v2278_v40 = vsel %vm2214_vm15, %v4035_v60, 0.0  ;;  %vm2230_vm15 = vcmp.eq.s32.totalorder %v3889_v36, %v3986_v30 }
 0x214   : > { %2349 = vadd.xlane.f32.xlu0 %v2275_v45  ;;  %v4067_v45 = vpop.permute.xlu0 %2121 }
 0x217   : > { %2347 = vadd.xlane.f32.xlu1 %v2274_v25 }
 0x218   : > { %v4014_v50 = vpop.f32.mrb[24].mxu1  ;;  %2345 = vadd.xlane.f32.xlu0 %v2273_v24  ;;  %v4074_v24 = vadd.f32 %v3972_v18, %v3882_v31  ;;  %v4094_v18 = vadd.f32 %v3882_v31, %v3974_v17 }
 0x219   : > { %v4019_v53 = vpop.f32.mrb[25].mxu1 }
 0x21a   : > { %v4026_v56 = vpop.f32.mrb[26].mxu1  ;;  %5475 = vst [vmem:[#allocation19_spill] sm:$0xff] %v4074_v24  ;;  %5477 = vst [vmem:[#allocation21_spill] sm:$0xff] %v4094_v18  ;;  %v2284_v17 = vsel %vm2220_vm1, %v4074_v24, 0.0  ;;  %v2282_v46 = vsel %vm2218_vm3, %v4094_v18, 0.0  ;;  %vm2236_vm1 = vcmp.eq.s32.totalorder %v3889_v36, %v4048_v6  ;;  %vm2234_vm3 = vcmp.eq.s32.totalorder %v3889_v36, %v4028_v58 }
 0x21b   : > { %v4030_v22 = vpop.f32.mrb[27].mxu1  ;;  %1333 = vmax.xlane.f32.xlu1 %v4017_v51 }
 0x21c   : > { %1331 = vmax.xlane.f32.xlu0 %v4024_v23 }
 0x21f   : > { %1329 = vmax.xlane.f32.xlu1 %v4035_v60 }
 0x220   : > { %v4043_v5 = vpop.f32.mrb[28].mxu1  ;;  %1327 = vmax.xlane.f32.xlu0 %v4038_v61 }
 0x221   : > { %v4050_v9 = vpop.f32.mrb[29].mxu1  ;;  %v4256_v4 = vadd.f32 %v4043_v5, %v3882_v31 }
 0x222   : > { %v4052_v8 = vpop.f32.mrb[30].mxu1  ;;  %v4274_v5 = vadd.f32 %v3882_v31, %v4050_v9 }
 0x223   : > { %v4057_v10 = vpop.f32.mrb[31].mxu1  ;;  %2359 = vadd.xlane.f32.xlu1 %v2280_v3  ;;  %v4080_v3 = vadd.f32 %v3960_v13, %v3882_v31  ;;  %v4098_v13 = vadd.f32 %v3882_v31, %v3967_v15 }
 0x224   : > { %2357 = vadd.xlane.f32.xlu0 %v2279_v11  ;;  %v2293_v49 = vsel %vm2229_vm0, %v4274_v5, 0.0 }
 0x225   : > { %5476 = vst [vmem:[#allocation20_spill] sm:$0xff] %v4080_v3  ;;  %5478 = vst [vmem:[#allocation22_spill] sm:$0xff] %v4098_v13  ;;  %v2283_v19 = vsel %vm2219_vm2, %v4080_v3, 0.0  ;;  %vm2235_vm2 = vcmp.eq.s32.totalorder %v3889_v36, %v4041_v2 }
 0x227   : > { %2355 = vadd.xlane.f32.xlu1 %v2278_v40  ;;  %v4087_v40 = vpop.permute.xlu1 %2124 }
 0x228   : > { %v4070_v25 = vpop.f32.mrb[32].mxu1  ;;  %2353 = vadd.xlane.f32.xlu0 %v2277_v28  ;;  %v4090_v28 = vpop.permute.xlu0 %2127 }
 0x229   : > { %v4076_v27 = vpop.f32.mrb[33].mxu1  ;;  %v4312_v30 = vadd.f32 %v4070_v25, %v3882_v31 }
 0x22a   : > { %v4082_v11 = vpop.f32.mrb[34].mxu1 }
 0x22b   : > { %v4084_v26 = vpop.f32.mrb[35].mxu1  ;;  %1341 = vmax.xlane.f32.xlu1 %v4074_v24  ;;  %v4108_v23 = vpop.permute.xlu1 %2130  ;;  %v2281_v24 = vsel %vm2217_vm4, %v4098_v13, 0.0  ;;  %5498 = vst [vmem:[#allocation42_spill] sm:$0xff] %v4312_v30  ;;  %vm2233_vm4 = vcmp.eq.s32.totalorder %v3889_v36, %v4021_v55 }
 0x22c   : > { %1339 = vmax.xlane.f32.xlu0 %v4080_v3  ;;  %v4115_v15 = vpop.permute.xlu0 %2133  ;;  %v4318_v20 = vadd.f32 %v3882_v31, %v4084_v26  ;;  %v2299_v26 = vsel %vm2235_vm2, %v4312_v30, 0.0 }
 0x22e   : > { %5499 = vst [vmem:[#allocation43_spill] sm:$0xff] %v4318_v20  ;;  %v2298_v6 = vsel %vm2234_vm3, %v4318_v20, 0.0 }
 0x22f   : > { %1337 = vmax.xlane.f32.xlu1 %v4094_v18  ;;  %v4126_v44 = vpop.permute.xlu1 %2136  ;;  %v4140_v18 = vadd.f32 %v3989_v32, %v3882_v31 }
 0x230   : > { %v4101_v61 = vpop.f32.mrb[36].mxu1  ;;  %1335 = vmax.xlane.f32.xlu0 %v4098_v13  ;;  %v4156_v13 = vadd.f32 %v3882_v31, %v3992_v34 }
 0x231   : > { %v4106_v60 = vpop.f32.mrb[37].mxu1  ;;  %5480 = vst [vmem:[#allocation24_spill] sm:$0xff] %v4140_v18  ;;  %v2287_v0 = vsel %vm2223_vm6, %v4140_v18, 0.0  ;;  %v4356_v58 = vadd.f32 %v4101_v61, %v3882_v31  ;;  %vm2239_vm6 = vcmp.eq.s32.totalorder %v3889_v36, %v4087_v40 }
 0x232   : > { %v4110_v51 = vpop.f32.mrb[38].mxu1  ;;  %5482 = vst [vmem:[#allocation26_spill] sm:$0xff] %v4156_v13 }
 0x233   : > { %v4117_v21 = vpop.f32.mrb[39].mxu1  ;;  %2367 = vadd.xlane.f32.xlu1 %v2284_v17  ;;  %v4130_v17 = vpop.permute.xlu0 %2139  ;;  %5508 = vst [vmem:[#allocation52_spill] sm:$0xff] %v4356_v58 }
 0x234   : > { %2365 = vadd.xlane.f32.xlu0 %v2283_v19  ;;  %v4134_v19 = vadd.f32 %v3996_v38, %v3882_v31  ;;  %v4152_v38 = vpop.permute.xlu1 %2142 }
 0x235   : > { %vm2245_vm0 = vcmp.eq.s32.totalorder %v3889_v36, %v4152_v38 }
 0x236   : > { %5479 = vst [vmem:[#allocation23_spill] sm:$0xff] %v4134_v19  ;;  %v2288_v34 = vsel %vm2224_vm5, %v4134_v19, 0.0  ;;  %vm2240_vm5 = vcmp.eq.s32.totalorder %v3889_v36, %v4090_v28 }
 0x237   : > { %2363 = vadd.xlane.f32.xlu1 %v2282_v46  ;;  %v4158_v32 = vpop.permute.xlu0 %2145 }
 0x238   : > { %v4128_v16 = vpop.f32.mrb[40].mxu1  ;;  %2361 = vadd.xlane.f32.xlu0 %v2281_v24  ;;  %v4150_v24 = vadd.f32 %v3882_v31, %v4001_v42  ;;  %v4176_v59 = vpop.permute.xlu1 %2148 }
 0x239   : > { %v4136_v39 = vpop.f32.mrb[41].mxu1 }
 0x23a   : > { %v4142_v35 = vpop.f32.mrb[42].mxu1  ;;  %5481 = vst [vmem:[#allocation25_spill] sm:$0xff] %v4150_v24  ;;  %v2286_v62 = vsel %vm2222_vm7, %v4150_v24, 0.0  ;;  %vm2238_vm7 = vcmp.eq.s32.totalorder %v3889_v36, %v4067_v45  ;;  %v4404_v45 = vadd.f32 %v4128_v16, %v3882_v31 }
 0x23b   : > { %v4144_v46 = vpop.f32.mrb[43].mxu1  ;;  %1349 = vmax.xlane.f32.xlu1 %v4134_v19  ;;  %v4180_v63 = vpop.permute.xlu0 %2151  ;;  %v2285_v19 = vsel %vm2221_vm8, %v4156_v13, 0.0  ;;  %vm2237_vm8 = vcmp.eq.s32.totalorder %v3889_v36, %v4062_v29 }
 0x23c   : > { %1347 = vmax.xlane.f32.xlu0 %v4140_v18  ;;  %v4194_v54 = vpop.permute.xlu1 %2154  ;;  %v4198_v18 = vadd.f32 %v4014_v50, %v3882_v31 }
 0x23e   : > { %5484 = vst [vmem:[#allocation28_spill] sm:$0xff] %v4198_v18  ;;  %v2291_v41 = vsel %vm2227_vm10, %v4198_v18, 0.0  ;;  %vm2243_vm10 = vcmp.eq.s32.totalorder %v3889_v36, %v4126_v44 }
 0x23f   : > { %1345 = vmax.xlane.f32.xlu1 %v4150_v24 }
 0x240   : > { %v4161_v3 = vpop.f32.mrb[44].mxu1  ;;  %1343 = vmax.xlane.f32.xlu0 %v4156_v13  ;;  %v4217_v50 = vpop.permute.xlu1 %2160 }
 0x241   : > { %v4166_v14 = vpop.f32.mrb[45].mxu1  ;;  %vm2251_vm2 = vcmp.eq.s32.totalorder %v3889_v36, %v4217_v50 }
 0x242   : > { %v4170_v42 = vpop.f32.mrb[46].mxu1 }
 0x243   : > { %v4173_v1 = vpop.f32.mrb[47].mxu1  ;;  %2375 = vadd.xlane.f32.xlu1 %v2288_v34  ;;  %v4190_v34 = vadd.f32 %v4026_v56, %v3882_v31  ;;  %v4210_v56 = vadd.f32 %v3882_v31, %v4030_v22 }
 0x244   : > { %2373 = vadd.xlane.f32.xlu0 %v2287_v0  ;;  %v4240_v43 = vpop.permute.xlu1 %2166 }
 0x245   : > { %5483 = vst [vmem:[#allocation27_spill] sm:$0xff] %v4190_v34  ;;  %5485 = vst [vmem:[#allocation29_spill] sm:$0xff] %v4210_v56  ;;  %v2292_v22 = vsel %vm2228_vm9, %v4190_v34, 0.0  ;;  %v2290_v12 = vsel %vm2226_vm11, %v4210_v56, 0.0  ;;  %vm2244_vm9 = vcmp.eq.s32.totalorder %v3889_v36, %v4130_v17  ;;  %vm2242_vm11 = vcmp.eq.s32.totalorder %v3889_v36, %v4115_v15 }
 0x246   : > { %v4452_v15 = vadd.f32 %v4161_v3, %v3882_v31 }
 0x247   : > { %2371 = vadd.xlane.f32.xlu1 %v2286_v62  ;;  %v4202_v62 = vpop.permute.xlu0 %2157 }
 0x248   : > { %v4186_v57 = vpop.f32.mrb[48].mxu1  ;;  %2369 = vadd.xlane.f32.xlu0 %v2285_v19  ;;  %v4214_v19 = vadd.f32 %v3882_v31, %v4019_v53  ;;  %5530 = vst [vmem:[#allocation74_spill] sm:$0xff] %v4452_v15  ;;  %vm2250_vm3 = vcmp.eq.s32.totalorder %v3889_v36, %v4202_v62 }
 0x249   : > { %v4192_v0 = vpop.f32.mrb[49].mxu1 }
 0x24a   : > { %v4200_v52 = vpop.f32.mrb[50].mxu1  ;;  %5486 = vst [vmem:[#allocation30_spill] sm:$0xff] %v4214_v19 }
 0x24b   : > { %v4204_v13 = vpop.f32.mrb[51].mxu1  ;;  %1357 = vmax.xlane.f32.xlu1 %v4190_v34  ;;  %v4224_v37 = vpop.permute.xlu0 %2163  ;;  %v2289_v34 = vsel %vm2225_vm12, %v4214_v19, 0.0  ;;  %vm2241_vm12 = vcmp.eq.s32.totalorder %v3889_v36, %v4108_v23 }
 0x24c   : > { %1355 = vmax.xlane.f32.xlu0 %v4198_v18 }
 0x24f   : > { %1353 = vmax.xlane.f32.xlu1 %v4210_v56 }
 0x250   : > { %v4219_v24 = vpop.f32.mrb[52].mxu1  ;;  %1351 = vmax.xlane.f32.xlu0 %v4214_v19 }
 0x251   : > { %v4226_v48 = vpop.f32.mrb[53].mxu1  ;;  %v4548_v62 = vadd.f32 %v4219_v24, %v3882_v31 }
 0x252   : > { %5487 = vst [vmem:[#allocation31_spill] sm:$0xff] %v4226_v48  ;;  %v4230_v53 = vpop.f32.mrb[54].mxu1  ;;  %v4243_v48 = vpop.permute.xlu0 %2169 }
 0x253   : > { %v4233_v33 = vpop.f32.mrb[55].mxu1  ;;  %2383 = vadd.xlane.f32.xlu1 %v2292_v22  ;;  %5550 = vst [vmem:[#allocation94_spill] sm:$0xff] %v4548_v62 }
 0x254   : > { %5488 = vst [vmem:[#allocation32_spill] sm:$0xff] %v4233_v33  ;;  %2381 = vadd.xlane.f32.xlu0 %v2291_v41  ;;  %v4250_v41 = vadd.f32 %v4052_v8, %v3882_v31  ;;  %v4270_v8 = vadd.f32 %v3882_v31, %v4057_v10 }
 0x256   : > { %v2296_v9 = vsel %vm2232_vm13, %v4250_v41, 0.0  ;;  %v2294_v47 = vsel %vm2230_vm15, %v4270_v8, 0.0  ;;  %vm2248_vm13 = vcmp.eq.s32.totalorder %v3889_v36, %v4180_v63  ;;  %vm2246_vm15 = vcmp.eq.s32.totalorder %v3889_v36, %v4158_v32 }
 0x257   : > { %2379 = vadd.xlane.f32.xlu1 %v2290_v12  ;;  %v4263_v12 = vpop.permute.xlu1 %2172  ;;  %v4500_v32 = vadd.f32 %v4186_v57, %v3882_v31 }
 0x258   : > { %v4246_v33 = vpop.f32.mrb[56].mxu1  ;;  %2377 = vadd.xlane.f32.xlu0 %v2289_v34  ;;  %v4266_v34 = vpop.permute.xlu0 %2175 }
 0x259   : > { %5489 = vst [vmem:[#allocation33_spill] sm:$0xff] %v4246_v33  ;;  %v4252_v7 = vpop.f32.mrb[57].mxu1  ;;  %5540 = vst [vmem:[#allocation84_spill] sm:$0xff] %v4500_v32 }
 0x25a   : > { %5490 = vst [vmem:[#allocation34_spill] sm:$0xff] %v4252_v7  ;;  %v4258_v22 = vpop.f32.mrb[58].mxu1 }
 0x25b   : > { %v4260_v56 = vpop.f32.mrb[59].mxu1  ;;  %1365 = vmax.xlane.f32.xlu1 %v4250_v41  ;;  %v4286_v10 = vpop.permute.xlu1 %2178 }
 0x25c   : > { %5491 = vst [vmem:[#allocation35_spill] sm:$0xff] %v4260_v56  ;;  %1363 = vmax.xlane.f32.xlu0 %v4256_v4  ;;  %5493 = vst [vmem:[#allocation37_spill] sm:$0xff] %v4286_v10  ;;  %v4291_v56 = vpop.permute.xlu0 %2181 }
 0x25d   : > { %5494 = vst [vmem:[#allocation38_spill] sm:$0xff] %v4291_v56 }
 0x25f   : > { %1361 = vmax.xlane.f32.xlu1 %v4270_v8  ;;  %v4302_v10 = vpop.permute.xlu1 %2184 }
 0x260   : > { %v4277_v19 = vpop.f32.mrb[60].mxu1  ;;  %1359 = vmax.xlane.f32.xlu0 %v4274_v5  ;;  %5495 = vst [vmem:[#allocation39_spill] sm:$0xff] %v4302_v10  ;;  %v4304_v56 = vpop.permute.xlu0 %2187 }
 0x261   : > { %5492 = vst [vmem:[#allocation36_spill] sm:$0xff] %v4277_v19  ;;  %v4282_v18 = vpop.f32.mrb[61].mxu1  ;;  %v2295_v19 = vsel %vm2231_vm14, %v4256_v4, 0.0  ;;  %5496 = vst [vmem:[#allocation40_spill] sm:$0xff] %v4304_v56  ;;  %vm2247_vm14 = vcmp.eq.s32.totalorder %v3889_v36, %v4176_v59 }
 0x262   : > { %v4288_v7 = vpop.f32.mrb[62].mxu1 }
 0x263   : > { %v4293_v33 = vpop.f32.mrb[63].mxu1  ;;  %2391 = vadd.xlane.f32.xlu1 %v2296_v9  ;;  %v4308_v9 = vadd.f32 %v4082_v11, %v3882_v31 }
 0x264   : > { %2389 = vadd.xlane.f32.xlu0 %v2295_v19  ;;  %v4320_v19 = vpop.permute.xlu1 %2190  ;;  %v4326_v11 = vpop.permute.xlu0 %2193 }
 0x265   : > { %5497 = vst [vmem:[#allocation41_spill] sm:$0xff] %v4308_v9  ;;  %5500 = vst [vmem:[#allocation44_spill] sm:$0xff] %v4320_v19  ;;  %v2300_v25 = vsel %vm2236_vm1, %v4308_v9, 0.0  ;;  %vm2252_vm1 = vcmp.eq.s32.totalorder %v3889_v36, %v4224_v37 }
 0x266   : > { %5502 = vst [vmem:[#allocation46_spill] sm:$0xff] %v4326_v11 }
 0x267   : > { %2387 = vadd.xlane.f32.xlu1 %v2294_v47  ;;  %v4324_v47 = vadd.f32 %v3882_v31, %v4076_v27 }
 0x268   : > { %2385 = vadd.xlane.f32.xlu0 %v2293_v49  ;;  %v4336_v49 = vpop.permute.xlu1 %2196  ;;  %v4340_v27 = vpop.permute.xlu0 %2199 }
 0x269   : > { %5501 = vst [vmem:[#allocation45_spill] sm:$0xff] %v4324_v47  ;;  %5503 = vst [vmem:[#allocation47_spill] sm:$0xff] %v4336_v49  ;;  %v2297_v2 = vsel %vm2233_vm4, %v4324_v47, 0.0  ;;  %vm2249_vm4 = vcmp.eq.s32.totalorder %v3889_v36, %v4194_v54 }
 0x26a   : > { %5504 = vst [vmem:[#allocation48_spill] sm:$0xff] %v4340_v27 }
 0x26b   : > { %1373 = vmax.xlane.f32.xlu1 %v4308_v9 }
 0x26c   : > { %1371 = vmax.xlane.f32.xlu0 %v4312_v30 }
 0x26f   : > { %1369 = vmax.xlane.f32.xlu1 %v4318_v20 }
 0x270   : > { %1367 = vmax.xlane.f32.xlu0 %v4324_v47 }
 0x273   : > { %2399 = vadd.xlane.f32.xlu1 %v2300_v25  ;;  %v4350_v25 = vadd.f32 %v4110_v51, %v3882_v31  ;;  %v4370_v51 = vadd.f32 %v3882_v31, %v4106_v60  ;;  %v2303_v60 = vsel %vm2239_vm6, %v4356_v58, 0.0  ;;  %vm2255_vm6 = vcmp.eq.s32.totalorder %v3889_v36, %v4263_v12 }
 0x274   : > { %2397 = vadd.xlane.f32.xlu0 %v2299_v26 }
 0x275   : > { %5506 = vst [vmem:[#allocation50_spill] sm:$0xff] %v4350_v25  ;;  %5512 = vst [vmem:[#allocation56_spill] sm:$0xff] %v4370_v51  ;;  %v2301_v40 = vsel %vm2237_vm8, %v4370_v51, 0.0  ;;  %vm2253_vm8 = vcmp.eq.s32.totalorder %v3889_v36, %v4240_v43  ;;  %v5564_v43 = vld [vmem:[#allocation33_spill] sm:$0xff] }
 0x277   : > { %2395 = vadd.xlane.f32.xlu1 %v2298_v6  ;;  %v4364_v6 = vadd.f32 %v3882_v31, %v4117_v21  ;;  %v2304_v21 = vsel %vm2240_vm5, %v4350_v25, 0.0  ;;  %vm2256_vm5 = vcmp.eq.s32.totalorder %v3889_v36, %v4266_v34 }
 0x278   : > { %v4346_v19 = vpop.xlane.xlu1 %1307  ;;  %2393 = vadd.xlane.f32.xlu0 %v2297_v2 }
 0x279   : > { %5505 = vst [vmem:[#allocation49_spill] sm:$0xff] %v4346_v19  ;;  %v4352_v26 = vpop.xlane.xlu0 %1303  ;;  %5510 = vst [vmem:[#allocation54_spill] sm:$0xff] %v4364_v6  ;;  %v2302_v28 = vsel %vm2238_vm7, %v4364_v6, 0.0  ;;  %vm2254_vm7 = vcmp.eq.s32.totalorder %v3889_v36, %v4243_v48  ;;  %v5563_v48 = vld [vmem:[#allocation2_spill] sm:$0xff] }
 0x27a   : > { %5507 = vst [vmem:[#allocation51_spill] sm:$0xff] %v4352_v26 }
 0x27b   : > { %1381 = vmax.xlane.f32.xlu1 %v4350_v25 }
 0x27c   : > { %v4359_v55 = vpop.xlane.xlu1 %1309  ;;  %1379 = vmax.xlane.f32.xlu0 %v4356_v58 }
 0x27d   : > { %5509 = vst [vmem:[#allocation53_spill] sm:$0xff] %v4359_v55  ;;  %v4366_v2 = vpop.xlane.xlu0 %2333 }
 0x27e   : > { %5511 = vst [vmem:[#allocation55_spill] sm:$0xff] %v4366_v2 }
 0x27f   : > { %1377 = vmax.xlane.f32.xlu1 %v4364_v6 }
 0x280   : > { %1375 = vmax.xlane.f32.xlu0 %v4370_v51  ;;  %v4374_v61 = vpop.xlane.xlu1 %2329 }
 0x281   : > { %5513 = vst [vmem:[#allocation57_spill] sm:$0xff] %v4374_v61  ;;  %v4378_v49 = vpop.xlane.xlu0 %1305 }
 0x282   : > { %5514 = vst [vmem:[#allocation58_spill] sm:$0xff] %v4378_v49 }
 0x283   : > { %2407 = vadd.xlane.f32.xlu1 %v2304_v21 }
 0x284   : > { %2405 = vadd.xlane.f32.xlu0 %v2303_v60  ;;  %v4384_v27 = vpop.xlane.xlu1 %2335  ;;  %v4398_v60 = vadd.f32 %v4142_v35, %v3882_v31  ;;  %v4418_v35 = vadd.f32 %v3882_v31, %v4136_v39  ;;  %v2307_v39 = vsel %vm2243_vm10, %v4404_v45, 0.0 }
 0x285   : > { %5515 = vst [vmem:[#allocation59_spill] sm:$0xff] %v4384_v27  ;;  %v4388_v11 = vpop.xlane.xlu0 %2331 }
 0x286   : > { %5516 = vst [vmem:[#allocation60_spill] sm:$0xff] %v4388_v11  ;;  %5518 = vst [vmem:[#allocation62_spill] sm:$0xff] %v4398_v60  ;;  %v2305_v44 = vsel %vm2241_vm12, %v4418_v35, 0.0 }
 0x287   : > { %2403 = vadd.xlane.f32.xlu1 %v2302_v28  ;;  %v4412_v28 = vadd.f32 %v3882_v31, %v4144_v46  ;;  %5522 = vst [vmem:[#allocation66_spill] sm:$0xff] %v4418_v35  ;;  %v2308_v46 = vsel %vm2244_vm9, %v4398_v60, 0.0 }
 0x288   : > { %2401 = vadd.xlane.f32.xlu0 %v2301_v40  ;;  %v4394_v21 = vpop.xlane.xlu1 %1317 }
 0x289   : > { %5517 = vst [vmem:[#allocation61_spill] sm:$0xff] %v4394_v21  ;;  %v4400_v61 = vpop.xlane.xlu0 %1315  ;;  %5520 = vst [vmem:[#allocation64_spill] sm:$0xff] %v4412_v28  ;;  %v2306_v17 = vsel %vm2242_vm11, %v4412_v28, 0.0 }
 0x28b   : > { %1389 = vmax.xlane.f32.xlu1 %v4398_v60 }
 0x28c   : > { %1387 = vmax.xlane.f32.xlu0 %v4404_v45  ;;  %v4408_v29 = vpop.xlane.xlu1 %1313 }
 0x28d   : > { %5519 = vst [vmem:[#allocation63_spill] sm:$0xff] %v4408_v29  ;;  %v4414_v40 = vpop.xlane.xlu0 %1311 }
 0x28e   : > { %5521 = vst [vmem:[#allocation65_spill] sm:$0xff] %v4414_v40 }
 0x28f   : > { %1385 = vmax.xlane.f32.xlu1 %v4412_v28 }
 0x290   : > { %1383 = vmax.xlane.f32.xlu0 %v4418_v35  ;;  %v4422_v16 = vpop.xlane.xlu1 %2343 }
 0x291   : > { %5523 = vst [vmem:[#allocation67_spill] sm:$0xff] %v4422_v16  ;;  %v4426_v11 = vpop.xlane.xlu0 %2341 }
 0x292   : > { %5524 = vst [vmem:[#allocation68_spill] sm:$0xff] %v4426_v11 }
 0x293   : > { %2415 = vadd.xlane.f32.xlu1 %v2308_v46 }
 0x294   : > { %2413 = vadd.xlane.f32.xlu0 %v2307_v39  ;;  %v4432_v2 = vpop.xlane.xlu1 %2339  ;;  %v4446_v39 = vadd.f32 %v4170_v42, %v3882_v31  ;;  %v4466_v42 = vadd.f32 %v3882_v31, %v4166_v14  ;;  %v2311_v14 = vsel %vm2247_vm14, %v4452_v15, 0.0 }
 0x295   : > { %5525 = vst [vmem:[#allocation69_spill] sm:$0xff] %v4432_v2  ;;  %v4436_v16 = vpop.xlane.xlu0 %2337 }
 0x296   : > { %5526 = vst [vmem:[#allocation70_spill] sm:$0xff] %v4436_v16  ;;  %5528 = vst [vmem:[#allocation72_spill] sm:$0xff] %v4446_v39  ;;  %v2309_v59 = vsel %vm2245_vm0, %v4466_v42, 0.0 }
 0x297   : > { %2411 = vadd.xlane.f32.xlu1 %v2306_v17  ;;  %v4460_v17 = vadd.f32 %v3882_v31, %v4173_v1  ;;  %5534 = vst [vmem:[#allocation78_spill] sm:$0xff] %v4466_v42  ;;  %v2312_v1 = vsel %vm2248_vm13, %v4446_v39, 0.0 }
 0x298   : > { %2409 = vadd.xlane.f32.xlu0 %v2305_v44  ;;  %v4442_v46 = vpop.xlane.xlu1 %1325 }
 0x299   : > { %5527 = vst [vmem:[#allocation71_spill] sm:$0xff] %v4442_v46  ;;  %v4448_v2 = vpop.xlane.xlu0 %1323  ;;  %5532 = vst [vmem:[#allocation76_spill] sm:$0xff] %v4460_v17  ;;  %v2310_v63 = vsel %vm2246_vm15, %v4460_v17, 0.0 }
 0x29a   : > { %5529 = vst [vmem:[#allocation73_spill] sm:$0xff] %v4448_v2 }
 0x29b   : > { %1397 = vmax.xlane.f32.xlu1 %v4446_v39 }
 0x29c   : > { %1395 = vmax.xlane.f32.xlu0 %v4452_v15  ;;  %v4456_v23 = vpop.xlane.xlu1 %1321 }
 0x29d   : > { %5531 = vst [vmem:[#allocation75_spill] sm:$0xff] %v4456_v23  ;;  %v4462_v44 = vpop.xlane.xlu0 %1319 }
 0x29e   : > { %5533 = vst [vmem:[#allocation77_spill] sm:$0xff] %v4462_v44 }
 0x29f   : > { %1393 = vmax.xlane.f32.xlu1 %v4460_v17 }
 0x2a0   : > { %1391 = vmax.xlane.f32.xlu0 %v4466_v42  ;;  %v4470_v3 = vpop.xlane.xlu1 %2351 }
 0x2a1   : > { %5535 = vst [vmem:[#allocation79_spill] sm:$0xff] %v4470_v3  ;;  %v4474_v16 = vpop.xlane.xlu0 %2349 }
 0x2a2   : > { %5536 = vst [vmem:[#allocation80_spill] sm:$0xff] %v4474_v16 }
 0x2a3   : > { %2423 = vadd.xlane.f32.xlu1 %v2312_v1 }
 0x2a4   : > { %2421 = vadd.xlane.f32.xlu0 %v2311_v14  ;;  %v4480_v11 = vpop.xlane.xlu1 %2347  ;;  %v4494_v14 = vadd.f32 %v4200_v52, %v3882_v31  ;;  %v4514_v52 = vadd.f32 %v3882_v31, %v4192_v0  ;;  %v2315_v0 = vsel %vm2251_vm2, %v4500_v32, 0.0 }
 0x2a5   : > { %5537 = vst [vmem:[#allocation81_spill] sm:$0xff] %v4480_v11  ;;  %v4484_v3 = vpop.xlane.xlu0 %2345 }
 0x2a6   : > { %5538 = vst [vmem:[#allocation82_spill] sm:$0xff] %v4484_v3  ;;  %5539 = vst [vmem:[#allocation83_spill] sm:$0xff] %v4494_v14  ;;  %v2313_v50 = vsel %vm2249_vm4, %v4514_v52, 0.0 }
 0x2a7   : > { %2419 = vadd.xlane.f32.xlu1 %v2310_v63  ;;  %v4508_v63 = vadd.f32 %v3882_v31, %v4204_v13  ;;  %5542 = vst [vmem:[#allocation86_spill] sm:$0xff] %v4514_v52  ;;  %v2316_v13 = vsel %vm2252_vm1, %v4494_v14, 0.0 }
 0x2a8   : > { %2417 = vadd.xlane.f32.xlu0 %v2309_v59  ;;  %v4490_v1 = vpop.xlane.xlu1 %1333 }
 0x2a9   : > { %v4496_v11 = vpop.xlane.xlu0 %1331  ;;  %5541 = vst [vmem:[#allocation85_spill] sm:$0xff] %v4508_v63  ;;  %v2314_v37 = vsel %vm2250_vm3, %v4508_v63, 0.0 }
 0x2ab   : > { %1405 = vmax.xlane.f32.xlu1 %v4494_v14 }
 0x2ac   : > { %1403 = vmax.xlane.f32.xlu0 %v4500_v32  ;;  %v4504_v38 = vpop.xlane.xlu1 %1329 }
 0x2ad   : > { %v4510_v59 = vpop.xlane.xlu0 %1327 }
 0x2af   : > { %1401 = vmax.xlane.f32.xlu1 %v4508_v63 }
 0x2b0   : > { %1399 = vmax.xlane.f32.xlu0 %v4514_v52  ;;  %v4518_v57 = vpop.xlane.xlu1 %2359 }
 0x2b1   : > { %5543 = vst [vmem:[#allocation87_spill] sm:$0xff] %v4518_v57  ;;  %v4522_v3 = vpop.xlane.xlu0 %2357 }
 0x2b2   : > { %5544 = vst [vmem:[#allocation88_spill] sm:$0xff] %v4522_v3 }
 0x2b3   : > { %2431 = vadd.xlane.f32.xlu1 %v2316_v13 }
 0x2b4   : > { %2429 = vadd.xlane.f32.xlu0 %v2315_v0  ;;  %v4528_v16 = vpop.xlane.xlu1 %2355  ;;  %v4542_v0 = vadd.f32 %v4230_v53, %v3882_v31  ;;  %v5555_v53 = vld [vmem:[#allocation31_spill] sm:$0xff] }
 0x2b5   : > { %5545 = vst [vmem:[#allocation89_spill] sm:$0xff] %v4528_v16  ;;  %v4532_v57 = vpop.xlane.xlu0 %2353  ;;  %v4562_v3 = vadd.f32 %v3882_v31, %v5555_v53  ;;  %v2319_v53 = vsel %vm2255_vm6, %v4548_v62, 0.0 }
 0x2b6   : > { %5546 = vst [vmem:[#allocation90_spill] sm:$0xff] %v4532_v57  ;;  %5548 = vst [vmem:[#allocation92_spill] sm:$0xff] %v4542_v0 }
 0x2b7   : > { %2427 = vadd.xlane.f32.xlu1 %v2314_v37  ;;  %v5552_v37 = vld [vmem:[#allocation32_spill] sm:$0xff]  ;;  %5556 = vst [vmem:[#allocation31_spill] sm:$0xff] %v4562_v3  ;;  %v2317_v12 = vsel %vm2253_vm8, %v4562_v3, 0.0 }
 0x2b8   : > { %2425 = vadd.xlane.f32.xlu0 %v2313_v50  ;;  %v4538_v13 = vpop.xlane.xlu1 %1341  ;;  %v4556_v50 = vadd.f32 %v3882_v31, %v5552_v37  ;;  %v2320_v37 = vsel %vm2256_vm5, %v4542_v0, 0.0 }
 0x2b9   : > { %5547 = vst [vmem:[#allocation91_spill] sm:$0xff] %v4538_v13  ;;  %v4544_v16 = vpop.xlane.xlu0 %1339 }
 0x2ba   : > { %5549 = vst [vmem:[#allocation93_spill] sm:$0xff] %v4544_v16  ;;  %5553 = vst [vmem:[#allocation32_spill] sm:$0xff] %v4556_v50  ;;  %v2318_v34 = vsel %vm2254_vm7, %v4556_v50, 0.0 }
 0x2bb   : > { %1413 = vmax.xlane.f32.xlu1 %v4542_v0 }
 0x2bc   : > { %1411 = vmax.xlane.f32.xlu0 %v4548_v62  ;;  %v4552_v54 = vpop.xlane.xlu1 %1337  ;;  %v5570_v62 = vld [vmem:[#allocation34_spill] sm:$0xff] }
 0x2bd   : > { %5551 = vst [vmem:[#allocation95_spill] sm:$0xff] %v4552_v54  ;;  %v4558_v57 = vpop.xlane.xlu0 %1335 }
 0x2be   : > { %5554 = vst [vmem:[#allocation96_spill] sm:$0xff] %v4558_v57 }
 0x2bf   : > { %1409 = vmax.xlane.f32.xlu1 %v4556_v50 }
 0x2c0   : > { %1407 = vmax.xlane.f32.xlu0 %v4562_v3  ;;  %v4566_v24 = vpop.xlane.xlu1 %2367 }
 0x2c1   : > { %5557 = vst [vmem:[#allocation97_spill] sm:$0xff] %v4566_v24  ;;  %v4570_v10 = vpop.xlane.xlu0 %2365 }
 0x2c2   : > { %5558 = vst [vmem:[#allocation98_spill] sm:$0xff] %v4570_v10 }
 0x2c3   : > { %2439 = vadd.xlane.f32.xlu1 %v2320_v37  ;;  %v5561_v37 = vld [vmem:[#allocation5_spill] sm:$0xff] }
 0x2c4   : > { %2437 = vadd.xlane.f32.xlu0 %v2319_v53  ;;  %v4576_v27 = vpop.xlane.xlu1 %2363  ;;  %v1434_v10 = vsub.f32 %v5561_v37, %v4359_v55 }
 0x2c5   : > { %5559 = vst [vmem:[#allocation99_spill] sm:$0xff] %v4576_v27  ;;  %v4580_v24 = vpop.xlane.xlu0 %2361  ;;  %v4592_v27 = vadd.f32 %v4258_v22, %v3882_v31  ;;  %v5567_v22 = vld [vmem:[#allocation35_spill] sm:$0xff] }
 0x2c6   : > { %5560 = vst [vmem:[#allocation100_spill] sm:$0xff] %v4580_v24  ;;  %v1433_v24 = vsub.f32 %v5563_v48, %v4346_v19  ;;  %v1501_v36 = vmul.f32 1.442695, %v1434_v10  ;;  %v4610_v3 = vadd.f32 %v3882_v31, %v5567_v22  ;;  %v5569_v19 = vld [vmem:[#allocation4_spill] sm:$0xff]  ;;  %v4618_v10 = vadd.f32 %v3882_v31, %v5570_v62 }
 0x2c7   : > { %2435 = vadd.xlane.f32.xlu1 %v2318_v34  ;;  %5562 = vst [vmem:[#allocation101_spill] sm:$0xff] %v4592_v27  ;;  %v4600_v34 = vadd.f32 %v5564_v43, %v3882_v31  ;;  %v1431_v50 = vsub.f32 %v5569_v19, %v4352_v26  ;;  %v5574_v62 = vld [vmem:[#allocation8_spill] sm:$0xff] }
 0x2c8   : > { %2433 = vadd.xlane.f32.xlu0 %v2317_v12  ;;  %v4588_v53 = vpop.xlane.xlu1 %1349  ;;  %v5566_v12 = vld [vmem:[#allocation6_spill] sm:$0xff]  ;;  %5568 = vst [vmem:[#allocation35_spill] sm:$0xff] %v4610_v3  ;;  %v1499_v48 = vmul.f32 1.442695, %v1433_v24  ;;  %5571 = vst [vmem:[#allocation34_spill] sm:$0xff] %v4618_v10  ;;  %3274 = vpow2.f32 %v1501_v36  ;;  %v4628_v24 = vadd.f32 %v4288_v7, %v3882_v31  ;;  %v1437_v26 = vsub.f32 %v5574_v62, %v4400_v61  ;;  %v5576_v36 = vld [vmem:[#allocation36_spill] sm:$0xff] }
 0x2c9   : > { %v4596_v56 = vpop.xlane.xlu0 %1347  ;;  %5565 = vst [vmem:[#allocation33_spill] sm:$0xff] %v4600_v34  ;;  %v1432_v37 = vsub.f32 %v5566_v12, %v4378_v49  ;;  %v5572_v49 = vld [vmem:[#allocation7_spill] sm:$0xff]  ;;  %v1495_v19 = vmul.f32 1.442695, %v1431_v50  ;;  %v4646_v50 = vadd.f32 %v3882_v31, %v4293_v33 }
 0x2ca   : > { %3276 = vpow2.f32 %v1499_v48  ;;  %v1507_v48 = vmul.f32 1.442695, %v1437_v26  ;;  %v5583_v26 = vld [vmem:[#allocation12_spill] sm:$0xff] }
 0x2cb   : > { %1421 = vmax.xlane.f32.xlu1 %v4592_v27  ;;  %v1497_v12 = vmul.f32 1.442695, %v1432_v37  ;;  %v4636_v37 = vadd.f32 %v5576_v36, %v3882_v31  ;;  %v5579_v36 = vld [vmem:[#allocation10_spill] sm:$0xff] }
 0x2cc   : > { %1419 = vmax.xlane.f32.xlu0 %v4600_v34  ;;  %v4606_v55 = vpop.xlane.xlu1 %1345  ;;  %v1438_v34 = vsub.f32 %v5572_v49, %v4394_v21 }
 0x2cd   : > { %v4614_v43 = vpop.xlane.xlu0 %1343  ;;  %3278 = vpow2.f32 %v1497_v12 }
 0x2ce   : > { %v1509_v49 = vmul.f32 1.442695, %v1438_v34  ;;  %3280 = vpow2.f32 %v1495_v19  ;;  %v4654_v34 = vadd.f32 %v3882_v31, %v4282_v18 }
 0x2cf   : > { %1417 = vmax.xlane.f32.xlu1 %v4610_v3 }
 0x2d0   : > { %1415 = vmax.xlane.f32.xlu0 %v4618_v10  ;;  %v4624_v22 = vpop.xlane.xlu1 %2375  ;;  %3282 = vpow2.f32 %v1509_v49 }
 0x2d1   : > { %5573 = vst [vmem:[#allocation102_spill] sm:$0xff] %v4624_v22  ;;  %v4632_v27 = vpop.xlane.xlu0 %2373  ;;  %v5577_v22 = vld [vmem:[#allocation9_spill] sm:$0xff]  ;;  %3284 = vpow2.f32 %v1507_v48 }
 0x2d2   : > { %5575 = vst [vmem:[#allocation103_spill] sm:$0xff] %v4632_v27  ;;  %v1436_v21 = vsub.f32 %v5577_v22, %v4408_v29  ;;  %v1435_v27 = vsub.f32 %v5579_v36, %v4414_v40  ;;  %v3275_v31 = vpop.eup %3274 }
 0x2d3   : > { %1429 = vmax.xlane.f32.xlu1 %v4628_v24 }
 0x2d4   : > { %1427 = vmax.xlane.f32.xlu0 %v4636_v37  ;;  %v4642_v7 = vpop.xlane.xlu1 %2371  ;;  %v1505_v12 = vmul.f32 1.442695, %v1436_v21  ;;  %v1503_v19 = vmul.f32 1.442695, %v1435_v27  ;;  %v3277_v18 = vpop.eup %3276  ;;  %v5585_v21 = vld [vmem:[#allocation13_spill] sm:$0xff]  ;;  %v5586_v27 = vld [vmem:[#allocation14_spill] sm:$0xff] }
 0x2d5   : > { %5578 = vst [vmem:[#allocation36_spill] sm:$0xff] %v4642_v7  ;;  %v4650_v62 = vpop.xlane.xlu0 %2369  ;;  %v5581_v7 = vld [vmem:[#allocation11_spill] sm:$0xff]  ;;  %v1440_v40 = vsub.f32 %v5585_v21, %v4456_v23  ;;  %v1439_v48 = vsub.f32 %v5586_v27, %v4462_v44 }
 0x2d6   : > { %5580 = vst [vmem:[#allocation104_spill] sm:$0xff] %v4650_v62  ;;  %v1442_v22 = vsub.f32 %v5581_v7, %v4442_v46  ;;  %v1441_v62 = vsub.f32 %v5583_v26, %v4448_v2  ;;  %3286 = vpow2.f32 %v1505_v12 }
 0x2d7   : > { %1425 = vmax.xlane.f32.xlu1 %v4646_v50  ;;  %3288 = vpow2.f32 %v1503_v19  ;;  %v3279_v26 = vpop.eup %3278 }
 0x2d8   : > { %1423 = vmax.xlane.f32.xlu0 %v4654_v34  ;;  %v4660_v33 = vpop.xlane.xlu1 %1357  ;;  %v1517_v49 = vmul.f32 1.442695, %v1442_v22  ;;  %v1515_v46 = vmul.f32 1.442695, %v1441_v62  ;;  %v3281_v2 = vpop.eup %3280  ;;  %v5587_v22 = vld [vmem:[#allocation15_spill] sm:$0xff]  ;;  %v5589_v62 = vld [vmem:[#allocation16_spill] sm:$0xff] }
 0x2d9   : > { %5582 = vst [vmem:[#allocation105_spill] sm:$0xff] %v4660_v33  ;;  %v4664_v36 = vpop.xlane.xlu0 %1355  ;;  %v1446_v12 = vsub.f32 %v5587_v22, %v4490_v1  ;;  %v1445_v19 = vsub.f32 %v5589_v62, %v4496_v11 }
 0x2da   : > { %5584 = vst [vmem:[#allocation106_spill] sm:$0xff] %v4664_v36  ;;  %3290 = vpow2.f32 %v1517_v49  ;;  %v3283_v27 = vpop.eup %3282 }
 0x2db   : > { %1629 = vadd.xlane.f32.xlu1 %v3275_v31  ;;  %v1513_v31 = vmul.f32 1.442695, %v1440_v40  ;;  %3292 = vpow2.f32 %v1515_v46  ;;  %v3285_v44 = vpop.eup %3284  ;;  %v5591_v40 = vld [vmem:[#allocation17_spill] sm:$0xff]  ;;  %v5593_v46 = vld [vmem:[#allocation18_spill] sm:$0xff] }
 0x2dc   : > { %1627 = vadd.xlane.f32.xlu0 %v3277_v18  ;;  %v4668_v7 = vpop.xlane.xlu1 %1353  ;;  %v1511_v18 = vmul.f32 1.442695, %v1439_v48  ;;  %v1444_v49 = vsub.f32 %v5591_v40, %v4504_v38  ;;  %v1443_v48 = vsub.f32 %v5593_v46, %v4510_v59 }
 0x2dd   : > { %v4672_v29 = vpop.xlane.xlu0 %1351  ;;  %3294 = vpow2.f32 %v1513_v31  ;;  %v5595_v31 = vld [vmem:[#allocation19_spill] sm:$0xff] }
 0x2de   : > { %3296 = vpow2.f32 %v1511_v18  ;;  %v5596_v18 = vld [vmem:[#allocation20_spill] sm:$0xff] }
 0x2df   : > { %1625 = vadd.xlane.f32.xlu1 %v3279_v26  ;;  %v1525_v26 = vmul.f32 1.442695, %v1446_v12  ;;  %v1450_v12 = vsub.f32 %v5595_v31, %v4538_v13 }
 0x2e0   : > { %1623 = vadd.xlane.f32.xlu0 %v3281_v2  ;;  %v4676_v21 = vpop.xlane.xlu1 %2383  ;;  %v1523_v2 = vmul.f32 1.442695, %v1445_v19  ;;  %v3287_v62 = vpop.eup %3286  ;;  %v1449_v19 = vsub.f32 %v5596_v18, %v4544_v16 }
 0x2e1   : > { %5588 = vst [vmem:[#allocation107_spill] sm:$0xff] %v4676_v21  ;;  %v4680_v23 = vpop.xlane.xlu0 %2381  ;;  %3298 = vpow2.f32 %v1525_v26  ;;  %v5597_v26 = vld [vmem:[#allocation21_spill] sm:$0xff] }
 0x2e2   : > { %5590 = vst [vmem:[#allocation108_spill] sm:$0xff] %v4680_v23  ;;  %v3289_v23 = vpop.eup %3288  ;;  %3300 = vpow2.f32 %v1523_v2  ;;  %v5598_v2 = vld [vmem:[#allocation22_spill] sm:$0xff] }
 0x2e3   : > { %1637 = vadd.xlane.f32.xlu1 %v3283_v27  ;;  %v1521_v27 = vmul.f32 1.442695, %v1444_v49  ;;  %v1448_v49 = vsub.f32 %v5597_v26, %v4552_v54 }
 0x2e4   : > { %1635 = vadd.xlane.f32.xlu0 %v3285_v44  ;;  %v4684_v22 = vpop.xlane.xlu1 %2379  ;;  %v1519_v44 = vmul.f32 1.442695, %v1443_v48  ;;  %v3291_v46 = vpop.eup %3290  ;;  %v1447_v48 = vsub.f32 %v5598_v2, %v4558_v57 }
 0x2e5   : > { %5592 = vst [vmem:[#allocation109_spill] sm:$0xff] %v4684_v22  ;;  %v4688_v21 = vpop.xlane.xlu0 %2377  ;;  %3302 = vpow2.f32 %v1521_v27  ;;  %v5599_v27 = vld [vmem:[#allocation23_spill] sm:$0xff] }
 0x2e6   : > { %5594 = vst [vmem:[#allocation110_spill] sm:$0xff] %v4688_v21  ;;  %v3293_v21 = vpop.eup %3292  ;;  %3304 = vpow2.f32 %v1519_v44  ;;  %v5601_v44 = vld [vmem:[#allocation24_spill] sm:$0xff] }
 0x2e7   : > { %1633 = vadd.xlane.f32.xlu1 %v3287_v62  ;;  %v1533_v62 = vmul.f32 1.442695, %v1450_v12  ;;  %v3295_v18 = vpop.eup %3294  ;;  %v1454_v12 = vsub.f32 %v5599_v27, %v4588_v53 }
 0x2e8   : > { %1631 = vadd.xlane.f32.xlu0 %v3289_v23  ;;  %v4692_v40 = vpop.xlane.xlu1 %1365  ;;  %v1531_v23 = vmul.f32 1.442695, %v1449_v19  ;;  %v3297_v16 = vpop.eup %3296  ;;  %v1453_v19 = vsub.f32 %v5601_v44, %v4596_v56 }
 0x2e9   : > { %v4696_v22 = vpop.xlane.xlu0 %1363  ;;  %3306 = vpow2.f32 %v1533_v62  ;;  %v5603_v62 = vld [vmem:[#allocation25_spill] sm:$0xff] }
 0x2ea   : > { %3308 = vpow2.f32 %v1531_v23  ;;  %v5605_v23 = vld [vmem:[#allocation26_spill] sm:$0xff] }
 0x2eb   : > { %1645 = vadd.xlane.f32.xlu1 %v3291_v46  ;;  %v1529_v46 = vmul.f32 1.442695, %v1448_v49  ;;  %v3299_v2 = vpop.eup %3298  ;;  %v1452_v49 = vsub.f32 %v5603_v62, %v4606_v55 }
 0x2ec   : > { %1643 = vadd.xlane.f32.xlu0 %v3293_v21  ;;  %v4700_v31 = vpop.xlane.xlu1 %1361  ;;  %v1527_v21 = vmul.f32 1.442695, %v1447_v48  ;;  %v3301_v57 = vpop.eup %3300  ;;  %v1451_v48 = vsub.f32 %v5605_v23, %v4614_v43 }
 0x2ed   : > { %v4704_v13 = vpop.xlane.xlu0 %1359  ;;  %3310 = vpow2.f32 %v1529_v46  ;;  %v5607_v46 = vld [vmem:[#allocation27_spill] sm:$0xff] }
 0x2ee   : > { %3312 = vpow2.f32 %v1527_v21  ;;  %v5608_v21 = vld [vmem:[#allocation28_spill] sm:$0xff] }
 0x2ef   : > { %1641 = vadd.xlane.f32.xlu1 %v3295_v18  ;;  %v1541_v18 = vmul.f32 1.442695, %v1454_v12  ;;  %v3303_v44 = vpop.eup %3302  ;;  %v1458_v12 = vsub.f32 %v5607_v46, %v4660_v33 }
 0x2f0   : > { %1639 = vadd.xlane.f32.xlu0 %v3297_v16  ;;  %v4708_v26 = vpop.xlane.xlu1 %2391  ;;  %v1539_v16 = vmul.f32 1.442695, %v1453_v19  ;;  %v1457_v19 = vsub.f32 %v5608_v21, %v4664_v36 }
 0x2f1   : > { %5600 = vst [vmem:[#allocation111_spill] sm:$0xff] %v4708_v26  ;;  %v4712_v54 = vpop.xlane.xlu0 %2389  ;;  %3314 = vpow2.f32 %v1541_v18  ;;  %v5609_v18 = vld [vmem:[#allocation29_spill] sm:$0xff] }
 0x2f2   : > { %5602 = vst [vmem:[#allocation112_spill] sm:$0xff] %v4712_v54  ;;  %v3305_v54 = vpop.eup %3304  ;;  %3316 = vpow2.f32 %v1539_v16  ;;  %v5610_v16 = vld [vmem:[#allocation30_spill] sm:$0xff] }
 0x2f3   : > { %1653 = vadd.xlane.f32.xlu1 %v3299_v2  ;;  %v1537_v2 = vmul.f32 1.442695, %v1452_v49  ;;  %v3307_v23 = vpop.eup %3306  ;;  %v1456_v49 = vsub.f32 %v5609_v18, %v4668_v7 }
 0x2f4   : > { %1651 = vadd.xlane.f32.xlu0 %v3301_v57  ;;  %v4716_v27 = vpop.xlane.xlu1 %2387  ;;  %v1535_v57 = vmul.f32 1.442695, %v1451_v48  ;;  %v1455_v48 = vsub.f32 %v5610_v16, %v4672_v29 }
 0x2f5   : > { %5604 = vst [vmem:[#allocation113_spill] sm:$0xff] %v4716_v27  ;;  %v4720_v26 = vpop.xlane.xlu0 %2385  ;;  %3318 = vpow2.f32 %v1537_v2  ;;  %v1462_v2 = vsub.f32 %v4250_v41, %v4692_v40 }
 0x2f6   : > { %5606 = vst [vmem:[#allocation114_spill] sm:$0xff] %v4720_v26  ;;  %v3309_v26 = vpop.eup %3308  ;;  %3320 = vpow2.f32 %v1535_v57  ;;  %v1461_v57 = vsub.f32 %v4256_v4, %v4696_v22 }
 0x2f7   : > { %1649 = vadd.xlane.f32.xlu1 %v3303_v44  ;;  %v1549_v44 = vmul.f32 1.442695, %v1458_v12  ;;  %v3311_v21 = vpop.eup %3310 }
 0x2f8   : > { %1647 = vadd.xlane.f32.xlu0 %v3305_v54  ;;  %v4724_v62 = vpop.xlane.xlu1 %1373  ;;  %v1547_v54 = vmul.f32 1.442695, %v1457_v19  ;;  %v3313_v36 = vpop.eup %3312 }
 0x2f9   : > { %v4728_v27 = vpop.xlane.xlu0 %1371  ;;  %3322 = vpow2.f32 %v1549_v44  ;;  %v1460_v44 = vsub.f32 %v4270_v8, %v4700_v31 }
 0x2fa   : > { %3324 = vpow2.f32 %v1547_v54  ;;  %v1459_v54 = vsub.f32 %v4274_v5, %v4704_v13 }
 0x2fb   : > { %1661 = vadd.xlane.f32.xlu1 %v3307_v23  ;;  %v1545_v23 = vmul.f32 1.442695, %v1456_v49  ;;  %v3315_v16 = vpop.eup %3314 }
 0x2fc   : > { %1659 = vadd.xlane.f32.xlu0 %v3309_v26  ;;  %v4732_v46 = vpop.xlane.xlu1 %1369  ;;  %v1543_v26 = vmul.f32 1.442695, %v1455_v48  ;;  %v3317_v18 = vpop.eup %3316 }
 0x2fd   : > { %v4736_v33 = vpop.xlane.xlu0 %1367  ;;  %3326 = vpow2.f32 %v1545_v23  ;;  %v1466_v23 = vsub.f32 %v4308_v9, %v4724_v62 }
 0x2fe   : > { %3328 = vpow2.f32 %v1543_v26  ;;  %v1465_v26 = vsub.f32 %v4312_v30, %v4728_v27 }
 0x2ff   : > { %1657 = vadd.xlane.f32.xlu1 %v3311_v21  ;;  %v1557_v21 = vmul.f32 1.442695, %v1462_v2 }
 0x300   : > { %1655 = vadd.xlane.f32.xlu0 %v3313_v36  ;;  %v4740_v12 = vpop.xlane.xlu1 %2399  ;;  %v1555_v36 = vmul.f32 1.442695, %v1461_v57 }
 0x301   : > { %5611 = vst [vmem:[#allocation115_spill] sm:$0xff] %v4740_v12  ;;  %v4744_v19 = vpop.xlane.xlu0 %2397  ;;  %v3319_v12 = vpop.eup %3318  ;;  %3330 = vpow2.f32 %v1557_v21  ;;  %v1464_v21 = vsub.f32 %v4318_v20, %v4732_v46 }
 0x302   : > { %5612 = vst [vmem:[#allocation116_spill] sm:$0xff] %v4744_v19  ;;  %v3321_v19 = vpop.eup %3320  ;;  %3332 = vpow2.f32 %v1555_v36  ;;  %v1463_v36 = vsub.f32 %v4324_v47, %v4736_v33 }
 0x303   : > { %1669 = vadd.xlane.f32.xlu1 %v3315_v16  ;;  %v1553_v16 = vmul.f32 1.442695, %v1460_v44 }
 0x304   : > { %1667 = vadd.xlane.f32.xlu0 %v3317_v18  ;;  %v4748_v49 = vpop.xlane.xlu1 %2395  ;;  %v1551_v18 = vmul.f32 1.442695, %v1459_v54 }
 0x305   : > { %5613 = vst [vmem:[#allocation117_spill] sm:$0xff] %v4748_v49  ;;  %v4752_v48 = vpop.xlane.xlu0 %2393  ;;  %v3323_v49 = vpop.eup %3322  ;;  %3334 = vpow2.f32 %v1553_v16 }
 0x306   : > { %5614 = vst [vmem:[#allocation118_spill] sm:$0xff] %v4752_v48  ;;  %v3325_v48 = vpop.eup %3324  ;;  %3336 = vpow2.f32 %v1551_v18 }
 0x307   : > { %1665 = vadd.xlane.f32.xlu1 %v3319_v12  ;;  %v1565_v12 = vmul.f32 1.442695, %v1466_v23  ;;  %v3327_v30 = vpop.eup %3326 }
 0x308   : > { %1663 = vadd.xlane.f32.xlu0 %v3321_v19  ;;  %v4756_v2 = vpop.xlane.xlu1 %1381  ;;  %v1563_v19 = vmul.f32 1.442695, %v1465_v26  ;;  %v3329_v9 = vpop.eup %3328 }
 0x309   : > { %v4760_v57 = vpop.xlane.xlu0 %1379  ;;  %3338 = vpow2.f32 %v1565_v12  ;;  %v1470_v16 = vsub.f32 %v4350_v25, %v4756_v2 }
 0x30a   : > { %3340 = vpow2.f32 %v1563_v19  ;;  %v1469_v18 = vsub.f32 %v4356_v58, %v4760_v57 }
 0x30b   : > { %1677 = vadd.xlane.f32.xlu1 %v3323_v49  ;;  %v1561_v49 = vmul.f32 1.442695, %v1464_v21  ;;  %v3331_v47 = vpop.eup %3330 }
 0x30c   : > { %1675 = vadd.xlane.f32.xlu0 %v3325_v48  ;;  %v4764_v44 = vpop.xlane.xlu1 %1377  ;;  %v1559_v48 = vmul.f32 1.442695, %v1463_v36  ;;  %v3333_v20 = vpop.eup %3332 }
 0x30d   : > { %v4768_v54 = vpop.xlane.xlu0 %1375  ;;  %3342 = vpow2.f32 %v1561_v49  ;;  %v1468_v12 = vsub.f32 %v4364_v6, %v4764_v44 }
 0x30e   : > { %3344 = vpow2.f32 %v1559_v48  ;;  %v1467_v19 = vsub.f32 %v4370_v51, %v4768_v54 }
 0x30f   : > { %1673 = vadd.xlane.f32.xlu1 %v3327_v30  ;;  %v1573_v30 = vmul.f32 1.442695, %v1470_v16  ;;  %v3335_v58 = vpop.eup %3334 }
 0x310   : > { %1671 = vadd.xlane.f32.xlu0 %v3329_v9  ;;  %v4772_v23 = vpop.xlane.xlu1 %2407  ;;  %v1571_v9 = vmul.f32 1.442695, %v1469_v18  ;;  %v3337_v25 = vpop.eup %3336  ;;  %v1567_v16 = vmul.f32 1.442695, %v1467_v19 }
 0x311   : > { %v4776_v26 = vpop.xlane.xlu0 %2405  ;;  %3346 = vpow2.f32 %v1573_v30 }
 0x312   : > { %3348 = vpow2.f32 %v1571_v9 }
 0x313   : > { %1685 = vadd.xlane.f32.xlu1 %v3331_v47  ;;  %v1569_v47 = vmul.f32 1.442695, %v1468_v12  ;;  %v3339_v18 = vpop.eup %3338 }
 0x314   : > { %1683 = vadd.xlane.f32.xlu0 %v3333_v20  ;;  %v4780_v21 = vpop.xlane.xlu1 %2403  ;;  %v3341_v6 = vpop.eup %3340 }
 0x315   : > { %v4784_v36 = vpop.xlane.xlu0 %2401  ;;  %3350 = vpow2.f32 %v1569_v47 }
 0x316   : > { %3352 = vpow2.f32 %v1567_v16 }
 0x317   : > { %1681 = vadd.xlane.f32.xlu1 %v3335_v58  ;;  %v3343_v19 = vpop.eup %3342 }
 0x318   : > { %1679 = vadd.xlane.f32.xlu0 %v3337_v25  ;;  %v4786_v49 = vpop.xlane.xlu1 %1389 }
 0x319   : > { %5615 = vst [vmem:[#allocation119_spill] sm:$0xff] %v4786_v49  ;;  %v1474_v20 = vsub.f32 %v4398_v60, %v4786_v49  ;;  %v4790_v48 = vpop.xlane.xlu0 %1387  ;;  %v3345_v49 = vpop.eup %3344 }
 0x31a   : > { %v1473_v51 = vsub.f32 %v4404_v45, %v4790_v48 }
 0x31b   : > { %1693 = vadd.xlane.f32.xlu1 %v3339_v18  ;;  %v1581_v58 = vmul.f32 1.442695, %v1474_v20 }
 0x31c   : > { %1691 = vadd.xlane.f32.xlu0 %v3341_v6  ;;  %v4794_v30 = vpop.xlane.xlu1 %1385  ;;  %v1579_v25 = vmul.f32 1.442695, %v1473_v51  ;;  %v3347_v51 = vpop.eup %3346 }
 0x31d   : > { %v1472_v12 = vsub.f32 %v4412_v28, %v4794_v30  ;;  %v4798_v9 = vpop.xlane.xlu0 %1383  ;;  %3354 = vpow2.f32 %v1581_v58  ;;  %v3349_v20 = vpop.eup %3348 }
 0x31e   : > { %v1471_v60 = vsub.f32 %v4418_v35, %v4798_v9  ;;  %3356 = vpow2.f32 %v1579_v25 }
 0x31f   : > { %1689 = vadd.xlane.f32.xlu1 %v3343_v19  ;;  %v1577_v18 = vmul.f32 1.442695, %v1472_v12  ;;  %v3351_v19 = vpop.eup %3350 }
 0x320   : > { %1687 = vadd.xlane.f32.xlu0 %v3345_v49  ;;  %v4802_v47 = vpop.xlane.xlu1 %2415  ;;  %v1575_v6 = vmul.f32 1.442695, %v1471_v60  ;;  %v3353_v58 = vpop.eup %3352 }
 0x321   : > { %v4804_v16 = vpop.xlane.xlu0 %2413  ;;  %3358 = vpow2.f32 %v1577_v18 }
 0x322   : > { %3360 = vpow2.f32 %v1575_v6 }
 0x323   : > { %1701 = vadd.xlane.f32.xlu1 %v3347_v51 }
 0x324   : > { %1699 = vadd.xlane.f32.xlu0 %v3349_v20  ;;  %v4806_v28 = vpop.xlane.xlu1 %2411 }
 0x325   : > { %5616 = vst [vmem:[#allocation120_spill] sm:$0xff] %v4806_v28  ;;  %v4808_v35 = vpop.xlane.xlu0 %2409 }
 0x326   : > { %5617 = vst [vmem:[#allocation121_spill] sm:$0xff] %v4808_v35 }
 0x327   : > { %1697 = vadd.xlane.f32.xlu1 %v3351_v19  ;;  %v3355_v12 = vpop.eup %3354 }
 0x328   : > { %1695 = vadd.xlane.f32.xlu0 %v3353_v58  ;;  %v4810_v49 = vpop.xlane.xlu1 %1397  ;;  %v3357_v51 = vpop.eup %3356 }
 0x329   : > { %5618 = vst [vmem:[#allocation122_spill] sm:$0xff] %v4810_v49  ;;  %v1478_v60 = vsub.f32 %v4446_v39, %v4810_v49  ;;  %v4814_v25 = vpop.xlane.xlu0 %1395 }
 0x32a   : > { %v1477_v18 = vsub.f32 %v4452_v15, %v4814_v25 }
 0x32b   : > { %v1589_v20 = vmul.f32 1.442695, %v1478_v60  ;;  %1709 = vadd.xlane.f32.xlu1 %v3355_v12  ;;  %v3359_v39 = vpop.eup %3358 }
 0x32c   : > { %v1587_v6 = vmul.f32 1.442695, %v1477_v18  ;;  %1707 = vadd.xlane.f32.xlu0 %v3357_v51  ;;  %v4818_v35 = vpop.xlane.xlu1 %1393  ;;  %v3361_v28 = vpop.eup %3360 }
 0x32d   : > { %5619 = vst [vmem:[#allocation123_spill] sm:$0xff] %v4818_v35  ;;  %3362 = vpow2.f32 %v1589_v20  ;;  %v1476_v19 = vsub.f32 %v4460_v17, %v4818_v35  ;;  %v4822_v58 = vpop.xlane.xlu0 %1391 }
 0x32e   : > { %5620 = vst [vmem:[#allocation124_spill] sm:$0xff] %v4822_v58  ;;  %3364 = vpow2.f32 %v1587_v6  ;;  %v1475_v49 = vsub.f32 %v4466_v42, %v4822_v58 }
 0x32f   : > { %v1585_v15 = vmul.f32 1.442695, %v1476_v19  ;;  %1705 = vadd.xlane.f32.xlu1 %v3359_v39 }
 0x330   : > { %v1583_v60 = vmul.f32 1.442695, %v1475_v49  ;;  %1703 = vadd.xlane.f32.xlu0 %v3361_v28  ;;  %v4826_v12 = vpop.xlane.xlu1 %2423 }
 0x331   : > { %5621 = vst [vmem:[#allocation125_spill] sm:$0xff] %v4826_v12  ;;  %3366 = vpow2.f32 %v1585_v15  ;;  %v4828_v18 = vpop.xlane.xlu0 %2421 }
 0x332   : > { %5622 = vst [vmem:[#allocation126_spill] sm:$0xff] %v4828_v18  ;;  %3368 = vpow2.f32 %v1583_v60  ;;  %v5659_v18 = vld [vmem:[#allocation40_spill] sm:$0xff] }
 0x334   : > { %v4830_v51 = vpop.xlane.xlu1 %2419 }
 0x335   : > { %5623 = vst [vmem:[#allocation127_spill] sm:$0xff] %v4830_v51  ;;  %v4832_v20 = vpop.xlane.xlu0 %2417 }
 0x336   : > { %5624 = vst [vmem:[#allocation128_spill] sm:$0xff] %v4832_v20 }
 0x337   : > { %v3363_v17 = vpop.eup %3362 }
 0x338   : > { %v3365_v6 = vpop.eup %3364  ;;  %1717 = vadd.xlane.f32.xlu1 %v3363_v17  ;;  %v4834_v35 = vpop.xlane.xlu1 %1405 }
 0x339   : > { %5625 = vst [vmem:[#allocation129_spill] sm:$0xff] %v4834_v35  ;;  %v1482_v39 = vsub.f32 %v4494_v14, %v4834_v35  ;;  %1715 = vadd.xlane.f32.xlu0 %v3365_v6  ;;  %v4838_v28 = vpop.xlane.xlu0 %1403 }
 0x33a   : > { %5626 = vst [vmem:[#allocation130_spill] sm:$0xff] %v4838_v28  ;;  %v1481_v15 = vsub.f32 %v4500_v32, %v4838_v28 }
 0x33b   : > { %v3367_v49 = vpop.eup %3366  ;;  %v1597_v19 = vmul.f32 1.442695, %v1482_v39 }
 0x33c   : > { %v3369_v60 = vpop.eup %3368  ;;  %v1595_v42 = vmul.f32 1.442695, %v1481_v15  ;;  %1713 = vadd.xlane.f32.xlu1 %v3367_v49  ;;  %v4842_v20 = vpop.xlane.xlu1 %1401 }
 0x33d   : > { %5627 = vst [vmem:[#allocation131_spill] sm:$0xff] %v4842_v20  ;;  %3370 = vpow2.f32 %v1597_v19  ;;  %v1480_v17 = vsub.f32 %v4508_v63, %v4842_v20  ;;  %1711 = vadd.xlane.f32.xlu0 %v3369_v60  ;;  %v4846_v51 = vpop.xlane.xlu0 %1399 }
 0x33e   : > { %5628 = vst [vmem:[#allocation132_spill] sm:$0xff] %v4846_v51  ;;  %3372 = vpow2.f32 %v1595_v42  ;;  %v1479_v6 = vsub.f32 %v4514_v52, %v4846_v51 }
 0x33f   : > { %v1593_v14 = vmul.f32 1.442695, %v1480_v17 }
 0x340   : > { %v1591_v32 = vmul.f32 1.442695, %v1479_v6  ;;  %v4850_v28 = vpop.xlane.xlu1 %2431 }
 0x341   : > { %5629 = vst [vmem:[#allocation133_spill] sm:$0xff] %v4850_v28  ;;  %3374 = vpow2.f32 %v1593_v14  ;;  %v4852_v39 = vpop.xlane.xlu0 %2429  ;;  %v5635_v14 = vld [vmem:[#allocation94_spill] sm:$0xff]  ;;  %v5656_v28 = vld [vmem:[#allocation37_spill] sm:$0xff] }
 0x342   : > { %5630 = vst [vmem:[#allocation134_spill] sm:$0xff] %v4852_v39  ;;  %3376 = vpow2.f32 %v1591_v32 }
 0x344   : > { %v4854_v15 = vpop.xlane.xlu1 %2427 }
 0x345   : > { %5631 = vst [vmem:[#allocation135_spill] sm:$0xff] %v4854_v15  ;;  %v4856_v49 = vpop.xlane.xlu0 %2425 }
 0x346   : > { %5632 = vst [vmem:[#allocation136_spill] sm:$0xff] %v4856_v49 }
 0x347   : > { %v3371_v19 = vpop.eup %3370 }
 0x348   : > { %v3373_v60 = vpop.eup %3372  ;;  %1725 = vadd.xlane.f32.xlu1 %v3371_v19  ;;  %v4858_v63 = vpop.xlane.xlu1 %1413  ;;  %v5637_v19 = vld [vmem:[#allocation32_spill] sm:$0xff] }
 0x349   : > { %5633 = vst [vmem:[#allocation137_spill] sm:$0xff] %v4858_v63  ;;  %v1486_v42 = vsub.f32 %v4542_v0, %v4858_v63  ;;  %1723 = vadd.xlane.f32.xlu0 %v3373_v60  ;;  %v4862_v17 = vpop.xlane.xlu0 %1411  ;;  %v5639_v60 = vld [vmem:[#allocation31_spill] sm:$0xff] }
 0x34a   : > { %5634 = vst [vmem:[#allocation138_spill] sm:$0xff] %v4862_v17  ;;  %v1485_v6 = vsub.f32 %v5635_v14, %v4862_v17 }
 0x34b   : > { %v3375_v52 = vpop.eup %3374  ;;  %v1605_v32 = vmul.f32 1.442695, %v1486_v42 }
 0x34c   : > { %v3377_v51 = vpop.eup %3376  ;;  %v1603_v15 = vmul.f32 1.442695, %v1485_v6  ;;  %1721 = vadd.xlane.f32.xlu1 %v3375_v52  ;;  %v4866_v49 = vpop.xlane.xlu1 %1409 }
 0x34d   : > { %5636 = vst [vmem:[#allocation139_spill] sm:$0xff] %v4866_v49  ;;  %3378 = vpow2.f32 %v1605_v32  ;;  %v1484_v20 = vsub.f32 %v5637_v19, %v4866_v49  ;;  %1719 = vadd.xlane.f32.xlu0 %v3377_v51  ;;  %v4870_v39 = vpop.xlane.xlu0 %1407 }
 0x34e   : > { %5638 = vst [vmem:[#allocation140_spill] sm:$0xff] %v4870_v39  ;;  %3380 = vpow2.f32 %v1603_v15  ;;  %v1483_v0 = vsub.f32 %v5639_v60, %v4870_v39  ;;  %v5645_v15 = vld [vmem:[#allocation101_spill] sm:$0xff] }
 0x34f   : > { %v1601_v63 = vmul.f32 1.442695, %v1484_v20 }
 0x350   : > { %v1599_v14 = vmul.f32 1.442695, %v1483_v0  ;;  %v4874_v17 = vpop.xlane.xlu1 %2439 }
 0x351   : > { %5640 = vst [vmem:[#allocation141_spill] sm:$0xff] %v4874_v17  ;;  %3382 = vpow2.f32 %v1601_v63  ;;  %v4876_v42 = vpop.xlane.xlu0 %2437  ;;  %v5647_v63 = vld [vmem:[#allocation33_spill] sm:$0xff] }
 0x352   : > { %5641 = vst [vmem:[#allocation142_spill] sm:$0xff] %v4876_v42  ;;  %3384 = vpow2.f32 %v1599_v14 }
 0x354   : > { %v4878_v52 = vpop.xlane.xlu1 %2435 }
 0x355   : > { %5642 = vst [vmem:[#allocation143_spill] sm:$0xff] %v4878_v52  ;;  %v4880_v6 = vpop.xlane.xlu0 %2433 }
 0x356   : > { %5643 = vst [vmem:[#allocation144_spill] sm:$0xff] %v4880_v6 }
 0x357   : > { %v3379_v32 = vpop.eup %3378 }
 0x358   : > { %v3381_v51 = vpop.eup %3380  ;;  %1733 = vadd.xlane.f32.xlu1 %v3379_v32  ;;  %v4882_v19 = vpop.xlane.xlu1 %1421 }
 0x359   : > { %5644 = vst [vmem:[#allocation145_spill] sm:$0xff] %v4882_v19  ;;  %v1490_v60 = vsub.f32 %v5645_v15, %v4882_v19  ;;  %1731 = vadd.xlane.f32.xlu0 %v3381_v51  ;;  %v4886_v0 = vpop.xlane.xlu0 %1419 }
 0x35a   : > { %5646 = vst [vmem:[#allocation101_spill] sm:$0xff] %v4886_v0  ;;  %v1489_v20 = vsub.f32 %v5647_v63, %v4886_v0 }
 0x35b   : > { %v3383_v39 = vpop.eup %3382  ;;  %v1613_v14 = vmul.f32 1.442695, %v1490_v60 }
 0x35c   : > { %v3385_v49 = vpop.eup %3384  ;;  %v1611_v52 = vmul.f32 1.442695, %v1489_v20  ;;  %1729 = vadd.xlane.f32.xlu1 %v3383_v39  ;;  %v4890_v6 = vpop.xlane.xlu1 %1417 }
 0x35d   : > { %5648 = vst [vmem:[#allocation33_spill] sm:$0xff] %v4890_v6  ;;  %3386 = vpow2.f32 %v1613_v14  ;;  %v1488_v32 = vsub.f32 %v4610_v3, %v4890_v6  ;;  %1727 = vadd.xlane.f32.xlu0 %v3385_v49  ;;  %v4894_v42 = vpop.xlane.xlu0 %1415 }
 0x35e   : > { %5649 = vst [vmem:[#allocation146_spill] sm:$0xff] %v4894_v42  ;;  %3388 = vpow2.f32 %v1611_v52  ;;  %v1487_v51 = vsub.f32 %v4618_v10, %v4894_v42 }
 0x35f   : > { %v1609_v19 = vmul.f32 1.442695, %v1488_v32 }
 0x360   : > { %v1607_v0 = vmul.f32 1.442695, %v1487_v51  ;;  %v4898_v17 = vpop.xlane.xlu1 %1429 }
 0x361   : > { %5650 = vst [vmem:[#allocation147_spill] sm:$0xff] %v4898_v17  ;;  %3390 = vpow2.f32 %v1609_v19  ;;  %v1494_v39 = vsub.f32 %v4628_v24, %v4898_v17  ;;  %v4902_v60 = vpop.xlane.xlu0 %1427 }
 0x362   : > { %5651 = vst [vmem:[#allocation148_spill] sm:$0xff] %v4902_v60  ;;  %3392 = vpow2.f32 %v1607_v0  ;;  %v1493_v49 = vsub.f32 %v4636_v37, %v4902_v60 }
 0x363   : > { %v1621_v20 = vmul.f32 1.442695, %v1494_v39 }
 0x364   : > { %v1619_v14 = vmul.f32 1.442695, %v1493_v49  ;;  %v4906_v52 = vpop.xlane.xlu1 %1425 }
 0x365   : > { %5652 = vst [vmem:[#allocation149_spill] sm:$0xff] %v4906_v52  ;;  %3394 = vpow2.f32 %v1621_v20  ;;  %v1492_v32 = vsub.f32 %v4646_v50, %v4906_v52  ;;  %v4910_v51 = vpop.xlane.xlu0 %1423 }
 0x366   : > { %5653 = vst [vmem:[#allocation150_spill] sm:$0xff] %v4910_v51  ;;  %3396 = vpow2.f32 %v1619_v14  ;;  %v1491_v19 = vsub.f32 %v4654_v34, %v4910_v51 }
 0x367   : > { %v3387_v17 = vpop.eup %3386  ;;  %v1617_v42 = vmul.f32 1.442695, %v1492_v32 }
 0x368   : > { %v3389_v0 = vpop.eup %3388  ;;  %v1615_v6 = vmul.f32 1.442695, %v1491_v19  ;;  %1741 = vadd.xlane.f32.xlu1 %v3387_v17  ;;  %v1630_v60 = vpop.xlane.xlu1 %1629 }
 0x369   : > { %3398 = vpow2.f32 %v1617_v42  ;;  %1739 = vadd.xlane.f32.xlu0 %v3389_v0  ;;  %v1628_v39 = vpop.xlane.xlu0 %1627 }
 0x36a   : > { %3400 = vpow2.f32 %v1615_v6 }
 0x36b   : > { %v3391_v49 = vpop.eup %3390  ;;  %3402 = vlog2.f32 %v1630_v60 }
 0x36c   : > { %v3393_v20 = vpop.eup %3392  ;;  %3404 = vlog2.f32 %v1628_v39  ;;  %1737 = vadd.xlane.f32.xlu1 %v3391_v49  ;;  %v1626_v52 = vpop.xlane.xlu1 %1625  ;;  %v5654_v49 = vld [vmem:[#allocation38_spill] sm:$0xff] }
 0x36d   : > { %3406 = vlog2.f32 %v1626_v52  ;;  %1735 = vadd.xlane.f32.xlu0 %v3393_v20  ;;  %v1624_v14 = vpop.xlane.xlu0 %1623  ;;  %v5655_v20 = vld [vmem:[#allocation3_spill] sm:$0xff] }
 0x36e   : > { %3408 = vlog2.f32 %v1624_v14  ;;  %vm2258_vm9 = vcmp.eq.s32.totalorder %v5655_v20, %v5654_v49  ;;  %vm2257_vm10 = vcmp.eq.s32.totalorder %v5655_v20, %v5656_v28  ;;  %vm2521_vm11 = vcmp.eq.s32.totalorder %v5655_v20, 4 }
 0x36f   : > { %v3395_v51 = vpop.eup %3394  ;;  %v2321_v58 = vsel %vm2257_vm10, %v4618_v10, 0.0  ;;  %vm2260_vm12 = vcmp.eq.s32.totalorder %v5655_v20, %v5659_v18 }
 0x370   : > { %v3397_v32 = vpop.eup %3396  ;;  %1749 = vadd.xlane.f32.xlu1 %v3395_v51  ;;  %v1638_v19 = vpop.xlane.xlu1 %1637  ;;  %v2324_v18 = vsel %vm2260_vm12, %v5645_v15, 0.0 }
 0x371   : > { %3410 = vlog2.f32 %v1638_v19  ;;  %1747 = vadd.xlane.f32.xlu0 %v3397_v32  ;;  %v1636_v17 = vpop.xlane.xlu0 %1635  ;;  %v2322_v19 = vsel %vm2258_vm9, %v4610_v3, 0.0  ;;  %v5665_v3 = vld [vmem:[#allocation5_spill] sm:$0xff] }
 0x372   : > { %3412 = vlog2.f32 %v1636_v17 }
 0x373   : > { %v3399_v42 = vpop.eup %3398 }
 0x374   : > { %v3401_v6 = vpop.eup %3400  ;;  %1745 = vadd.xlane.f32.xlu1 %v3399_v42  ;;  %v1634_v60 = vpop.xlane.xlu1 %1633  ;;  %v5657_v42 = vld [vmem:[#allocation53_spill] sm:$0xff] }
 0x375   : > { %v3403_v0 = vpop.eup %3402  ;;  %3414 = vlog2.f32 %v1634_v60  ;;  %1743 = vadd.xlane.f32.xlu0 %v3401_v6  ;;  %v1632_v39 = vpop.xlane.xlu0 %1631 }
 0x376   : > { %v3405_v52 = vpop.eup %3404  ;;  %v1758_v14 = vmul.f32 0.6931472, %v3403_v0  ;;  %3416 = vlog2.f32 %v1632_v39  ;;  %v5658_v0 = vld [vmem:[#allocation49_spill] sm:$0xff] }
 0x377   : > { %v3407_v51 = vpop.eup %3406  ;;  %v1756_v32 = vmul.f32 0.6931472, %v3405_v52  ;;  %v5660_v52 = vld [vmem:[#allocation59_spill] sm:$0xff] }
 0x378   : > { %v3409_v17 = vpop.eup %3408  ;;  %v1882_v35 = vadd.f32 %v1758_v14, %v5657_v42  ;;  %v1754_v60 = vmul.f32 0.6931472, %v3407_v51  ;;  %2443 = vadd.xlane.f32.xlu1 %v2322_v19  ;;  %v1646_v6 = vpop.xlane.xlu1 %1645  ;;  %v5661_v51 = vld [vmem:[#allocation58_spill] sm:$0xff] }
 0x379   : > { %v1881_v39 = vadd.f32 %v1756_v32, %v5658_v0  ;;  %v1752_v49 = vmul.f32 0.6931472, %v3409_v17  ;;  %3418 = vlog2.f32 %v1646_v6  ;;  %2441 = vadd.xlane.f32.xlu0 %v2321_v58  ;;  %v1644_v28 = vpop.xlane.xlu0 %1643  ;;  %v5662_v32 = vld [vmem:[#allocation39_spill] sm:$0xff] }
 0x37a   : > { %v2460_v14 = vsub.f32 %v1882_v35, %v5660_v52  ;;  %v1880_v19 = vadd.f32 %v1754_v60, %v5661_v51  ;;  %3420 = vlog2.f32 %v1644_v28  ;;  %vm2259_vm13 = vcmp.eq.s32.totalorder %v5655_v20, %v5662_v32  ;;  %v5663_v58 = vld [vmem:[#allocation55_spill] sm:$0xff]  ;;  %v5666_v35 = vld [vmem:[#allocation60_spill] sm:$0xff]  ;;  %v5668_v32 = vld [vmem:[#allocation57_spill] sm:$0xff] }
 0x37b   : > { %v3411_v42 = vpop.eup %3410  ;;  %v2459_v17 = vsub.f32 %v1881_v39, %v5663_v58  ;;  %v5664_v6 = vld [vmem:[#allocation51_spill] sm:$0xff]  ;;  %v2323_v51 = vsel %vm2259_vm13, %v5647_v63, 0.0  ;;  %v5667_v39 = vld [vmem:[#allocation2_spill] sm:$0xff] }
 0x37c   : > { %v1879_v0 = vadd.f32 %v1752_v49, %v5664_v6  ;;  %v3413_v10 = vpop.eup %3412  ;;  %v2525_v12 = vsel %vm2521_vm11, %v2460_v14, %v5665_v3  ;;  %v2458_v52 = vsub.f32 %v1880_v19, %v5666_v35  ;;  %v1766_v60 = vmul.f32 0.6931472, %v3411_v42  ;;  %2447 = vadd.xlane.f32.xlu1 %v2324_v18  ;;  %v1642_v28 = vpop.xlane.xlu1 %1641  ;;  %v5669_v14 = vld [vmem:[#allocation46_spill] sm:$0xff] }
 0x37d   : > { %2589 = vst [vmem:[%s4929_s11 + $0x18] sm:$0xff] %v2525_v12  ;;  %v2524_v49 = vsel %vm2521_vm11, %v2459_v17, %v5667_v39  ;;  %v1764_v6 = vmul.f32 0.6931472, %v3413_v10  ;;  %3422 = vlog2.f32 %v1642_v28  ;;  %2445 = vadd.xlane.f32.xlu0 %v2323_v51  ;;  %v1640_v3 = vpop.xlane.xlu0 %1639  ;;  %vm2262_vm14 = vcmp.eq.s32.totalorder %v5655_v20, %v5669_v14  ;;  %v5670_v19 = vld [vmem:[#allocation6_spill] sm:$0xff]  ;;  %v5671_v12 = vld [vmem:[#allocation61_spill] sm:$0xff]  ;;  %v5672_v17 = vld [vmem:[#allocation44_spill] sm:$0xff] }
 0x37e   : > { %v2457_v58 = vsub.f32 %v1879_v0, %v5668_v32  ;;  %2588 = vst [vmem:[%s4929_s11 + $0x10] sm:$0xff] %v2524_v49  ;;  %v2523_v42 = vsel %vm2521_vm11, %v2458_v52, %v5670_v19  ;;  %v1886_v18 = vadd.f32 %v1766_v60, %v5671_v12  ;;  %3424 = vlog2.f32 %v1640_v3  ;;  %v5673_v10 = vld [vmem:[#allocation4_spill] sm:$0xff]  ;;  %v5674_v49 = vld [vmem:[#allocation67_spill] sm:$0xff] }
 0x37f   : > { %v3415_v35 = vpop.eup %3414  ;;  %vm2261_vm15 = vcmp.eq.s32.totalorder %v5655_v20, %v5672_v17  ;;  %2587 = vst [vmem:[%s4929_s11 + $0x8] sm:$0xff] %v2523_v42  ;;  %v1885_v28 = vadd.f32 %v1764_v6, %v4400_v61  ;;  %v2326_v51 = vsel %vm2262_vm14, %v4646_v50, 0.0  ;;  %v5675_v14 = vld [vmem:[#allocation68_spill] sm:$0xff]  ;;  %v5677_v6 = vld [vmem:[#allocation7_spill] sm:$0xff] }
 0x380   : > { %v2522_v0 = vsel %vm2521_vm11, %v2457_v58, %v5673_v10  ;;  %v3417_v39 = vpop.eup %3416  ;;  %v2464_v52 = vsub.f32 %v1886_v18, %v5674_v49  ;;  %v1762_v60 = vmul.f32 0.6931472, %v3415_v35  ;;  %2451 = vadd.xlane.f32.xlu1 %v2326_v51  ;;  %v1654_v32 = vpop.xlane.xlu1 %1653  ;;  %v2325_v3 = vsel %vm2261_vm15, %v4654_v34, 0.0  ;;  %v5676_v61 = vld [vmem:[#allocation48_spill] sm:$0xff]  ;;  %v5678_v18 = vld [vmem:[#allocation63_spill] sm:$0xff]  ;;  %v5681_v51 = vld [vmem:[#allocation65_spill] sm:$0xff] }
 0x381   : > { %2586 = vst [vmem:[%s4929_s11] sm:$0xff] %v2522_v0  ;;  %v2463_v19 = vsub.f32 %v1885_v28, %v5675_v14  ;;  %v1760_v42 = vmul.f32 0.6931472, %v3417_v39  ;;  %3426 = vlog2.f32 %v1654_v32  ;;  %2449 = vadd.xlane.f32.xlu0 %v2325_v3  ;;  %v1652_v58 = vpop.xlane.xlu0 %1651  ;;  %vm2264_vm0 = vcmp.eq.s32.totalorder %v5655_v20, %v5676_v61  ;;  %v5679_v10 = vld [vmem:[#allocation47_spill] sm:$0xff]  ;;  %v5680_v0 = vld [vmem:[#allocation8_spill] sm:$0xff]  ;;  %v5683_v61 = vld [vmem:[#allocation70_spill] sm:$0xff] }
 0x382   : > { %v2529_v12 = vsel %vm2521_vm11, %v2464_v52, %v5677_v6  ;;  %v1884_v35 = vadd.f32 %v1762_v60, %v5678_v18  ;;  %3428 = vlog2.f32 %v1652_v58  ;;  %vm2263_vm1 = vcmp.eq.s32.totalorder %v5655_v20, %v5679_v10  ;;  %v5682_v52 = vld [vmem:[#allocation69_spill] sm:$0xff]  ;;  %v5685_v10 = vld [vmem:[#allocation71_spill] sm:$0xff] }
 0x383   : > { %v3419_v17 = vpop.eup %3418  ;;  %2593 = vst [vmem:[%s4929_s11 + $0x38] sm:$0xff] %v2529_v12  ;;  %v2528_v28 = vsel %vm2521_vm11, %v2463_v19, %v5680_v0  ;;  %v1883_v39 = vadd.f32 %v1760_v42, %v5681_v51  ;;  %v2328_v49 = vsel %vm2264_vm0, %v4628_v24, 0.0  ;;  %v2327_v58 = vsel %vm2263_vm1, %v4636_v37, 0.0  ;;  %v5684_v42 = vld [vmem:[#allocation9_spill] sm:$0xff] }
 0x384   : > { %v3421_v32 = vpop.eup %3420  ;;  %2592 = vst [vmem:[%s4929_s11 + $0x30] sm:$0xff] %v2528_v28  ;;  %v2462_v3 = vsub.f32 %v1884_v35, %v5682_v52  ;;  %v1774_v60 = vmul.f32 0.6931472, %v3419_v17  ;;  %2455 = vadd.xlane.f32.xlu1 %v2328_v49  ;;  %v1650_v14 = vpop.xlane.xlu1 %1649  ;;  %v5686_v17 = vld [vmem:[#allocation10_spill] sm:$0xff]  ;;  %v5687_v51 = vld [vmem:[#allocation73_spill] sm:$0xff] }
 0x385   : > { %v2461_v6 = vsub.f32 %v1883_v39, %v5683_v61  ;;  %v1772_v12 = vmul.f32 0.6931472, %v3421_v32  ;;  %3430 = vlog2.f32 %v1650_v14  ;;  %2453 = vadd.xlane.f32.xlu0 %v2327_v58  ;;  %v1648_v19 = vpop.xlane.xlu0 %1647  ;;  %v5688_v32 = vld [vmem:[#allocation79_spill] sm:$0xff] }
 0x386   : > { %v2527_v18 = vsel %vm2521_vm11, %v2462_v3, %v5684_v42  ;;  %v1890_v0 = vadd.f32 %v1774_v60, %v5685_v10  ;;  %3432 = vlog2.f32 %v1648_v19  ;;  %v5689_v3 = vld [vmem:[#allocation80_spill] sm:$0xff]  ;;  %v5690_v42 = vld [vmem:[#allocation11_spill] sm:$0xff] }
 0x387   : > { %v3423_v35 = vpop.eup %3422  ;;  %2591 = vst [vmem:[%s4929_s11 + $0x28] sm:$0xff] %v2527_v18  ;;  %v2526_v28 = vsel %vm2521_vm11, %v2461_v6, %v5686_v17  ;;  %v1889_v39 = vadd.f32 %v1772_v12, %v5687_v51  ;;  %v5691_v10 = vld [vmem:[#allocation75_spill] sm:$0xff]  ;;  %v5692_v17 = vld [vmem:[#allocation12_spill] sm:$0xff] }
 0x388   : > { %v3425_v49 = vpop.eup %3424  ;;  %2590 = vst [vmem:[%s4929_s11 + $0x20] sm:$0xff] %v2526_v28  ;;  %v2468_v52 = vsub.f32 %v1890_v0, %v5688_v32  ;;  %v1770_v14 = vmul.f32 0.6931472, %v3423_v35  ;;  %v1662_v58 = vpop.xlane.xlu1 %1661  ;;  %v5693_v35 = vld [vmem:[#allocation77_spill] sm:$0xff] }
 0x389   : > { %v2467_v61 = vsub.f32 %v1889_v39, %v5689_v3  ;;  %v1768_v60 = vmul.f32 0.6931472, %v3425_v49  ;;  %3434 = vlog2.f32 %v1662_v58  ;;  %v1660_v19 = vpop.xlane.xlu0 %1659  ;;  %v5694_v39 = vld [vmem:[#allocation81_spill] sm:$0xff] }
 0x38a   : > { %v2533_v18 = vsel %vm2521_vm11, %v2468_v52, %v5690_v42  ;;  %v1888_v6 = vadd.f32 %v1770_v14, %v5691_v10  ;;  %3436 = vlog2.f32 %v1660_v19  ;;  %v5695_v52 = vld [vmem:[#allocation82_spill] sm:$0xff]  ;;  %v5696_v42 = vld [vmem:[#allocation13_spill] sm:$0xff] }
 0x38b   : > { %v3427_v12 = vpop.eup %3426  ;;  %2597 = vst [vmem:[%s4929_s11 + $0x58] sm:$0xff] %v2533_v18  ;;  %v2532_v0 = vsel %vm2521_vm11, %v2467_v61, %v5692_v17  ;;  %v1887_v28 = vadd.f32 %v1768_v60, %v5693_v35  ;;  %v5697_v10 = vld [vmem:[#allocation14_spill] sm:$0xff] }
 0x38c   : > { %v3429_v51 = vpop.eup %3428  ;;  %2596 = vst [vmem:[%s4929_s11 + $0x50] sm:$0xff] %v2532_v0  ;;  %v2466_v49 = vsub.f32 %v1888_v6, %v5694_v39  ;;  %v1782_v32 = vmul.f32 0.6931472, %v3427_v12  ;;  %v1658_v58 = vpop.xlane.xlu1 %1657  ;;  %v5698_v0 = vld [vmem:[#allocation87_spill] sm:$0xff]  ;;  %v5699_v39 = vld [vmem:[#allocation88_spill] sm:$0xff] }
 0x38d   : > { %v2465_v3 = vsub.f32 %v1887_v28, %v5695_v52  ;;  %v1780_v14 = vmul.f32 0.6931472, %v3429_v51  ;;  %3438 = vlog2.f32 %v1658_v58  ;;  %v1656_v19 = vpop.xlane.xlu0 %1655  ;;  %v5700_v58 = vld [vmem:[#allocation15_spill] sm:$0xff] }
 0x38e   : > { %v2531_v18 = vsel %vm2521_vm11, %v2466_v49, %v5696_v42  ;;  %v1894_v61 = vadd.f32 %v1782_v32, %v4490_v1  ;;  %3440 = vlog2.f32 %v1656_v19 }
 0x38f   : > { %v3431_v60 = vpop.eup %3430  ;;  %2595 = vst [vmem:[%s4929_s11 + $0x48] sm:$0xff] %v2531_v18  ;;  %v2530_v6 = vsel %vm2521_vm11, %v2465_v3, %v5697_v10  ;;  %v1893_v12 = vadd.f32 %v1780_v14, %v4496_v11  ;;  %v5701_v14 = vld [vmem:[#allocation16_spill] sm:$0xff] }
 0x390   : > { %v3433_v17 = vpop.eup %3432  ;;  %2594 = vst [vmem:[%s4929_s11 + $0x40] sm:$0xff] %v2530_v6  ;;  %v2472_v35 = vsub.f32 %v1894_v61, %v5698_v0  ;;  %v1778_v28 = vmul.f32 0.6931472, %v3431_v60  ;;  %v1670_v51 = vpop.xlane.xlu1 %1669  ;;  %v5702_v61 = vld [vmem:[#allocation89_spill] sm:$0xff] }
 0x391   : > { %v2471_v49 = vsub.f32 %v1893_v12, %v5699_v39  ;;  %v1776_v1 = vmul.f32 0.6931472, %v3433_v17  ;;  %3442 = vlog2.f32 %v1670_v51  ;;  %v1668_v32 = vpop.xlane.xlu0 %1667  ;;  %v5703_v12 = vld [vmem:[#allocation90_spill] sm:$0xff]  ;;  %v5705_v51 = vld [vmem:[#allocation91_spill] sm:$0xff] }
 0x392   : > { %v2537_v52 = vsel %vm2521_vm11, %v2472_v35, %v5700_v58  ;;  %v1892_v3 = vadd.f32 %v1778_v28, %v4504_v38  ;;  %3444 = vlog2.f32 %v1668_v32  ;;  %v5704_v35 = vld [vmem:[#allocation17_spill] sm:$0xff] }
 0x393   : > { %v3435_v11 = vpop.eup %3434  ;;  %2601 = vst [vmem:[%s4929_s11 + $0x78] sm:$0xff] %v2537_v52  ;;  %v2536_v19 = vsel %vm2521_vm11, %v2471_v49, %v5701_v14  ;;  %v1891_v42 = vadd.f32 %v1776_v1, %v4510_v59  ;;  %v5706_v49 = vld [vmem:[#allocation18_spill] sm:$0xff]  ;;  %v5707_v32 = vld [vmem:[#allocation93_spill] sm:$0xff] }
 0x394   : > { %v3437_v18 = vpop.eup %3436  ;;  %2600 = vst [vmem:[%s4929_s11 + $0x70] sm:$0xff] %v2536_v19  ;;  %v2470_v60 = vsub.f32 %v1892_v3, %v5702_v61  ;;  %v1790_v10 = vmul.f32 0.6931472, %v3435_v11  ;;  %v1666_v6 = vpop.xlane.xlu1 %1665  ;;  %v5708_v3 = vld [vmem:[#allocation97_spill] sm:$0xff] }
 0x395   : > { %v2469_v17 = vsub.f32 %v1891_v42, %v5703_v12  ;;  %v1788_v38 = vmul.f32 0.6931472, %v3437_v18  ;;  %3446 = vlog2.f32 %v1666_v6  ;;  %v1664_v0 = vpop.xlane.xlu0 %1663  ;;  %v5709_v42 = vld [vmem:[#allocation98_spill] sm:$0xff]  ;;  %v5711_v12 = vld [vmem:[#allocation95_spill] sm:$0xff] }
 0x396   : > { %v2535_v28 = vsel %vm2521_vm11, %v2470_v60, %v5704_v35  ;;  %v1898_v39 = vadd.f32 %v1790_v10, %v5705_v51  ;;  %3448 = vlog2.f32 %v1664_v0  ;;  %v5710_v10 = vld [vmem:[#allocation19_spill] sm:$0xff]  ;;  %v5712_v0 = vld [vmem:[#allocation20_spill] sm:$0xff] }
 0x397   : > { %v3439_v59 = vpop.eup %3438  ;;  %2599 = vst [vmem:[%s4929_s11 + $0x68] sm:$0xff] %v2535_v28  ;;  %v2534_v1 = vsel %vm2521_vm11, %v2469_v17, %v5706_v49  ;;  %v1897_v58 = vadd.f32 %v1788_v38, %v5707_v32  ;;  %v5713_v28 = vld [vmem:[#allocation96_spill] sm:$0xff] }
 0x398   : > { %v3441_v52 = vpop.eup %3440  ;;  %2598 = vst [vmem:[%s4929_s11 + $0x60] sm:$0xff] %v2534_v1  ;;  %v2476_v11 = vsub.f32 %v1898_v39, %v5708_v3  ;;  %v1786_v14 = vmul.f32 0.6931472, %v3439_v59  ;;  %v1678_v19 = vpop.xlane.xlu1 %1677  ;;  %v5714_v59 = vld [vmem:[#allocation99_spill] sm:$0xff] }
 0x399   : > { %v2475_v18 = vsub.f32 %v1897_v58, %v5709_v42  ;;  %v1784_v61 = vmul.f32 0.6931472, %v3441_v52  ;;  %3450 = vlog2.f32 %v1678_v19  ;;  %v1676_v60 = vpop.xlane.xlu0 %1675  ;;  %v5715_v58 = vld [vmem:[#allocation100_spill] sm:$0xff] }
 0x39a   : > { %v2541_v6 = vsel %vm2521_vm11, %v2476_v11, %v5710_v10  ;;  %v1896_v17 = vadd.f32 %v1786_v14, %v5711_v12  ;;  %3452 = vlog2.f32 %v1676_v60  ;;  %v5716_v14 = vld [vmem:[#allocation21_spill] sm:$0xff]  ;;  %v5718_v12 = vld [vmem:[#allocation102_spill] sm:$0xff] }
 0x39b   : > { %v3443_v38 = vpop.eup %3442  ;;  %2605 = vst [vmem:[%s4929_s11 + $0x98] sm:$0xff] %v2541_v6  ;;  %v2540_v35 = vsel %vm2521_vm11, %v2475_v18, %v5712_v0  ;;  %v1895_v51 = vadd.f32 %v1784_v61, %v5713_v28  ;;  %v5717_v61 = vld [vmem:[#allocation22_spill] sm:$0xff] }
 0x39c   : > { %v3445_v39 = vpop.eup %3444  ;;  %2604 = vst [vmem:[%s4929_s11 + $0x90] sm:$0xff] %v2540_v35  ;;  %v2474_v49 = vsub.f32 %v1896_v17, %v5714_v59  ;;  %v1798_v1 = vmul.f32 0.6931472, %v3443_v38  ;;  %v1674_v32 = vpop.xlane.xlu1 %1673  ;;  %v5719_v35 = vld [vmem:[#allocation103_spill] sm:$0xff] }
 0x39d   : > { %v2473_v52 = vsub.f32 %v1895_v51, %v5715_v58  ;;  %v1796_v3 = vmul.f32 0.6931472, %v3445_v39  ;;  %3454 = vlog2.f32 %v1674_v32  ;;  %v1672_v11 = vpop.xlane.xlu0 %1671  ;;  %v5720_v39 = vld [vmem:[#allocation23_spill] sm:$0xff] }
 0x39e   : > { %v2539_v19 = vsel %vm2521_vm11, %v2474_v49, %v5716_v14  ;;  %v1902_v42 = vadd.f32 %v1798_v1, %v4588_v53  ;;  %3456 = vlog2.f32 %v1672_v11  ;;  %v5721_v1 = vld [vmem:[#allocation24_spill] sm:$0xff] }
 0x39f   : > { %v3447_v18 = vpop.eup %3446  ;;  %2603 = vst [vmem:[%s4929_s11 + $0x88] sm:$0xff] %v2539_v19  ;;  %v2538_v60 = vsel %vm2521_vm11, %v2473_v52, %v5717_v61  ;;  %v1901_v10 = vadd.f32 %v1796_v3, %v4596_v56  ;;  %v5722_v3 = vld [vmem:[#allocation36_spill] sm:$0xff] }
 0x3a0   : > { %v3449_v6 = vpop.eup %3448  ;;  %2602 = vst [vmem:[%s4929_s11 + $0x80] sm:$0xff] %v2538_v60  ;;  %v2480_v17 = vsub.f32 %v1902_v42, %v5718_v12  ;;  %v1794_v38 = vmul.f32 0.6931472, %v3447_v18  ;;  %v1686_v0 = vpop.xlane.xlu1 %1685  ;;  %v5723_v42 = vld [vmem:[#allocation104_spill] sm:$0xff]  ;;  %v5724_v60 = vld [vmem:[#allocation25_spill] sm:$0xff] }
 0x3a1   : > { %v2479_v28 = vsub.f32 %v1901_v10, %v5719_v35  ;;  %v1792_v53 = vmul.f32 0.6931472, %v3449_v6  ;;  %3458 = vlog2.f32 %v1686_v0  ;;  %v1684_v51 = vpop.xlane.xlu0 %1683  ;;  %v5725_v6 = vld [vmem:[#allocation105_spill] sm:$0xff]  ;;  %v5727_v0 = vld [vmem:[#allocation106_spill] sm:$0xff] }
 0x3a2   : > { %v2545_v59 = vsel %vm2521_vm11, %v2480_v17, %v5720_v39  ;;  %v1900_v49 = vadd.f32 %v1794_v38, %v4606_v55  ;;  %3460 = vlog2.f32 %v1684_v51  ;;  %v5726_v17 = vld [vmem:[#allocation26_spill] sm:$0xff] }
 0x3a3   : > { %v3451_v56 = vpop.eup %3450  ;;  %2609 = vst [vmem:[%s4929_s11 + $0xb8] sm:$0xff] %v2545_v59  ;;  %v2544_v32 = vsel %vm2521_vm11, %v2479_v28, %v5721_v1  ;;  %v1899_v58 = vadd.f32 %v1792_v53, %v4614_v43  ;;  %v5728_v53 = vld [vmem:[#allocation107_spill] sm:$0xff] }
 0x3a4   : > { %v3453_v52 = vpop.eup %3452  ;;  %2608 = vst [vmem:[%s4929_s11 + $0xb0] sm:$0xff] %v2544_v32  ;;  %v2478_v11 = vsub.f32 %v1900_v49, %v5722_v3  ;;  %v1806_v14 = vmul.f32 0.6931472, %v3451_v56  ;;  %v1682_v19 = vpop.xlane.xlu1 %1681  ;;  %v5729_v49 = vld [vmem:[#allocation108_spill] sm:$0xff] }
 0x3a5   : > { %v2477_v18 = vsub.f32 %v1899_v58, %v5723_v42  ;;  %v1804_v55 = vmul.f32 0.6931472, %v3453_v52  ;;  %3462 = vlog2.f32 %v1682_v19  ;;  %v1680_v61 = vpop.xlane.xlu0 %1679  ;;  %v5730_v58 = vld [vmem:[#allocation27_spill] sm:$0xff] }
 0x3a6   : > { %v2543_v10 = vsel %vm2521_vm11, %v2478_v11, %v5724_v60  ;;  %v1906_v12 = vadd.f32 %v1806_v14, %v5725_v6  ;;  %3464 = vlog2.f32 %v1680_v61  ;;  %v5731_v14 = vld [vmem:[#allocation28_spill] sm:$0xff]  ;;  %v5733_v6 = vld [vmem:[#allocation110_spill] sm:$0xff] }
 0x3a7   : > { %v3455_v43 = vpop.eup %3454  ;;  %2607 = vst [vmem:[%s4929_s11 + $0xa8] sm:$0xff] %v2543_v10  ;;  %v2542_v38 = vsel %vm2521_vm11, %v2477_v18, %v5726_v17  ;;  %v1905_v35 = vadd.f32 %v1804_v55, %v5727_v0  ;;  %v5732_v55 = vld [vmem:[#allocation109_spill] sm:$0xff] }
 0x3a8   : > { %v3457_v28 = vpop.eup %3456  ;;  %2606 = vst [vmem:[%s4929_s11 + $0xa0] sm:$0xff] %v2542_v38  ;;  %v2484_v51 = vsub.f32 %v1906_v12, %v5728_v53  ;;  %v1802_v39 = vmul.f32 0.6931472, %v3455_v43  ;;  %v1694_v59 = vpop.xlane.xlu1 %1693  ;;  %v5734_v17 = vld [vmem:[#allocation29_spill] sm:$0xff] }
 0x3a9   : > { %v2483_v56 = vsub.f32 %v1905_v35, %v5729_v49  ;;  %v1800_v1 = vmul.f32 0.6931472, %v3457_v28  ;;  %3466 = vlog2.f32 %v1694_v59  ;;  %v1692_v32 = vpop.xlane.xlu0 %1691  ;;  %v5735_v35 = vld [vmem:[#allocation30_spill] sm:$0xff] }
 0x3aa   : > { %v2549_v52 = vsel %vm2521_vm11, %v2484_v51, %v5730_v58  ;;  %v1904_v3 = vadd.f32 %v1802_v39, %v4668_v7  ;;  %3468 = vlog2.f32 %v1692_v32  ;;  %v5736_v39 = vld [vmem:[#allocation111_spill] sm:$0xff] }
 0x3ab   : > { %v3459_v11 = vpop.eup %3458  ;;  %2613 = vst [vmem:[%s4929_s11 + $0xd8] sm:$0xff] %v2549_v52  ;;  %v2548_v19 = vsel %vm2521_vm11, %v2483_v56, %v5731_v14  ;;  %v1903_v42 = vadd.f32 %v1800_v1, %v4672_v29  ;;  %v5737_v1 = vld [vmem:[#allocation112_spill] sm:$0xff] }
 0x3ac   : > { %v3461_v18 = vpop.eup %3460  ;;  %2612 = vst [vmem:[%s4929_s11 + $0xd0] sm:$0xff] %v2548_v19  ;;  %v2482_v61 = vsub.f32 %v1904_v3, %v5732_v55  ;;  %v1814_v60 = vmul.f32 0.6931472, %v3459_v11  ;;  %v1690_v10 = vpop.xlane.xlu1 %1689 }
 0x3ad   : > { %v2481_v12 = vsub.f32 %v1903_v42, %v5733_v6  ;;  %v1812_v7 = vmul.f32 0.6931472, %v3461_v18  ;;  %3470 = vlog2.f32 %v1690_v10  ;;  %v1688_v43 = vpop.xlane.xlu0 %1687  ;;  %v5738_v42 = vld [vmem:[#allocation113_spill] sm:$0xff] }
 0x3ae   : > { %v2547_v38 = vsel %vm2521_vm11, %v2482_v61, %v5734_v17  ;;  %v1910_v0 = vadd.f32 %v1814_v60, %v4692_v40  ;;  %3472 = vlog2.f32 %v1688_v43  ;;  %v5740_v17 = vld [vmem:[#allocation115_spill] sm:$0xff] }
 0x3af   : > { %v3463_v29 = vpop.eup %3462  ;;  %2611 = vst [vmem:[%s4929_s11 + $0xc8] sm:$0xff] %v2547_v38  ;;  %v2546_v28 = vsel %vm2521_vm11, %v2481_v12, %v5735_v35  ;;  %v1909_v53 = vadd.f32 %v1812_v7, %v4696_v22 }
 0x3b0   : > { %v3465_v51 = vpop.eup %3464  ;;  %2610 = vst [vmem:[%s4929_s11 + $0xc0] sm:$0xff] %v2546_v28  ;;  %v2488_v59 = vsub.f32 %v1910_v0, %v5736_v39  ;;  %v1810_v49 = vmul.f32 0.6931472, %v3463_v29  ;;  %v1702_v56 = vpop.xlane.xlu1 %1701  ;;  %v5743_v39 = vld [vmem:[#allocation42_spill] sm:$0xff] }
 0x3b1   : > { %v2487_v32 = vsub.f32 %v1909_v53, %v5737_v1  ;;  %v1808_v40 = vmul.f32 0.6931472, %v3465_v51  ;;  %3474 = vlog2.f32 %v1702_v56  ;;  %v1700_v58 = vpop.xlane.xlu0 %1699  ;;  %v5742_v53 = vld [vmem:[#allocation41_spill] sm:$0xff] }
 0x3b2   : > { %v2553_v52 = vsel %vm2521_vm11, %v2488_v59, %v4250_v41  ;;  %v1908_v3 = vadd.f32 %v1810_v49, %v4700_v31  ;;  %3476 = vlog2.f32 %v1700_v58  ;;  %v5739_v41 = vld [vmem:[#allocation114_spill] sm:$0xff]  ;;  %v5744_v1 = vld [vmem:[#allocation117_spill] sm:$0xff] }
 0x3b3   : > { %v3467_v22 = vpop.eup %3466  ;;  %2617 = vst [vmem:[%s4929_s11 + $0xf8] sm:$0xff] %v2553_v52  ;;  %v2552_v11 = vsel %vm2521_vm11, %v2487_v32, %v4256_v4  ;;  %v1907_v14 = vadd.f32 %v1808_v40, %v4704_v13  ;;  %v5745_v52 = vld [vmem:[#allocation118_spill] sm:$0xff] }
 0x3b4   : > { %v3469_v19 = vpop.eup %3468  ;;  %2616 = vst [vmem:[%s4929_s11 + $0xf0] sm:$0xff] %v2552_v11  ;;  %v2486_v18 = vsub.f32 %v1908_v3, %v5738_v42  ;;  %v1822_v55 = vmul.f32 0.6931472, %v3467_v22  ;;  %v1698_v61 = vpop.xlane.xlu1 %1697  ;;  %v5746_v11 = vld [vmem:[#allocation43_spill] sm:$0xff]  ;;  %v5747_v42 = vld [vmem:[#allocation45_spill] sm:$0xff] }
 0x3b5   : > { %v2485_v60 = vsub.f32 %v1907_v14, %v5739_v41  ;;  %v1820_v31 = vmul.f32 0.6931472, %v3469_v19  ;;  %3478 = vlog2.f32 %v1698_v61  ;;  %v1696_v10 = vpop.xlane.xlu0 %1695 }
 0x3b6   : > { %v2551_v6 = vsel %vm2521_vm11, %v2486_v18, %v4270_v8  ;;  %v1914_v4 = vadd.f32 %v1822_v55, %v4724_v62  ;;  %3480 = vlog2.f32 %v1696_v10  ;;  %v5741_v8 = vld [vmem:[#allocation116_spill] sm:$0xff] }
 0x3b7   : > { %v3471_v13 = vpop.eup %3470  ;;  %2615 = vst [vmem:[%s4929_s11 + $0xe8] sm:$0xff] %v2551_v6  ;;  %v2550_v12 = vsel %vm2521_vm11, %v2485_v60, %v4274_v5  ;;  %v1913_v7 = vadd.f32 %v1820_v31, %v4728_v27  ;;  %v5748_v6 = vld [vmem:[#allocation50_spill] sm:$0xff] }
 0x3b8   : > { %v3473_v43 = vpop.eup %3472  ;;  %2614 = vst [vmem:[%s4929_s11 + $0xe0] sm:$0xff] %v2550_v12  ;;  %v2492_v38 = vsub.f32 %v1914_v4, %v5740_v17  ;;  %v1818_v0 = vmul.f32 0.6931472, %v3471_v13  ;;  %v1710_v29 = vpop.xlane.xlu1 %1709  ;;  %v5749_v12 = vld [vmem:[#allocation52_spill] sm:$0xff] }
 0x3b9   : > { %v2491_v35 = vsub.f32 %v1913_v7, %v5741_v8  ;;  %v1816_v62 = vmul.f32 0.6931472, %v3473_v43  ;;  %3482 = vlog2.f32 %v1710_v29  ;;  %v1708_v28 = vpop.xlane.xlu0 %1707  ;;  %v5751_v8 = vld [vmem:[#allocation119_spill] sm:$0xff] }
 0x3ba   : > { %v2557_v51 = vsel %vm2521_vm11, %v2492_v38, %v5742_v53  ;;  %v1912_v5 = vadd.f32 %v1818_v0, %v4732_v46  ;;  %3484 = vlog2.f32 %v1708_v28 }
 0x3bb   : > { %v3475_v27 = vpop.eup %3474  ;;  %2621 = vst [vmem:[%s4929_s11 + $0x118] sm:$0xff] %v2557_v51  ;;  %v2556_v59 = vsel %vm2521_vm11, %v2491_v35, %v5743_v39  ;;  %v1911_v49 = vadd.f32 %v1816_v62, %v4736_v33 }
 0x3bc   : > { %v3477_v56 = vpop.eup %3476  ;;  %2620 = vst [vmem:[%s4929_s11 + $0x110] sm:$0xff] %v2556_v59  ;;  %v2490_v32 = vsub.f32 %v1912_v5, %v5744_v1  ;;  %v1830_v40 = vmul.f32 0.6931472, %v3475_v27  ;;  %v1706_v58 = vpop.xlane.xlu1 %1705 }
 0x3bd   : > { %v2489_v3 = vsub.f32 %v1911_v49, %v5745_v52  ;;  %v1828_v46 = vmul.f32 0.6931472, %v3477_v56  ;;  %3486 = vlog2.f32 %v1706_v58  ;;  %v1704_v22 = vpop.xlane.xlu0 %1703  ;;  %v5753_v49 = vld [vmem:[#allocation62_spill] sm:$0xff]  ;;  %v5755_v58 = vld [vmem:[#allocation121_spill] sm:$0xff] }
 0x3be   : > { %v2555_v14 = vsel %vm2521_vm11, %v2490_v32, %v5746_v11  ;;  %v1918_v19 = vadd.f32 %v1830_v40, %v4756_v2  ;;  %3488 = vlog2.f32 %v1704_v22 }
 0x3bf   : > { %v3479_v33 = vpop.eup %3478  ;;  %2619 = vst [vmem:[%s4929_s11 + $0x108] sm:$0xff] %v2555_v14  ;;  %v2554_v18 = vsel %vm2521_vm11, %v2489_v3, %v5747_v42  ;;  %v1917_v55 = vadd.f32 %v1828_v46, %v4760_v57  ;;  %v5756_v3 = vld [vmem:[#allocation64_spill] sm:$0xff] }
 0x3c0   : > { %v3481_v61 = vpop.eup %3480  ;;  %2618 = vst [vmem:[%s4929_s11 + $0x100] sm:$0xff] %v2554_v18  ;;  %v2496_v41 = vsub.f32 %v1918_v19, %v4772_v23  ;;  %v1826_v60 = vmul.f32 0.6931472, %v3479_v33  ;;  %v5758_v19 = vld [vmem:[#allocation122_spill] sm:$0xff] }
 0x3c1   : > { %v2495_v31 = vsub.f32 %v1917_v55, %v4776_v26  ;;  %v1824_v10 = vmul.f32 0.6931472, %v3481_v61  ;;  %v5759_v61 = vld [vmem:[#allocation125_spill] sm:$0xff] }
 0x3c2   : > { %v2561_v2 = vsel %vm2521_vm11, %v2496_v41, %v5748_v6  ;;  %v1916_v4 = vadd.f32 %v1826_v60, %v4764_v44  ;;  %v5750_v44 = vld [vmem:[#allocation54_spill] sm:$0xff] }
 0x3c3   : > { %v3483_v13 = vpop.eup %3482  ;;  %2625 = vst [vmem:[%s4929_s11 + $0x138] sm:$0xff] %v2561_v2  ;;  %v2560_v57 = vsel %vm2521_vm11, %v2495_v31, %v5749_v12  ;;  %v1915_v7 = vadd.f32 %v1824_v10, %v4768_v54  ;;  %v5752_v54 = vld [vmem:[#allocation56_spill] sm:$0xff]  ;;  %v5760_v10 = vld [vmem:[#allocation126_spill] sm:$0xff] }
 0x3c4   : > { %v3485_v23 = vpop.eup %3484  ;;  %2624 = vst [vmem:[%s4929_s11 + $0x130] sm:$0xff] %v2560_v57  ;;  %v2494_v26 = vsub.f32 %v1916_v4, %v4780_v21  ;;  %v1838_v43 = vmul.f32 0.6931472, %v3483_v13  ;;  %v5761_v13 = vld [vmem:[#allocation72_spill] sm:$0xff]  ;;  %v5762_v57 = vld [vmem:[#allocation123_spill] sm:$0xff] }
 0x3c5   : > { %v2493_v17 = vsub.f32 %v1915_v7, %v4784_v36  ;;  %v1836_v38 = vmul.f32 0.6931472, %v3485_v23  ;;  %v1718_v0 = vpop.xlane.xlu1 %1717 }
 0x3c6   : > { %v2559_v29 = vsel %vm2521_vm11, %v2494_v26, %v5750_v44  ;;  %v1922_v35 = vadd.f32 %v1838_v43, %v5751_v8  ;;  %3490 = vlog2.f32 %v1718_v0  ;;  %v1716_v62 = vpop.xlane.xlu0 %1715  ;;  %v5764_v26 = vld [vmem:[#allocation124_spill] sm:$0xff] }
 0x3c7   : > { %v3487_v28 = vpop.eup %3486  ;;  %2623 = vst [vmem:[%s4929_s11 + $0x128] sm:$0xff] %v2559_v29  ;;  %v2558_v21 = vsel %vm2521_vm11, %v2493_v17, %v5752_v54  ;;  %v1921_v53 = vadd.f32 %v1836_v38, %v4790_v48  ;;  %3492 = vlog2.f32 %v1716_v62  ;;  %v5765_v17 = vld [vmem:[#allocation127_spill] sm:$0xff]  ;;  %v5766_v44 = vld [vmem:[#allocation128_spill] sm:$0xff] }
 0x3c8   : > { %v3489_v36 = vpop.eup %3488  ;;  %2622 = vst [vmem:[%s4929_s11 + $0x120] sm:$0xff] %v2558_v21  ;;  %v2500_v51 = vsub.f32 %v1922_v35, %v4802_v47  ;;  %v1834_v5 = vmul.f32 0.6931472, %v3487_v28  ;;  %v5767_v35 = vld [vmem:[#allocation76_spill] sm:$0xff]  ;;  %v5768_v28 = vld [vmem:[#allocation78_spill] sm:$0xff] }
 0x3c9   : > { %v2499_v27 = vsub.f32 %v1921_v53, %v4804_v16  ;;  %v1832_v39 = vmul.f32 0.6931472, %v3489_v36  ;;  %v1714_v59 = vpop.xlane.xlu1 %1713  ;;  %v5754_v16 = vld [vmem:[#allocation120_spill] sm:$0xff] }
 0x3ca   : > { %v2565_v56 = vsel %vm2521_vm11, %v2500_v51, %v5753_v49  ;;  %v1920_v1 = vadd.f32 %v1834_v5, %v4794_v30  ;;  %3494 = vlog2.f32 %v1714_v59  ;;  %v1712_v48 = vpop.xlane.xlu0 %1711  ;;  %v5757_v30 = vld [vmem:[#allocation66_spill] sm:$0xff]  ;;  %v5769_v5 = vld [vmem:[#allocation129_spill] sm:$0xff] }
 0x3cb   : > { %2629 = vst [vmem:[%s4929_s11 + $0x158] sm:$0xff] %v2565_v56  ;;  %v2564_v47 = vsel %vm2521_vm11, %v2499_v27, %v4404_v45  ;;  %v1919_v32 = vadd.f32 %v1832_v39, %v4798_v9  ;;  %3496 = vlog2.f32 %v1712_v48  ;;  %v5770_v59 = vld [vmem:[#allocation130_spill] sm:$0xff] }
 0x3cc   : > { %2628 = vst [vmem:[%s4929_s11 + $0x150] sm:$0xff] %v2564_v47  ;;  %v2498_v40 = vsub.f32 %v1920_v1, %v5754_v16  ;;  %v5771_v1 = vld [vmem:[#allocation133_spill] sm:$0xff]  ;;  %v5772_v16 = vld [vmem:[#allocation134_spill] sm:$0xff] }
 0x3cd   : > { %v2497_v52 = vsub.f32 %v1919_v32, %v5755_v58 }
 0x3ce   : > { %v2563_v46 = vsel %vm2521_vm11, %v2498_v40, %v5756_v3  ;;  %v5773_v3 = vld [vmem:[#allocation83_spill] sm:$0xff] }
 0x3cf   : > { %2627 = vst [vmem:[%s4929_s11 + $0x148] sm:$0xff] %v2563_v46  ;;  %v2562_v22 = vsel %vm2521_vm11, %v2497_v52, %v5757_v30  ;;  %v5774_v30 = vld [vmem:[#allocation131_spill] sm:$0xff] }
 0x3d0   : > { %v3491_v11 = vpop.eup %3490  ;;  %2626 = vst [vmem:[%s4929_s11 + $0x140] sm:$0xff] %v2562_v22 }
 0x3d1   : > { %v3493_v45 = vpop.eup %3492  ;;  %v1846_v14 = vmul.f32 0.6931472, %v3491_v11  ;;  %v5775_v11 = vld [vmem:[#allocation84_spill] sm:$0xff] }
 0x3d2   : > { %v1844_v9 = vmul.f32 0.6931472, %v3493_v45 }
 0x3d3   : > { %v1926_v33 = vadd.f32 %v1846_v14, %v5758_v19  ;;  %v5776_v14 = vld [vmem:[#allocation132_spill] sm:$0xff]  ;;  %v5777_v19 = vld [vmem:[#allocation135_spill] sm:$0xff] }
 0x3d4   : > { %v3495_v42 = vpop.eup %3494  ;;  %v1925_v18 = vadd.f32 %v1844_v9, %v4814_v25  ;;  %v5763_v25 = vld [vmem:[#allocation74_spill] sm:$0xff] }
 0x3d5   : > { %v3497_v55 = vpop.eup %3496  ;;  %v2504_v41 = vsub.f32 %v1926_v33, %v5759_v61  ;;  %v1842_v60 = vmul.f32 0.6931472, %v3495_v42  ;;  %v1726_v31 = vpop.xlane.xlu1 %1725 }
 0x3d6   : > { %v2503_v6 = vsub.f32 %v1925_v18, %v5760_v10  ;;  %v1840_v2 = vmul.f32 0.6931472, %v3497_v55  ;;  %3498 = vlog2.f32 %v1726_v31  ;;  %v1724_v4 = vpop.xlane.xlu0 %1723  ;;  %v5778_v18 = vld [vmem:[#allocation136_spill] sm:$0xff]  ;;  %v5780_v31 = vld [vmem:[#allocation86_spill] sm:$0xff] }
 0x3d7   : > { %v2569_v12 = vsel %vm2521_vm11, %v2504_v41, %v5761_v13  ;;  %v1924_v7 = vadd.f32 %v1842_v60, %v5762_v57  ;;  %3500 = vlog2.f32 %v1724_v4  ;;  %v5779_v41 = vld [vmem:[#allocation85_spill] sm:$0xff] }
 0x3d8   : > { %2633 = vst [vmem:[%s4929_s11 + $0x178] sm:$0xff] %v2569_v12  ;;  %v2568_v23 = vsel %vm2521_vm11, %v2503_v6, %v5763_v25  ;;  %v1923_v43 = vadd.f32 %v1840_v2, %v5764_v26  ;;  %v5781_v12 = vld [vmem:[#allocation137_spill] sm:$0xff]  ;;  %v5782_v25 = vld [vmem:[#allocation138_spill] sm:$0xff] }
 0x3d9   : > { %2632 = vst [vmem:[%s4929_s11 + $0x170] sm:$0xff] %v2568_v23  ;;  %v2502_v38 = vsub.f32 %v1924_v7, %v5765_v17  ;;  %v1722_v0 = vpop.xlane.xlu1 %1721 }
 0x3da   : > { %v2501_v29 = vsub.f32 %v1923_v43, %v5766_v44  ;;  %3502 = vlog2.f32 %v1722_v0  ;;  %v1720_v8 = vpop.xlane.xlu0 %1719  ;;  %v5783_v43 = vld [vmem:[#allocation141_spill] sm:$0xff]  ;;  %v5784_v44 = vld [vmem:[#allocation142_spill] sm:$0xff] }
 0x3db   : > { %v2567_v62 = vsel %vm2521_vm11, %v2502_v38, %v5767_v35  ;;  %3504 = vlog2.f32 %v1720_v8 }
 0x3dc   : > { %2631 = vst [vmem:[%s4929_s11 + $0x168] sm:$0xff] %v2567_v62  ;;  %v2566_v54 = vsel %vm2521_vm11, %v2501_v29, %v5768_v28  ;;  %v5785_v62 = vld [vmem:[#allocation92_spill] sm:$0xff] }
 0x3dd   : > { %2630 = vst [vmem:[%s4929_s11 + $0x160] sm:$0xff] %v2566_v54  ;;  %v5786_v54 = vld [vmem:[#allocation139_spill] sm:$0xff] }
 0x3e0   : > { %v3499_v21 = vpop.eup %3498 }
 0x3e1   : > { %v3501_v53 = vpop.eup %3500  ;;  %v1854_v36 = vmul.f32 0.6931472, %v3499_v21 }
 0x3e2   : > { %v1852_v51 = vmul.f32 0.6931472, %v3501_v53  ;;  %v5787_v53 = vld [vmem:[#allocation94_spill] sm:$0xff] }
 0x3e3   : > { %v1930_v27 = vadd.f32 %v1854_v36, %v5769_v5 }
 0x3e4   : > { %v3503_v39 = vpop.eup %3502  ;;  %v1929_v49 = vadd.f32 %v1852_v51, %v5770_v59  ;;  %v5788_v51 = vld [vmem:[#allocation140_spill] sm:$0xff] }
 0x3e5   : > { %v3505_v56 = vpop.eup %3504  ;;  %v2508_v48 = vsub.f32 %v1930_v27, %v5771_v1  ;;  %v1850_v47 = vmul.f32 0.6931472, %v3503_v39  ;;  %v1734_v32 = vpop.xlane.xlu1 %1733  ;;  %v5789_v27 = vld [vmem:[#allocation143_spill] sm:$0xff] }
 0x3e6   : > { %v2507_v40 = vsub.f32 %v1929_v49, %v5772_v16  ;;  %v1848_v58 = vmul.f32 0.6931472, %v3505_v56  ;;  %3506 = vlog2.f32 %v1734_v32  ;;  %v1732_v52 = vpop.xlane.xlu0 %1731  ;;  %v5790_v49 = vld [vmem:[#allocation144_spill] sm:$0xff]  ;;  %v5792_v32 = vld [vmem:[#allocation31_spill] sm:$0xff] }
 0x3e7   : > { %v2573_v46 = vsel %vm2521_vm11, %v2508_v48, %v5773_v3  ;;  %v1928_v22 = vadd.f32 %v1850_v47, %v5774_v30  ;;  %3508 = vlog2.f32 %v1732_v52  ;;  %v5791_v48 = vld [vmem:[#allocation32_spill] sm:$0xff] }
 0x3e8   : > { %2637 = vst [vmem:[%s4929_s11 + $0x198] sm:$0xff] %v2573_v46  ;;  %v2572_v45 = vsel %vm2521_vm11, %v2507_v40, %v5775_v11  ;;  %v1927_v9 = vadd.f32 %v1848_v58, %v5776_v14 }
 0x3e9   : > { %2636 = vst [vmem:[%s4929_s11 + $0x190] sm:$0xff] %v2572_v45  ;;  %v2506_v33 = vsub.f32 %v1928_v22, %v5777_v19  ;;  %v1730_v42 = vpop.xlane.xlu1 %1729 }
 0x3ea   : > { %v2505_v55 = vsub.f32 %v1927_v9, %v5778_v18  ;;  %3510 = vlog2.f32 %v1730_v42  ;;  %v1728_v61 = vpop.xlane.xlu0 %1727  ;;  %v5793_v18 = vld [vmem:[#allocation33_spill] sm:$0xff] }
 0x3eb   : > { %v2571_v60 = vsel %vm2521_vm11, %v2506_v33, %v5779_v41  ;;  %3512 = vlog2.f32 %v1728_v61  ;;  %v5794_v61 = vld [vmem:[#allocation146_spill] sm:$0xff] }
 0x3ec   : > { %2635 = vst [vmem:[%s4929_s11 + $0x188] sm:$0xff] %v2571_v60  ;;  %v2570_v10 = vsel %vm2521_vm11, %v2505_v55, %v5780_v31  ;;  %v5795_v60 = vld [vmem:[#allocation145_spill] sm:$0xff] }
 0x3ed   : > { %2634 = vst [vmem:[%s4929_s11 + $0x180] sm:$0xff] %v2570_v10 }
 0x3f0   : > { %v3507_v6 = vpop.eup %3506 }
 0x3f1   : > { %v3509_v2 = vpop.eup %3508  ;;  %v1862_v4 = vmul.f32 0.6931472, %v3507_v6 }
 0x3f2   : > { %v1860_v13 = vmul.f32 0.6931472, %v3509_v2 }
 0x3f3   : > { %v1934_v57 = vadd.f32 %v1862_v4, %v5781_v12  ;;  %v5796_v4 = vld [vmem:[#allocation101_spill] sm:$0xff] }
 0x3f4   : > { %v3511_v7 = vpop.eup %3510  ;;  %v1933_v23 = vadd.f32 %v1860_v13, %v5782_v25 }
 0x3f5   : > { %v3513_v26 = vpop.eup %3512  ;;  %v2512_v17 = vsub.f32 %v1934_v57, %v5783_v43  ;;  %v1858_v38 = vmul.f32 0.6931472, %v3511_v7  ;;  %v1742_v0 = vpop.xlane.xlu1 %1741 }
 0x3f6   : > { %v2511_v29 = vsub.f32 %v1933_v23, %v5784_v44  ;;  %v1856_v8 = vmul.f32 0.6931472, %v3513_v26  ;;  %v1740_v35 = vpop.xlane.xlu0 %1739  ;;  %3514 = vlog2.f32 %v1742_v0  ;;  %v5797_v23 = vld [vmem:[#allocation35_spill] sm:$0xff]  ;;  %v5798_v0 = vld [vmem:[#allocation34_spill] sm:$0xff] }
 0x3f7   : > { %v2577_v28 = vsel %vm2521_vm11, %v2512_v17, %v5785_v62  ;;  %v1932_v21 = vadd.f32 %v1858_v38, %v5786_v54  ;;  %3516 = vlog2.f32 %v1740_v35 }
 0x3f8   : > { %2641 = vst [vmem:[%s4929_s11 + $0x1b8] sm:$0xff] %v2577_v28  ;;  %v2576_v36 = vsel %vm2521_vm11, %v2511_v29, %v5787_v53  ;;  %v1931_v5 = vadd.f32 %v1856_v8, %v5788_v51 }
 0x3f9   : > { %2640 = vst [vmem:[%s4929_s11 + $0x1b0] sm:$0xff] %v2576_v36  ;;  %v2510_v39 = vsub.f32 %v1932_v21, %v5789_v27  ;;  %v1738_v59 = vpop.xlane.xlu1 %1737  ;;  %v5799_v36 = vld [vmem:[#allocation149_spill] sm:$0xff]  ;;  %v5801_v27 = vld [vmem:[#allocation147_spill] sm:$0xff] }
 0x3fa   : > { %v2509_v56 = vsub.f32 %v1931_v5, %v5790_v49  ;;  %3518 = vlog2.f32 %v1738_v59  ;;  %v1736_v1 = vpop.xlane.xlu0 %1735  ;;  %v5800_v5 = vld [vmem:[#allocation150_spill] sm:$0xff] }
 0x3fb   : > { %v2575_v47 = vsel %vm2521_vm11, %v2510_v39, %v5791_v48  ;;  %3520 = vlog2.f32 %v1736_v1 }
 0x3fc   : > { %2639 = vst [vmem:[%s4929_s11 + $0x1a8] sm:$0xff] %v2575_v47  ;;  %v2574_v16 = vsel %vm2521_vm11, %v2509_v56, %v5792_v32  ;;  %v5802_v56 = vld [vmem:[#allocation148_spill] sm:$0xff] }
 0x3fd   : > { %2638 = vst [vmem:[%s4929_s11 + $0x1a0] sm:$0xff] %v2574_v16  ;;  %v1750_v40 = vpop.xlane.xlu1 %1749 }
 0x3fe   : > { %v1748_v58 = vpop.xlane.xlu0 %1747  ;;  %3522 = vlog2.f32 %v1750_v40 }
 0x3ff   : > { %3524 = vlog2.f32 %v1748_v58 }
 0x400   : > { %v3515_v52 = vpop.eup %3514 }
 0x401   : > { %v1746_v3 = vpop.xlane.xlu1 %1745  ;;  %v3517_v46 = vpop.eup %3516  ;;  %v1870_v11 = vmul.f32 0.6931472, %v3515_v52 }
 0x402   : > { %3526 = vlog2.f32 %v1746_v3  ;;  %v1744_v30 = vpop.xlane.xlu0 %1743  ;;  %v1868_v14 = vmul.f32 0.6931472, %v3517_v46 }
 0x403   : > { %3528 = vlog2.f32 %v1744_v30  ;;  %v1938_v31 = vadd.f32 %v1870_v11, %v5795_v60 }
 0x404   : > { %v3519_v22 = vpop.eup %3518  ;;  %v1937_v13 = vadd.f32 %v1868_v14, %v5796_v4 }
 0x405   : > { %v3521_v45 = vpop.eup %3520  ;;  %v1866_v9 = vmul.f32 0.6931472, %v3519_v22  ;;  %v2444_v19 = vpop.xlane.xlu1 %2443 }
 0x406   : > { %v1864_v33 = vmul.f32 0.6931472, %v3521_v45  ;;  %v2442_v42 = vpop.xlane.xlu0 %2441 }
 0x407   : > { %v1936_v55 = vadd.f32 %v1866_v9, %v5793_v18 }
 0x408   : > { %v1935_v41 = vadd.f32 %v1864_v33, %v5794_v61  ;;  %v3523_v10 = vpop.eup %3522 }
 0x409   : > { %v2514_v6 = vsub.f32 %v1936_v55, %v2444_v19  ;;  %v2448_v2 = vpop.xlane.xlu1 %2447  ;;  %v3525_v12 = vpop.eup %3524  ;;  %v1878_v38 = vmul.f32 0.6931472, %v3523_v10 }
 0x40a   : > { %v2513_v57 = vsub.f32 %v1935_v41, %v2442_v42  ;;  %v2516_v7 = vsub.f32 %v1938_v31, %v2448_v2  ;;  %v2446_v25 = vpop.xlane.xlu0 %2445  ;;  %v1876_v35 = vmul.f32 0.6931472, %v3525_v12 }
 0x40b   : > { %v2579_v26 = vsel %vm2521_vm11, %v2514_v6, %v5797_v23  ;;  %v2515_v43 = vsub.f32 %v1937_v13, %v2446_v25  ;;  %v1942_v39 = vadd.f32 %v1878_v38, %v5801_v27 }
 0x40c   : > { %v3527_v17 = vpop.eup %3526  ;;  %2643 = vst [vmem:[%s4929_s11 + $0x1c8] sm:$0xff] %v2579_v26  ;;  %v2578_v44 = vsel %vm2521_vm11, %v2513_v57, %v5798_v0  ;;  %v2581_v29 = vsel %vm2521_vm11, %v2516_v7, %v5645_v15  ;;  %v1941_v1 = vadd.f32 %v1876_v35, %v5802_v56 }
 0x40d   : > { %v3529_v8 = vpop.eup %3528  ;;  %v1874_v62 = vmul.f32 0.6931472, %v3527_v17  ;;  %2642 = vst [vmem:[%s4929_s11 + $0x1c0] sm:$0xff] %v2578_v44  ;;  %2645 = vst [vmem:[%s4929_s11 + $0x1d8] sm:$0xff] %v2581_v29  ;;  %v2580_v28 = vsel %vm2521_vm11, %v2515_v43, %v5647_v63  ;;  %v2452_v54 = vpop.xlane.xlu1 %2451 }
 0x40e   : > { %v1872_v21 = vmul.f32 0.6931472, %v3529_v8  ;;  %2644 = vst [vmem:[%s4929_s11 + $0x1d0] sm:$0xff] %v2580_v28  ;;  %v2450_v53 = vpop.xlane.xlu0 %2449 }
 0x40f   : > { %v1940_v51 = vadd.f32 %v1874_v62, %v5799_v36 }
 0x410   : > { %v1939_v15 = vadd.f32 %v1872_v21, %v5800_v5 }
 0x411   : > { %v2518_v59 = vsub.f32 %v1940_v51, %v2452_v54  ;;  %v2456_v49 = vpop.xlane.xlu1 %2455 }
 0x412   : > { %v2517_v48 = vsub.f32 %v1939_v15, %v2450_v53  ;;  %v2520_v63 = vsub.f32 %v1942_v39, %v2456_v49  ;;  %v2454_v47 = vpop.xlane.xlu0 %2453 }
 0x413   : > { %v2583_v32 = vsel %vm2521_vm11, %v2518_v59, %v4646_v50  ;;  %v2519_v16 = vsub.f32 %v1941_v1, %v2454_v47 }
 0x414   : > { %2647 = vst [vmem:[%s4929_s11 + $0x1e8] sm:$0xff] %v2583_v32  ;;  %v2582_v40 = vsel %vm2521_vm11, %v2517_v48, %v4654_v34  ;;  %v2585_v58 = vsel %vm2521_vm11, %v2520_v63, %v4628_v24 }
 0x415   : > { %2646 = vst [vmem:[%s4929_s11 + $0x1e0] sm:$0xff] %v2582_v40  ;;  %2649 = vst [vmem:[%s4929_s11 + $0x1f8] sm:$0xff] %v2585_v58  ;;  %v2584_v52 = vsel %vm2521_vm11, %v2519_v16, %v4636_v37 }
 0x416   : > { %2648 = vst [vmem:[%s4929_s11 + $0x1f0] sm:$0xff] %v2584_v52 }
 0x417 PF: > { %s16_s21 = sadd.s32 1, %s3536_s21  }
 0x418   : > { %p13_p4 = scmp.ge.s32.totalorder %s16_s21, 4  }
 0x41a   :  { %15 = sbr.rel (!%p13_p4) target bundleno = 1 (0x1), region = 77 }

</bundles_post_ra>
